<compile_context>
chip_gen: v6e
topology: v6e:2x2x1
jax: 0.10.0
libtpu: 0.0.40
codegen_flags: <defaults>
</compile_context>

<pallas_src>
import functools
import numpy as np
import jax
import jax.numpy as jnp
from jax.experimental import pallas as pl
from jax.experimental.pallas import tpu as pltpu


def _round_up(x, m):
    return (x + m - 1) // m * m


# ----------------------------- kernel helpers ---------------------------------
def _convt_pre(x_hwc, w_ref, ycat_ref, acc_ref):
    """Pre-activation ConvTranspose2d (stride 1, pad 0) == full correlation.

    x_hwc    : (Hin, Win, Cin)  f32 value, HWC layout
    w_ref    : (K, K*Cin, Cout) ref; w[p, q*Cin+ci, co] = w_pt[ci, co, K-1-p, K-1-q]
    ycat_ref : (Hin + 2*(K-1), Wslab, K*Cin) f32 VMEM scratch; Wslab >= Win+K-1 and
               Wslab % 8 == 0 so the per-p patch reshape is layout-preserving.
    acc_ref  : (Ho*Wslab, Cout) f32 VMEM accumulator
    returns  : (Ho*Wslab, Cout) f32; only rows a*Wslab + c with c < Win+K-1 valid.
    """
    Hin, Win, Cin = x_hwc.shape
    K, KCin, Cout = w_ref.shape
    Ho = Hin + K - 1
    Wslab = ycat_ref.shape[1]

    # Fused zero-pad + im2col over the q (kernel-column) axis:
    #   ycat[r, c, q*Cin + ci] = xpad[r, c + q, ci]   (xpad = x zero-padded by K-1)
    ycat_ref[...] = jnp.zeros_like(ycat_ref)
    for q in range(K):
        ycat_ref[K - 1:K - 1 + Hin,
                 K - 1 - q:K - 1 - q + Win,
                 q * Cin:(q + 1) * Cin] = x_hwc

    # K deep matmuls (contraction K*Cin) instead of K*K shallow ones.
    acc_ref[...] = jnp.zeros_like(acc_ref)
    for p in range(K):
        # free reshape: merges leading dims, middle dim Wslab is a multiple of 8
        patch = ycat_ref[p:p + Ho, :, :].reshape(Ho * Wslab, KCin)
        acc_ref[...] += jnp.dot(patch, w_ref[p],
                                preferred_element_type=jnp.float32)
    return acc_ref[...]


def _decoder_kernel(x_ref, w1_ref, b1_ref, w2_ref, b2c_ref, o_ref,
                    ycat1_ref, acc1_ref, ycat2_ref, acc2_ref, *, H, W):
    # x_ref : (Cin, H*W) one batch element in NCHW order (batch squeezed)
    # o_ref : (C2, Ho2*Wo2) lane-dense NCHW-ordered output slab for this element
    K = w1_ref.shape[0]
    Cin = x_ref.shape[0]
    C1 = w1_ref.shape[2]
    C2 = o_ref.shape[0]
    Ho1, Wo1 = H + K - 1, W + K - 1
    Ho2, Wo2 = Ho1 + K - 1, Wo1 + K - 1
    Wp1 = ycat1_ref.shape[1]
    Wp2 = ycat2_ref.shape[1]

    # NCHW block -> HWC: one small 2-D transpose + a free leading-dim split.
    x_hwc = jnp.transpose(x_ref[...].astype(jnp.float32)).reshape(H, W, Cin)

    # ---- layer 1: ConvTranspose2d(16 -> 6, k=5) + bias + ReLU (stays in VMEM) --
    z1 = _convt_pre(x_hwc, w1_ref, ycat1_ref, acc1_ref)            # (Ho1*Wp1, C1)
    h = jnp.maximum(z1 + b1_ref[...], 0.0).reshape(Ho1, Wp1, C1)[:, :Wo1, :]

    # ---- layer 2: ConvTranspose2d(6 -> C2, k=5) + bias + ReLU ------------------
    z2 = _convt_pre(h, w2_ref, ycat2_ref, acc2_ref)                # (Ho2*Wp2, 128)
    if Wp2 != Wo2:   # generic fallback; not taken for the shapes in this script
        z2 = z2.reshape(Ho2, Wp2, -1)[:, :Wo2, :].reshape(Ho2 * Wo2, -1)
    z2t = jnp.transpose(z2)                                        # (128, S2) aligned
    y = jnp.maximum(z2t[0:C2, :] + b2c_ref[...], 0.0)              # (C2, S2)
    o_ref[...] = y.astype(o_ref.dtype)


# ------------------------------- wrappers --------------------------------------
def prepare_decoder_params(params):
    """One-time weight massaging (done at parameter-load time, not per call)."""
    def prep_w(w_pt, pad_cout_to=None):
        # PyTorch ConvTranspose2d weight layout: (Cin, Cout, K, K).
        Cin, Cout, K, _ = w_pt.shape
        # effective full-correlation kernel: w_eff[p,q,ci,co] = w[ci,co,K-1-p,K-1-q]
        w_eff = jnp.transpose(w_pt[:, :, ::-1, ::-1], (2, 3, 0, 1))   # (K,K,Cin,Cout)
        w_eff = w_eff.reshape(K, K * Cin, Cout)                       # q-major flatten
        if pad_cout_to is not None and pad_cout_to > Cout:
            w_eff = jnp.pad(w_eff, ((0, 0), (0, 0), (0, pad_cout_to - Cout)))
        return jnp.asarray(w_eff, jnp.float32)

    return {
        "w1p": prep_w(params["w1"]),                                  # (K, K*16, 6)
        "b1":  jnp.asarray(params["b1"], jnp.float32).reshape(1, -1), # (1, 6)
        # layer-2 Cout lane-padded to 128 -> tile-aligned transpose, dense store
        "w2p": prep_w(params["w2"], pad_cout_to=128),                 # (K, K*6, 128)
        "b2c": jnp.asarray(params["b2"], jnp.float32).reshape(-1, 1), # (C2, 1)
    }


@jax.jit
def decoder_forward(x_nchw, prepared):
    """Matches PyTorch Decoder.forward (NCHW in, NCHW out), activation='relu'."""
    N, Cin, H, W = x_nchw.shape
    w1p, b1 = prepared["w1p"], prepared["b1"]
    w2p, b2c = prepared["w2p"], prepared["b2c"]
    K = w1p.shape[0]
    C1 = w1p.shape[2]
    C2p = w2p.shape[2]            # lane-padded (128)
    C2 = b2c.shape[0]             # true output channels
    Ho1, Wo1 = H + K - 1, W + K - 1
    Ho2, Wo2 = Ho1 + K - 1, Wo1 + K - 1
    Wp1 = _round_up(Wo1, 8)       # sublane-aligned slab widths -> free reshapes
    Wp2 = _round_up(Wo2, 8)

    x2d = x_nchw.reshape(N, Cin, H * W)   # free bitcast; no wrapper transpose op

    kernel = functools.partial(_decoder_kernel, H=H, W=W)

    out2d = pl.pallas_call(
        kernel,
        out_shape=jax.ShapeDtypeStruct((N, C2, Ho2 * Wo2), x_nchw.dtype),
        grid=(N,),
        in_specs=[
            pl.BlockSpec((None, Cin, H * W), lambda n: (n, 0, 0)),
            pl.BlockSpec(w1p.shape, lambda n: (0, 0, 0)),
            pl.BlockSpec(b1.shape, lambda n: (0, 0)),
            pl.BlockSpec(w2p.shape, lambda n: (0, 0, 0)),
            pl.BlockSpec(b2c.shape, lambda n: (0, 0)),
        ],
        out_specs=pl.BlockSpec((None, C2, Ho2 * Wo2), lambda n: (n, 0, 0)),
        scratch_shapes=[
            pltpu.VMEM((H + 2 * (K - 1), Wp1, K * Cin), jnp.float32),   # ycat1
            pltpu.VMEM((Ho1 * Wp1, C1), jnp.float32),                   # acc1
            pltpu.VMEM((Ho1 + 2 * (K - 1), Wp2, K * C1), jnp.float32),  # ycat2
            pltpu.VMEM((Ho2 * Wp2, C2p), jnp.float32),                  # acc2
        ],
        compiler_params=pltpu.CompilerParams(
            dimension_semantics=("parallel",)),
    )(x2d, w1p, b1, w2p, b2c)

    return out2d.reshape(N, C2, Ho2, Wo2)             # free metadata reshape


# ---------------- reference (numpy, direct ConvTranspose2d definition) ---------
def _ref_convT_relu_nchw(x, w, b):
    N, Cin, H, W = x.shape
    _, Cout, K, _ = w.shape
    Ho, Wo = H + K - 1, W + K - 1
    y = np.zeros((N, Cout, Ho, Wo), np.float64)
    for n in range(N):
        for ci in range(Cin):
            for co in range(Cout):
                for a in range(H):
                    for c in range(W):
                        y[n, co, a:a + K, c:c + K] += x[n, ci, a, c] * w[ci, co]
    y += b.reshape(1, Cout, 1, 1)
    return np.maximum(y, 0.0).astype(np.float32)


if __name__ == "__main__":
    key = jax.random.PRNGKey(0)
    k1, k2, k3, k4, k5 = jax.random.split(key, 5)

    # latent input to the decoder: 16 channels (required by ConvTranspose2d(16, 6, 5))
    N, Cin, H, W = 2, 16, 8, 8
    C_img = 3  # input_shape[0] of the autoencoder, e.g. (3, 16, 16)
    x = jax.random.normal(k1, (N, Cin, H, W), jnp.float32)

    # deterministic synthetic parameters (PyTorch weight layout: (Cin, Cout, K, K))
    params = {
        "w1": 0.05 * jax.random.normal(k2, (16, 6, 5, 5), jnp.float32),
        "b1": 0.05 * jax.random.normal(k3, (6,), jnp.float32),
        "w2": 0.05 * jax.random.normal(k4, (6, C_img, 5, 5), jnp.float32),
        "b2": 0.05 * jax.random.normal(k5, (C_img,), jnp.float32),
    }
    prepared = prepare_decoder_params(params)

    out = jax.block_until_ready(decoder_forward(x, prepared))
    assert out.shape == (N, C_img, H + 8, W + 8), out.shape

    # verify against a direct numpy implementation of ConvTranspose2d + ReLU
    xr = np.asarray(x, np.float64)
    h_ref = _ref_convT_relu_nchw(xr, np.asarray(params["w1"], np.float64),
                                 np.asarray(params["b1"], np.float64))
    y_ref = _ref_convT_relu_nchw(h_ref.astype(np.float64),
                                 np.asarray(params["w2"], np.float64),
                                 np.asarray(params["b2"], np.float64))
    np.testing.assert_allclose(np.asarray(out), y_ref, rtol=1e-4, atol=1e-4)

    print("KERNEL_OK")
</pallas_src>

<mosaic_0001>
module attributes {stable_mosaic.version = 11 : i64} {
  func.func @_decoder_kernel(%arg0: i32, %arg1: memref<1x16x64xf32, #tpu.memory_space<vmem>>, %arg2: memref<5x80x6xf32, #tpu.memory_space<vmem>>, %arg3: memref<1x6xf32, #tpu.memory_space<vmem>>, %arg4: memref<5x30x128xf32, #tpu.memory_space<vmem>>, %arg5: memref<3x1xf32, #tpu.memory_space<vmem>>, %arg6: memref<1x3x256xf32, #tpu.memory_space<vmem>>, %arg7: memref<16x16x80xf32, #tpu.memory_space<vmem>>, %arg8: memref<192x6xf32, #tpu.memory_space<vmem>>, %arg9: memref<20x16x30xf32, #tpu.memory_space<vmem>>, %arg10: memref<256x128xf32, #tpu.memory_space<vmem>>) attributes {dimension_semantics = [#tpu.dimension_semantics<parallel>], iteration_bounds = array<i64: 2>, scalar_prefetch = 0 : i64, scratch_operands = 4 : i64, tpu.core_type = #tpu.core_type<tc>, window_params = [{transform_indices = @transform_0, window_bounds = array<i64: 1, 16, 64>}, {pipeline_mode = #tpu.pipeline_mode<synchronous>, transform_indices = @transform_1, window_bounds = array<i64: 5, 80, 6>}, {pipeline_mode = #tpu.pipeline_mode<synchronous>, transform_indices = @transform_2, window_bounds = array<i64: 1, 6>}, {pipeline_mode = #tpu.pipeline_mode<synchronous>, transform_indices = @transform_3, window_bounds = array<i64: 5, 30, 128>}, {pipeline_mode = #tpu.pipeline_mode<synchronous>, transform_indices = @transform_4, window_bounds = array<i64: 3, 1>}, {transform_indices = @transform_5, window_bounds = array<i64: 1, 3, 256>}]} {
    %c0 = arith.constant 0 : index
    %c0_0 = arith.constant 0 : index
    %c0_1 = arith.constant 0 : index
    %0 = vector.load %arg1[%c0, %c0_0, %c0_1] : memref<1x16x64xf32, #tpu.memory_space<vmem>>, vector<1x16x64xf32>
    %1 = vector.shape_cast %0 : vector<1x16x64xf32> to vector<16x64xf32>
    %2 = tpu.transpose %1, [1, 0] : vector<16x64xf32> -> vector<64x16xf32>
    %3 = vector.shape_cast %2 : vector<64x16xf32> to vector<8x8x16xf32>
    %cst = arith.constant 0.000000e+00 : f32
    %4 = vector.broadcast %cst : f32 to vector<16x16x80xf32>
    %c0_2 = arith.constant 0 : index
    %c0_3 = arith.constant 0 : index
    %c0_4 = arith.constant 0 : index
    %5 = vector.load %arg7[%c0_2, %c0_3, %c0_4] : memref<16x16x80xf32, #tpu.memory_space<vmem>>, vector<16x16x80xf32>
    tpu.vector_store %arg7[%c0_2, %c0_3, %c0_4], %4 {strides = array<i32>} : memref<16x16x80xf32, #tpu.memory_space<vmem>>, vector<16x16x80xf32>,
    %c4 = arith.constant 4 : index
    %c4_5 = arith.constant 4 : index
    %c0_6 = arith.constant 0 : index
    %6 = vector.load %arg7[%c4, %c4_5, %c0_6] : memref<16x16x80xf32, #tpu.memory_space<vmem>>, vector<8x8x16xf32>
    tpu.vector_store %arg7[%c4, %c4_5, %c0_6], %3 {strides = array<i32>} : memref<16x16x80xf32, #tpu.memory_space<vmem>>, vector<8x8x16xf32>,
    %c4_7 = arith.constant 4 : index
    %c3 = arith.constant 3 : index
    %c16 = arith.constant 16 : index
    %7 = vector.load %arg7[%c4_7, %c3, %c16] : memref<16x16x80xf32, #tpu.memory_space<vmem>>, vector<8x8x16xf32>
    tpu.vector_store %arg7[%c4_7, %c3, %c16], %3 {strides = array<i32>} : memref<16x16x80xf32, #tpu.memory_space<vmem>>, vector<8x8x16xf32>,
    %c4_8 = arith.constant 4 : index
    %c2 = arith.constant 2 : index
    %c32 = arith.constant 32 : index
    %8 = vector.load %arg7[%c4_8, %c2, %c32] : memref<16x16x80xf32, #tpu.memory_space<vmem>>, vector<8x8x16xf32>
    tpu.vector_store %arg7[%c4_8, %c2, %c32], %3 {strides = array<i32>} : memref<16x16x80xf32, #tpu.memory_space<vmem>>, vector<8x8x16xf32>,
    %c4_9 = arith.constant 4 : index
    %c1 = arith.constant 1 : index
    %c48 = arith.constant 48 : index
    %9 = vector.load %arg7[%c4_9, %c1, %c48] : memref<16x16x80xf32, #tpu.memory_space<vmem>>, vector<8x8x16xf32>
    tpu.vector_store %arg7[%c4_9, %c1, %c48], %3 {strides = array<i32>} : memref<16x16x80xf32, #tpu.memory_space<vmem>>, vector<8x8x16xf32>,
    %c4_10 = arith.constant 4 : index
    %c0_11 = arith.constant 0 : index
    %c64 = arith.constant 64 : index
    %10 = vector.load %arg7[%c4_10, %c0_11, %c64] : memref<16x16x80xf32, #tpu.memory_space<vmem>>, vector<8x8x16xf32>
    tpu.vector_store %arg7[%c4_10, %c0_11, %c64], %3 {strides = array<i32>} : memref<16x16x80xf32, #tpu.memory_space<vmem>>, vector<8x8x16xf32>,
    %cst_12 = arith.constant 0.000000e+00 : f32
    %11 = vector.broadcast %cst_12 : f32 to vector<192x6xf32>
    %c0_13 = arith.constant 0 : index
    %c0_14 = arith.constant 0 : index
    %12 = vector.load %arg8[%c0_13, %c0_14] : memref<192x6xf32, #tpu.memory_space<vmem>>, vector<192x6xf32>
    tpu.vector_store %arg8[%c0_13, %c0_14], %11 {strides = array<i32>} : memref<192x6xf32, #tpu.memory_space<vmem>>, vector<192x6xf32>,
    %c0_15 = arith.constant 0 : index
    %c0_16 = arith.constant 0 : index
    %c0_17 = arith.constant 0 : index
    %13 = vector.load %arg7[%c0_15, %c0_16, %c0_17] : memref<16x16x80xf32, #tpu.memory_space<vmem>>, vector<12x16x80xf32>
    %14 = vector.shape_cast %13 : vector<12x16x80xf32> to vector<192x80xf32>
    %c0_18 = arith.constant 0 : index
    %c0_19 = arith.constant 0 : index
    %15 = vector.load %arg8[%c0_18, %c0_19] : memref<192x6xf32, #tpu.memory_space<vmem>>, vector<192x6xf32>
    %c0_20 = arith.constant 0 : index
    %c0_21 = arith.constant 0 : index
    %c0_22 = arith.constant 0 : index
    %16 = vector.load %arg2[%c0_20, %c0_21, %c0_22] : memref<5x80x6xf32, #tpu.memory_space<vmem>>, vector<1x80x6xf32>
    %17 = vector.shape_cast %16 : vector<1x80x6xf32> to vector<80x6xf32>
    %cst_23 = arith.constant dense<0.000000e+00> : vector<192x6xf32>
    %18 = tpu.matmul %14, %17, %cst_23 {dimension_numbers = #tpu.dot_dimension_numbers<[1], [0], [0], [1], [0, 0, 1, 1], [], []>} : vector<192x80xf32>, vector<80x6xf32>, vector<192x6xf32> -> vector<192x6xf32>
    %19 = arith.addf %15, %18 : vector<192x6xf32>
    %c0_24 = arith.constant 0 : index
    %c0_25 = arith.constant 0 : index
    %20 = vector.load %arg8[%c0_24, %c0_25] : memref<192x6xf32, #tpu.memory_space<vmem>>, vector<192x6xf32>
    tpu.vector_store %arg8[%c0_24, %c0_25], %19 {strides = array<i32>} : memref<192x6xf32, #tpu.memory_space<vmem>>, vector<192x6xf32>,
    %c1_26 = arith.constant 1 : index
    %c0_27 = arith.constant 0 : index
    %c0_28 = arith.constant 0 : index
    %21 = vector.load %arg7[%c1_26, %c0_27, %c0_28] : memref<16x16x80xf32, #tpu.memory_space<vmem>>, vector<12x16x80xf32>
    %22 = vector.shape_cast %21 : vector<12x16x80xf32> to vector<192x80xf32>
    %c0_29 = arith.constant 0 : index
    %c0_30 = arith.constant 0 : index
    %23 = vector.load %arg8[%c0_29, %c0_30] : memref<192x6xf32, #tpu.memory_space<vmem>>, vector<192x6xf32>
    %c1_31 = arith.constant 1 : index
    %c0_32 = arith.constant 0 : index
    %c0_33 = arith.constant 0 : index
    %24 = vector.load %arg2[%c1_31, %c0_32, %c0_33] : memref<5x80x6xf32, #tpu.memory_space<vmem>>, vector<1x80x6xf32>
    %25 = vector.shape_cast %24 : vector<1x80x6xf32> to vector<80x6xf32>
    %cst_34 = arith.constant dense<0.000000e+00> : vector<192x6xf32>
    %26 = tpu.matmul %22, %25, %cst_34 {dimension_numbers = #tpu.dot_dimension_numbers<[1], [0], [0], [1], [0, 0, 1, 1], [], []>} : vector<192x80xf32>, vector<80x6xf32>, vector<192x6xf32> -> vector<192x6xf32>
    %27 = arith.addf %23, %26 : vector<192x6xf32>
    %c0_35 = arith.constant 0 : index
    %c0_36 = arith.constant 0 : index
    %28 = vector.load %arg8[%c0_35, %c0_36] : memref<192x6xf32, #tpu.memory_space<vmem>>, vector<192x6xf32>
    tpu.vector_store %arg8[%c0_35, %c0_36], %27 {strides = array<i32>} : memref<192x6xf32, #tpu.memory_space<vmem>>, vector<192x6xf32>,
    %c2_37 = arith.constant 2 : index
    %c0_38 = arith.constant 0 : index
    %c0_39 = arith.constant 0 : index
    %29 = vector.load %arg7[%c2_37, %c0_38, %c0_39] : memref<16x16x80xf32, #tpu.memory_space<vmem>>, vector<12x16x80xf32>
    %30 = vector.shape_cast %29 : vector<12x16x80xf32> to vector<192x80xf32>
    %c0_40 = arith.constant 0 : index
    %c0_41 = arith.constant 0 : index
    %31 = vector.load %arg8[%c0_40, %c0_41] : memref<192x6xf32, #tpu.memory_space<vmem>>, vector<192x6xf32>
    %c2_42 = arith.constant 2 : index
    %c0_43 = arith.constant 0 : index
    %c0_44 = arith.constant 0 : index
    %32 = vector.load %arg2[%c2_42, %c0_43, %c0_44] : memref<5x80x6xf32, #tpu.memory_space<vmem>>, vector<1x80x6xf32>
    %33 = vector.shape_cast %32 : vector<1x80x6xf32> to vector<80x6xf32>
    %cst_45 = arith.constant dense<0.000000e+00> : vector<192x6xf32>
    %34 = tpu.matmul %30, %33, %cst_45 {dimension_numbers = #tpu.dot_dimension_numbers<[1], [0], [0], [1], [0, 0, 1, 1], [], []>} : vector<192x80xf32>, vector<80x6xf32>, vector<192x6xf32> -> vector<192x6xf32>
    %35 = arith.addf %31, %34 : vector<192x6xf32>
    %c0_46 = arith.constant 0 : index
    %c0_47 = arith.constant 0 : index
    %36 = vector.load %arg8[%c0_46, %c0_47] : memref<192x6xf32, #tpu.memory_space<vmem>>, vector<192x6xf32>
    tpu.vector_store %arg8[%c0_46, %c0_47], %35 {strides = array<i32>} : memref<192x6xf32, #tpu.memory_space<vmem>>, vector<192x6xf32>,
    %c3_48 = arith.constant 3 : index
    %c0_49 = arith.constant 0 : index
    %c0_50 = arith.constant 0 : index
    %37 = vector.load %arg7[%c3_48, %c0_49, %c0_50] : memref<16x16x80xf32, #tpu.memory_space<vmem>>, vector<12x16x80xf32>
    %38 = vector.shape_cast %37 : vector<12x16x80xf32> to vector<192x80xf32>
    %c0_51 = arith.constant 0 : index
    %c0_52 = arith.constant 0 : index
    %39 = vector.load %arg8[%c0_51, %c0_52] : memref<192x6xf32, #tpu.memory_space<vmem>>, vector<192x6xf32>
    %c3_53 = arith.constant 3 : index
    %c0_54 = arith.constant 0 : index
    %c0_55 = arith.constant 0 : index
    %40 = vector.load %arg2[%c3_53, %c0_54, %c0_55] : memref<5x80x6xf32, #tpu.memory_space<vmem>>, vector<1x80x6xf32>
    %41 = vector.shape_cast %40 : vector<1x80x6xf32> to vector<80x6xf32>
    %cst_56 = arith.constant dense<0.000000e+00> : vector<192x6xf32>
    %42 = tpu.matmul %38, %41, %cst_56 {dimension_numbers = #tpu.dot_dimension_numbers<[1], [0], [0], [1], [0, 0, 1, 1], [], []>} : vector<192x80xf32>, vector<80x6xf32>, vector<192x6xf32> -> vector<192x6xf32>
    %43 = arith.addf %39, %42 : vector<192x6xf32>
    %c0_57 = arith.constant 0 : index
    %c0_58 = arith.constant 0 : index
    %44 = vector.load %arg8[%c0_57, %c0_58] : memref<192x6xf32, #tpu.memory_space<vmem>>, vector<192x6xf32>
    tpu.vector_store %arg8[%c0_57, %c0_58], %43 {strides = array<i32>} : memref<192x6xf32, #tpu.memory_space<vmem>>, vector<192x6xf32>,
    %c4_59 = arith.constant 4 : index
    %c0_60 = arith.constant 0 : index
    %c0_61 = arith.constant 0 : index
    %45 = vector.load %arg7[%c4_59, %c0_60, %c0_61] : memref<16x16x80xf32, #tpu.memory_space<vmem>>, vector<12x16x80xf32>
    %46 = vector.shape_cast %45 : vector<12x16x80xf32> to vector<192x80xf32>
    %c0_62 = arith.constant 0 : index
    %c0_63 = arith.constant 0 : index
    %47 = vector.load %arg8[%c0_62, %c0_63] : memref<192x6xf32, #tpu.memory_space<vmem>>, vector<192x6xf32>
    %c4_64 = arith.constant 4 : index
    %c0_65 = arith.constant 0 : index
    %c0_66 = arith.constant 0 : index
    %48 = vector.load %arg2[%c4_64, %c0_65, %c0_66] : memref<5x80x6xf32, #tpu.memory_space<vmem>>, vector<1x80x6xf32>
    %49 = vector.shape_cast %48 : vector<1x80x6xf32> to vector<80x6xf32>
    %cst_67 = arith.constant dense<0.000000e+00> : vector<192x6xf32>
    %50 = tpu.matmul %46, %49, %cst_67 {dimension_numbers = #tpu.dot_dimension_numbers<[1], [0], [0], [1], [0, 0, 1, 1], [], []>} : vector<192x80xf32>, vector<80x6xf32>, vector<192x6xf32> -> vector<192x6xf32>
    %51 = arith.addf %47, %50 : vector<192x6xf32>
    %c0_68 = arith.constant 0 : index
    %c0_69 = arith.constant 0 : index
    %52 = vector.load %arg8[%c0_68, %c0_69] : memref<192x6xf32, #tpu.memory_space<vmem>>, vector<192x6xf32>
    tpu.vector_store %arg8[%c0_68, %c0_69], %51 {strides = array<i32>} : memref<192x6xf32, #tpu.memory_space<vmem>>, vector<192x6xf32>,
    %c0_70 = arith.constant 0 : index
    %c0_71 = arith.constant 0 : index
    %53 = vector.load %arg8[%c0_70, %c0_71] : memref<192x6xf32, #tpu.memory_space<vmem>>, vector<192x6xf32>
    %c0_72 = arith.constant 0 : index
    %c0_73 = arith.constant 0 : index
    %54 = vector.load %arg3[%c0_72, %c0_73] : memref<1x6xf32, #tpu.memory_space<vmem>>, vector<1x6xf32>
    %55 = vector.broadcast %54 : vector<1x6xf32> to vector<192x6xf32>
    %56 = arith.addf %53, %55 : vector<192x6xf32>
    %cst_74 = arith.constant 0.000000e+00 : f32
    %57 = vector.broadcast %cst_74 : f32 to vector<192x6xf32>
    %58 = arith.maximumf %56, %57 : vector<192x6xf32>
    %59 = vector.shape_cast %58 : vector<192x6xf32> to vector<12x16x6xf32>
    %60 = vector.extract_strided_slice %59 {offsets = [0, 0, 0], sizes = [12, 12, 6], strides = [1, 1, 1]} : vector<12x16x6xf32> to vector<12x12x6xf32>
    %cst_75 = arith.constant 0.000000e+00 : f32
    %61 = vector.broadcast %cst_75 : f32 to vector<20x16x30xf32>
    %c0_76 = arith.constant 0 : index
    %c0_77 = arith.constant 0 : index
    %c0_78 = arith.constant 0 : index
    %62 = vector.load %arg9[%c0_76, %c0_77, %c0_78] : memref<20x16x30xf32, #tpu.memory_space<vmem>>, vector<20x16x30xf32>
    tpu.vector_store %arg9[%c0_76, %c0_77, %c0_78], %61 {strides = array<i32>} : memref<20x16x30xf32, #tpu.memory_space<vmem>>, vector<20x16x30xf32>,
    %c4_79 = arith.constant 4 : index
    %c4_80 = arith.constant 4 : index
    %c0_81 = arith.constant 0 : index
    %63 = vector.load %arg9[%c4_79, %c4_80, %c0_81] : memref<20x16x30xf32, #tpu.memory_space<vmem>>, vector<12x12x6xf32>
    tpu.vector_store %arg9[%c4_79, %c4_80, %c0_81], %60 {strides = array<i32>} : memref<20x16x30xf32, #tpu.memory_space<vmem>>, vector<12x12x6xf32>,
    %c4_82 = arith.constant 4 : index
    %c3_83 = arith.constant 3 : index
    %c6 = arith.constant 6 : index
    %64 = vector.load %arg9[%c4_82, %c3_83, %c6] : memref<20x16x30xf32, #tpu.memory_space<vmem>>, vector<12x12x6xf32>
    tpu.vector_store %arg9[%c4_82, %c3_83, %c6], %60 {strides = array<i32>} : memref<20x16x30xf32, #tpu.memory_space<vmem>>, vector<12x12x6xf32>,
    %c4_84 = arith.constant 4 : index
    %c2_85 = arith.constant 2 : index
    %c12 = arith.constant 12 : index
    %65 = vector.load %arg9[%c4_84, %c2_85, %c12] : memref<20x16x30xf32, #tpu.memory_space<vmem>>, vector<12x12x6xf32>
    tpu.vector_store %arg9[%c4_84, %c2_85, %c12], %60 {strides = array<i32>} : memref<20x16x30xf32, #tpu.memory_space<vmem>>, vector<12x12x6xf32>,
    %c4_86 = arith.constant 4 : index
    %c1_87 = arith.constant 1 : index
    %c18 = arith.constant 18 : index
    %66 = vector.load %arg9[%c4_86, %c1_87, %c18] : memref<20x16x30xf32, #tpu.memory_space<vmem>>, vector<12x12x6xf32>
    tpu.vector_store %arg9[%c4_86, %c1_87, %c18], %60 {strides = array<i32>} : memref<20x16x30xf32, #tpu.memory_space<vmem>>, vector<12x12x6xf32>,
    %c4_88 = arith.constant 4 : index
    %c0_89 = arith.constant 0 : index
    %c24 = arith.constant 24 : index
    %67 = vector.load %arg9[%c4_88, %c0_89, %c24] : memref<20x16x30xf32, #tpu.memory_space<vmem>>, vector<12x12x6xf32>
    tpu.vector_store %arg9[%c4_88, %c0_89, %c24], %60 {strides = array<i32>} : memref<20x16x30xf32, #tpu.memory_space<vmem>>, vector<12x12x6xf32>,
    %cst_90 = arith.constant 0.000000e+00 : f32
    %68 = vector.broadcast %cst_90 : f32 to vector<256x128xf32>
    %c0_91 = arith.constant 0 : index
    %c0_92 = arith.constant 0 : index
    %69 = vector.load %arg10[%c0_91, %c0_92] : memref<256x128xf32, #tpu.memory_space<vmem>>, vector<256x128xf32>
    tpu.vector_store %arg10[%c0_91, %c0_92], %68 {strides = array<i32>} : memref<256x128xf32, #tpu.memory_space<vmem>>, vector<256x128xf32>,
    %c0_93 = arith.constant 0 : index
    %c0_94 = arith.constant 0 : index
    %c0_95 = arith.constant 0 : index
    %70 = vector.load %arg9[%c0_93, %c0_94, %c0_95] : memref<20x16x30xf32, #tpu.memory_space<vmem>>, vector<16x16x30xf32>
    %71 = vector.shape_cast %70 : vector<16x16x30xf32> to vector<256x30xf32>
    %c0_96 = arith.constant 0 : index
    %c0_97 = arith.constant 0 : index
    %72 = vector.load %arg10[%c0_96, %c0_97] : memref<256x128xf32, #tpu.memory_space<vmem>>, vector<256x128xf32>
    %c0_98 = arith.constant 0 : index
    %c0_99 = arith.constant 0 : index
    %c0_100 = arith.constant 0 : index
    %73 = vector.load %arg4[%c0_98, %c0_99, %c0_100] : memref<5x30x128xf32, #tpu.memory_space<vmem>>, vector<1x30x128xf32>
    %74 = vector.shape_cast %73 : vector<1x30x128xf32> to vector<30x128xf32>
    %cst_101 = arith.constant dense<0.000000e+00> : vector<256x128xf32>
    %75 = tpu.matmul %71, %74, %cst_101 {dimension_numbers = #tpu.dot_dimension_numbers<[1], [0], [0], [1], [0, 0, 1, 1], [], []>} : vector<256x30xf32>, vector<30x128xf32>, vector<256x128xf32> -> vector<256x128xf32>
    %76 = arith.addf %72, %75 : vector<256x128xf32>
    %c0_102 = arith.constant 0 : index
    %c0_103 = arith.constant 0 : index
    %77 = vector.load %arg10[%c0_102, %c0_103] : memref<256x128xf32, #tpu.memory_space<vmem>>, vector<256x128xf32>
    tpu.vector_store %arg10[%c0_102, %c0_103], %76 {strides = array<i32>} : memref<256x128xf32, #tpu.memory_space<vmem>>, vector<256x128xf32>,
    %c1_104 = arith.constant 1 : index
    %c0_105 = arith.constant 0 : index
    %c0_106 = arith.constant 0 : index
    %78 = vector.load %arg9[%c1_104, %c0_105, %c0_106] : memref<20x16x30xf32, #tpu.memory_space<vmem>>, vector<16x16x30xf32>
    %79 = vector.shape_cast %78 : vector<16x16x30xf32> to vector<256x30xf32>
    %c0_107 = arith.constant 0 : index
    %c0_108 = arith.constant 0 : index
    %80 = vector.load %arg10[%c0_107, %c0_108] : memref<256x128xf32, #tpu.memory_space<vmem>>, vector<256x128xf32>
    %c1_109 = arith.constant 1 : index
    %c0_110 = arith.constant 0 : index
    %c0_111 = arith.constant 0 : index
    %81 = vector.load %arg4[%c1_109, %c0_110, %c0_111] : memref<5x30x128xf32, #tpu.memory_space<vmem>>, vector<1x30x128xf32>
    %82 = vector.shape_cast %81 : vector<1x30x128xf32> to vector<30x128xf32>
    %cst_112 = arith.constant dense<0.000000e+00> : vector<256x128xf32>
    %83 = tpu.matmul %79, %82, %cst_112 {dimension_numbers = #tpu.dot_dimension_numbers<[1], [0], [0], [1], [0, 0, 1, 1], [], []>} : vector<256x30xf32>, vector<30x128xf32>, vector<256x128xf32> -> vector<256x128xf32>
    %84 = arith.addf %80, %83 : vector<256x128xf32>
    %c0_113 = arith.constant 0 : index
    %c0_114 = arith.constant 0 : index
    %85 = vector.load %arg10[%c0_113, %c0_114] : memref<256x128xf32, #tpu.memory_space<vmem>>, vector<256x128xf32>
    tpu.vector_store %arg10[%c0_113, %c0_114], %84 {strides = array<i32>} : memref<256x128xf32, #tpu.memory_space<vmem>>, vector<256x128xf32>,
    %c2_115 = arith.constant 2 : index
    %c0_116 = arith.constant 0 : index
    %c0_117 = arith.constant 0 : index
    %86 = vector.load %arg9[%c2_115, %c0_116, %c0_117] : memref<20x16x30xf32, #tpu.memory_space<vmem>>, vector<16x16x30xf32>
    %87 = vector.shape_cast %86 : vector<16x16x30xf32> to vector<256x30xf32>
    %c0_118 = arith.constant 0 : index
    %c0_119 = arith.constant 0 : index
    %88 = vector.load %arg10[%c0_118, %c0_119] : memref<256x128xf32, #tpu.memory_space<vmem>>, vector<256x128xf32>
    %c2_120 = arith.constant 2 : index
    %c0_121 = arith.constant 0 : index
    %c0_122 = arith.constant 0 : index
    %89 = vector.load %arg4[%c2_120, %c0_121, %c0_122] : memref<5x30x128xf32, #tpu.memory_space<vmem>>, vector<1x30x128xf32>
    %90 = vector.shape_cast %89 : vector<1x30x128xf32> to vector<30x128xf32>
    %cst_123 = arith.constant dense<0.000000e+00> : vector<256x128xf32>
    %91 = tpu.matmul %87, %90, %cst_123 {dimension_numbers = #tpu.dot_dimension_numbers<[1], [0], [0], [1], [0, 0, 1, 1], [], []>} : vector<256x30xf32>, vector<30x128xf32>, vector<256x128xf32> -> vector<256x128xf32>
    %92 = arith.addf %88, %91 : vector<256x128xf32>
    %c0_124 = arith.constant 0 : index
    %c0_125 = arith.constant 0 : index
    %93 = vector.load %arg10[%c0_124, %c0_125] : memref<256x128xf32, #tpu.memory_space<vmem>>, vector<256x128xf32>
    tpu.vector_store %arg10[%c0_124, %c0_125], %92 {strides = array<i32>} : memref<256x128xf32, #tpu.memory_space<vmem>>, vector<256x128xf32>,
    %c3_126 = arith.constant 3 : index
    %c0_127 = arith.constant 0 : index
    %c0_128 = arith.constant 0 : index
    %94 = vector.load %arg9[%c3_126, %c0_127, %c0_128] : memref<20x16x30xf32, #tpu.memory_space<vmem>>, vector<16x16x30xf32>
    %95 = vector.shape_cast %94 : vector<16x16x30xf32> to vector<256x30xf32>
    %c0_129 = arith.constant 0 : index
    %c0_130 = arith.constant 0 : index
    %96 = vector.load %arg10[%c0_129, %c0_130] : memref<256x128xf32, #tpu.memory_space<vmem>>, vector<256x128xf32>
    %c3_131 = arith.constant 3 : index
    %c0_132 = arith.constant 0 : index
    %c0_133 = arith.constant 0 : index
    %97 = vector.load %arg4[%c3_131, %c0_132, %c0_133] : memref<5x30x128xf32, #tpu.memory_space<vmem>>, vector<1x30x128xf32>
    %98 = vector.shape_cast %97 : vector<1x30x128xf32> to vector<30x128xf32>
    %cst_134 = arith.constant dense<0.000000e+00> : vector<256x128xf32>
    %99 = tpu.matmul %95, %98, %cst_134 {dimension_numbers = #tpu.dot_dimension_numbers<[1], [0], [0], [1], [0, 0, 1, 1], [], []>} : vector<256x30xf32>, vector<30x128xf32>, vector<256x128xf32> -> vector<256x128xf32>
    %100 = arith.addf %96, %99 : vector<256x128xf32>
    %c0_135 = arith.constant 0 : index
    %c0_136 = arith.constant 0 : index
    %101 = vector.load %arg10[%c0_135, %c0_136] : memref<256x128xf32, #tpu.memory_space<vmem>>, vector<256x128xf32>
    tpu.vector_store %arg10[%c0_135, %c0_136], %100 {strides = array<i32>} : memref<256x128xf32, #tpu.memory_space<vmem>>, vector<256x128xf32>,
    %c4_137 = arith.constant 4 : index
    %c0_138 = arith.constant 0 : index
    %c0_139 = arith.constant 0 : index
    %102 = vector.load %arg9[%c4_137, %c0_138, %c0_139] : memref<20x16x30xf32, #tpu.memory_space<vmem>>, vector<16x16x30xf32>
    %103 = vector.shape_cast %102 : vector<16x16x30xf32> to vector<256x30xf32>
    %c0_140 = arith.constant 0 : index
    %c0_141 = arith.constant 0 : index
    %104 = vector.load %arg10[%c0_140, %c0_141] : memref<256x128xf32, #tpu.memory_space<vmem>>, vector<256x128xf32>
    %c4_142 = arith.constant 4 : index
    %c0_143 = arith.constant 0 : index
    %c0_144 = arith.constant 0 : index
    %105 = vector.load %arg4[%c4_142, %c0_143, %c0_144] : memref<5x30x128xf32, #tpu.memory_space<vmem>>, vector<1x30x128xf32>
    %106 = vector.shape_cast %105 : vector<1x30x128xf32> to vector<30x128xf32>
    %cst_145 = arith.constant dense<0.000000e+00> : vector<256x128xf32>
    %107 = tpu.matmul %103, %106, %cst_145 {dimension_numbers = #tpu.dot_dimension_numbers<[1], [0], [0], [1], [0, 0, 1, 1], [], []>} : vector<256x30xf32>, vector<30x128xf32>, vector<256x128xf32> -> vector<256x128xf32>
    %108 = arith.addf %104, %107 : vector<256x128xf32>
    %c0_146 = arith.constant 0 : index
    %c0_147 = arith.constant 0 : index
    %109 = vector.load %arg10[%c0_146, %c0_147] : memref<256x128xf32, #tpu.memory_space<vmem>>, vector<256x128xf32>
    tpu.vector_store %arg10[%c0_146, %c0_147], %108 {strides = array<i32>} : memref<256x128xf32, #tpu.memory_space<vmem>>, vector<256x128xf32>,
    %c0_148 = arith.constant 0 : index
    %c0_149 = arith.constant 0 : index
    %110 = vector.load %arg10[%c0_148, %c0_149] : memref<256x128xf32, #tpu.memory_space<vmem>>, vector<256x128xf32>
    %111 = tpu.transpose %110, [1, 0] : vector<256x128xf32> -> vector<128x256xf32>
    %112 = vector.extract_strided_slice %111 {offsets = [0, 0], sizes = [3, 256], strides = [1, 1]} : vector<128x256xf32> to vector<3x256xf32>
    %c0_150 = arith.constant 0 : index
    %c0_151 = arith.constant 0 : index
    %113 = vector.load %arg5[%c0_150, %c0_151] : memref<3x1xf32, #tpu.memory_space<vmem>>, vector<3x1xf32>
    %114 = vector.broadcast %113 : vector<3x1xf32> to vector<3x256xf32>
    %115 = arith.addf %112, %114 : vector<3x256xf32>
    %cst_152 = arith.constant 0.000000e+00 : f32
    %116 = vector.broadcast %cst_152 : f32 to vector<3x256xf32>
    %117 = arith.maximumf %115, %116 : vector<3x256xf32>
    %c0_153 = arith.constant 0 : index
    %c0_154 = arith.constant 0 : index
    %c0_155 = arith.constant 0 : index
    %118 = vector.load %arg6[%c0_153, %c0_154, %c0_155] : memref<1x3x256xf32, #tpu.memory_space<vmem>>, vector<1x3x256xf32>
    %119 = vector.shape_cast %118 : vector<1x3x256xf32> to vector<3x256xf32>
    %120 = vector.shape_cast %117 : vector<3x256xf32> to vector<1x3x256xf32>
    tpu.vector_store %arg6[%c0_153, %c0_154, %c0_155], %120 {strides = array<i32>} : memref<1x3x256xf32, #tpu.memory_space<vmem>>, vector<1x3x256xf32>,
    return
  }
  func.func @transform_0(%arg0: i32) -> (i32, i32, i32) {
    %c0_i32 = arith.constant 0 : i32
    %c0_i32_0 = arith.constant 0 : i32
    %c0_i32_1 = arith.constant 0 : i32
    return %arg0, %c0_i32, %c0_i32_0 : i32, i32, i32
  }
  func.func @transform_1(%arg0: i32) -> (i32, i32, i32) {
    %c0_i32 = arith.constant 0 : i32
    %c0_i32_0 = arith.constant 0 : i32
    %c0_i32_1 = arith.constant 0 : i32
    %c0_i32_2 = arith.constant 0 : i32
    return %c0_i32, %c0_i32_0, %c0_i32_1 : i32, i32, i32
  }
  func.func @transform_2(%arg0: i32) -> (i32, i32) {
    %c0_i32 = arith.constant 0 : i32
    %c0_i32_0 = arith.constant 0 : i32
    %c0_i32_1 = arith.constant 0 : i32
    return %c0_i32, %c0_i32_0 : i32, i32
  }
  func.func @transform_3(%arg0: i32) -> (i32, i32, i32) {
    %c0_i32 = arith.constant 0 : i32
    %c0_i32_0 = arith.constant 0 : i32
    %c0_i32_1 = arith.constant 0 : i32
    %c0_i32_2 = arith.constant 0 : i32
    return %c0_i32, %c0_i32_0, %c0_i32_1 : i32, i32, i32
  }
  func.func @transform_4(%arg0: i32) -> (i32, i32) {
    %c0_i32 = arith.constant 0 : i32
    %c0_i32_0 = arith.constant 0 : i32
    %c0_i32_1 = arith.constant 0 : i32
    return %c0_i32, %c0_i32_0 : i32, i32
  }
  func.func @transform_5(%arg0: i32) -> (i32, i32, i32) {
    %c0_i32 = arith.constant 0 : i32
    %c0_i32_0 = arith.constant 0 : i32
    %c0_i32_1 = arith.constant 0 : i32
    return %arg0, %c0_i32, %c0_i32_0 : i32, i32, i32
  }
}

</mosaic_0001>

<bundles_post_ra>
// kernel: decoder_forward.1
= control target key start
LH: loop header
LB: loop body
LE: loop exit
PB: predicated region body
PF: predicated region fallthrough
CT: control target
= control target key end

     0   :  { %s6682_s18 = smov 0   ;;  %s8577_s0 = inlined_call_operand.vmem [shape: f32[2,16,64], index: 0, kind: input, shape index: {}]   ;;  %s8578_s1 = inlined_call_operand.vmem [shape: f32[5,80,6], index: 1, kind: input, shape index: {}]   ;;  %s8579_s2 = inlined_call_operand.vmem [shape: f32[1,6], index: 2, kind: input, shape index: {}]   ;;  %s8580_s3 = inlined_call_operand.vmem [shape: f32[5,30,128], index: 3, kind: input, shape index: {}]   ;;  %s8581_s4 = inlined_call_operand.vmem [shape: f32[3,1], index: 4, kind: input, shape index: {}]   ;;  %s8582_s5 = inlined_call_operand.vmem [shape: f32[2,3,256], index: 5, kind: output, shape index: {}]  }
   0x1 LB: > { %s5337_s19 = sadd.s32 4294967295, %s6640_s18   ;;  %p5341_p0 = scmp.ge.s32.totalorder %s6640_s18, 1  ;;  %s6640_s18 = sphi %s6682_s18, %s15_s18  }
   0x2   : > { %p187_p1 = scmp.lt.s32.totalorder %s6640_s18, 3 }
   0x4   : > { %p188_p2 = pnand %p5341_p0, %p187_p1 }
   0x5   : > { %p215_p3 = scmp.lt.s32.totalorder (!%p188_p2), %s5337_s19, 1  ;;  %s6643_s16 = smov (!%p188_p2), 48  }
   0x6   : > { %191 = sbr.rel (%p188_p2) target bundleno = 1362 (0x552), region = 40  ;;  %s6644_s17 = smov (!%p188_p2), 16  }
   0x7   : > { %s6646_s21 = smov (!%p188_p2), 64   ;;  %s6647_s8 = smov (!%p188_p2), 24  }
   0x8   : > { %s6648_s9 = smov (!%p188_p2), 6   ;;  %s6649_s10 = smov (!%p188_p2), 12  }
   0x9   : > { %s6650_s11 = smov (!%p188_p2), 18  }
   0xb   : > { %s8584_s19 = smov (!%p215_p3, %s5337_s19), 1  ;;  %vm259_vm0 = vcmask 654336   ;;  %v6642_v0 = vmov 0.0   ;;  %v524_v3 = vld [vmem:[%s8578_s1 + $0x48] sm:$0xff]  ;;  %v523_v4 = vld [vmem:[%s8578_s1 + $0x40] sm:$0xff]  ;;  %v522_v5 = vld [vmem:[%s8578_s1 + $0x38] sm:$0xff] }
   0xc   : > { %260 = vst.msk [vmem:[#allocation2] sm:$0xff] %vm259_vm0, %v6642_v0  ;;  %261 = vst.msk [vmem:[#allocation2 + $0x8] sm:$0xff] %vm259_vm0, %v6642_v0  ;;  %s5690_s20 = sshll.u32 %s8584_s19, 4  ;;  %6042 = vmatprep.subr.mxu0 %v524_v3  ;;  %v521_v6 = vld [vmem:[%s8578_s1 + $0x30] sm:$0xff]  ;;  %v520_v7 = vld [vmem:[%s8578_s1 + $0x28] sm:$0xff]  ;;  %vm293_vm1 = vcmask 130048  }
   0xd   : > { %262 = vst.msk [vmem:[#allocation2 + $0x10] sm:$0xff] %vm259_vm0, %v6642_v0  ;;  %263 = vst.msk [vmem:[#allocation2 + $0x18] sm:$0xff] %vm259_vm0, %v6642_v0  ;;  %s219_s23 = scalar_lea.vmem %s8577_s0, %s5690_s20  ;;  %6043 = vmatpush3.msra.mxu0 %v524_v3  ;;  %v519_v8 = vld [vmem:[%s8578_s1 + $0x20] sm:$0xff]  ;;  %v5379_v9 = vld [vmem:[%s8578_s1 + $0x98] sm:$0xff]  ;;  %s6645_s20 = smov 32   ;;  %vm334_vm2 = vcmask 261248  }
   0xe   : > { %264 = vst.msk [vmem:[#allocation2 + $0x20] sm:$0xff] %vm259_vm0, %v6642_v0  ;;  %265 = vst.msk [vmem:[#allocation2 + $0x28] sm:$0xff] %vm259_vm0, %v6642_v0  ;;  %v225_v1 = vld [vmem:[%s219_s23] sm:$0xff]  ;;  %v226_v2 = vld [vmem:[%s219_s23 + $0x8] sm:$0xff]  ;;  %6044 = vmatprep.subr.mxu0 %v523_v4  ;;  %6098 = vmatprep.subr.mxu1 %v5379_v9  ;;  %vm367_vm3 = vcmask 392448   ;;  %vm400_vm4 = vcmask 523648  }
   0xf   : > { %266 = vst.msk [vmem:[#allocation2 + $0x30] sm:$0xff] %vm259_vm0, %v6642_v0  ;;  %267 = vst.msk [vmem:[#allocation2 + $0x38] sm:$0xff] %vm259_vm0, %v6642_v0  ;;  %227 = vxpose.xlu0.b32.start [1/2] (short) (narrow) %v225_v1, 64  ;;  %6045 = vmatpush3.msra.mxu0 %v523_v4  ;;  %v5378_v10 = vld [vmem:[%s8578_s1 + $0x90] sm:$0xff]  ;;  %v518_v11 = vld [vmem:[%s8578_s1 + $0x18] sm:$0xff]  ;;  %vm433_vm5 = vcmask 654848  }
  0x10   : > { %268 = vst.msk [vmem:[#allocation2 + $0x40] sm:$0xff] %vm259_vm0, %v6642_v0  ;;  %269 = vst.msk [vmem:[#allocation2 + $0x48] sm:$0xff] %vm259_vm0, %v6642_v0  ;;  %6046 = vmatprep.subr.mxu0 %v522_v5  ;;  %6099 = vmatpush3.msra.mxu1 %v5379_v9  ;;  %v5377_v12 = vld [vmem:[%s8578_s1 + $0x88] sm:$0xff]  ;;  %v517_v13 = vld [vmem:[%s8578_s1 + $0x10] sm:$0xff]  ;;  %vm442_vm6 = vcmask 48128   ;;  %vm2368_vm7 = vcmask 244736  }
  0x11   : > { %270 = vst.msk [vmem:[#allocation2 + $0x50] sm:$0xff] %vm259_vm0, %v6642_v0  ;;  %271 = vst.msk [vmem:[#allocation2 + $0x58] sm:$0xff] %vm259_vm0, %v6642_v0  ;;  %6047 = vmatpush3.msra.mxu0 %v522_v5  ;;  %6100 = vmatprep.subr.mxu1 %v5378_v10  ;;  %v5376_v14 = vld [vmem:[%s8578_s1 + $0x80] sm:$0xff]  ;;  %v516_v15 = vld [vmem:[%s8578_s1 + $0x8] sm:$0xff]  ;;  %vm3047_vm8 = vcmask 1045504   ;;  %vm2411_vm9 = vcmask 44032  }
  0x12   : > { %272 = vst.msk [vmem:[#allocation2 + $0x60] sm:$0xff] %vm259_vm0, %v6642_v0  ;;  %273 = vst.msk [vmem:[#allocation2 + $0x68] sm:$0xff] %vm259_vm0, %v6642_v0  ;;  %6048 = vmatprep.subr.mxu0 %v521_v6  ;;  %6101 = vmatpush3.msra.mxu1 %v5378_v10  ;;  %v5375_v16 = vld [vmem:[%s8578_s1 + $0x78] sm:$0xff]  ;;  %v515_v18 = vld [vmem:[%s8578_s1] sm:$0xff]  ;;  %vm2533_vm10 = vcmask 93232   ;;  %vm2531_vm11 = vcmask 97328  }
  0x13   : > { %274 = vst.msk [vmem:[#allocation2 + $0x70] sm:$0xff] %vm259_vm0, %v6642_v0  ;;  %275 = vst.msk [vmem:[#allocation2 + $0x78] sm:$0xff] %vm259_vm0, %v6642_v0  ;;  %228 = vxpose.xlu0.b32.end [2/2] (short) (narrow) %v226_v2, 64  ;;  %6049 = vmatpush3.msra.mxu0 %v521_v6  ;;  %v467_v17 = vld [vmem:[#allocation2] sm:$0xff]  ;;  %v5374_v19 = vld [vmem:[%s8578_s1 + $0x70] sm:$0xff]  ;;  %vm2631_vm12 = vcmask 142432  }
  0x14   : > { %276 = vst.msk [vmem:[#allocation2 + $0x80] sm:$0xff] %vm259_vm0, %v6642_v0  ;;  %277 = vst.msk [vmem:[#allocation2 + $0x88] sm:$0xff] %vm259_vm0, %v6642_v0  ;;  %6050 = vmatprep.subr.mxu0 %v520_v7  ;;  %6102 = vmatprep.subr.mxu1 %v5377_v12  ;;  %v468_v20 = vld [vmem:[#allocation2 + $0x8] sm:$0xff]  ;;  %v469_v22 = vld [vmem:[#allocation2 + $0x10] sm:$0xff]  ;;  %vm2629_vm13 = vcmask 146528   ;;  %vm2729_vm14 = vcmask 191632  }
  0x15   : > { %278 = vst.msk [vmem:[#allocation2 + $0x90] sm:$0xff] %vm259_vm0, %v6642_v0  ;;  %279 = vst.msk [vmem:[#allocation2 + $0x98] sm:$0xff] %vm259_vm0, %v6642_v0  ;;  %6051 = vmatpush3.msra.mxu0 %v520_v7  ;;  %6103 = vmatpush3.msra.mxu1 %v5377_v12  ;;  %v5373_v21 = vld [vmem:[%s8578_s1 + $0x68] sm:$0xff]  ;;  %v5372_v23 = vld [vmem:[%s8578_s1 + $0x60] sm:$0xff]  ;;  %vm2727_vm15 = vcmask 195728   ;;  %s5691_s15 = sshll.u32 %s8584_s19, 3 }
  0x16   : > { %280 = vst.msk [vmem:[#allocation2 + $0xa0] sm:$0xff] %vm259_vm0, %v6642_v0  ;;  %281 = vst.msk [vmem:[#allocation2 + $0xa8] sm:$0xff] %vm259_vm0, %v6642_v0  ;;  %6052 = vmatprep.subr.mxu0 %v519_v8  ;;  %6104 = vmatprep.subr.mxu1 %v5376_v14  ;;  %v470_v24 = vld [vmem:[#allocation2 + $0x18] sm:$0xff]  ;;  %v6822_v26 = vld [vmem:[#allocation2 + $0x20] sm:$0xff] }
  0x17   : > { %282 = vst.msk [vmem:[#allocation2 + $0xb0] sm:$0xff] %vm259_vm0, %v6642_v0  ;;  %283 = vst.msk [vmem:[#allocation2 + $0xb8] sm:$0xff] %vm259_vm0, %v6642_v0  ;;  %6053 = vmatpush3.msra.mxu0 %v519_v8  ;;  %6105 = vmatpush3.msra.mxu1 %v5376_v14  ;;  %v5371_v25 = vld [vmem:[%s8578_s1 + $0x58] sm:$0xff]  ;;  %v6824_v27 = vld [vmem:[#allocation2 + $0x28] sm:$0xff] }
  0x18   : > { %284 = vst.msk [vmem:[#allocation2 + $0xc0] sm:$0xff] %vm259_vm0, %v6642_v0  ;;  %285 = vst.msk [vmem:[#allocation2 + $0xc8] sm:$0xff] %vm259_vm0, %v6642_v0  ;;  %6054 = vmatprep.subr.mxu0 %v518_v11  ;;  %6106 = vmatprep.subr.mxu1 %v5375_v16  ;;  %v5370_v28 = vld [vmem:[%s8578_s1 + $0x50] sm:$0xff]  ;;  %v6835_v30 = vld [vmem:[#allocation2 + $0x38] sm:$0xff] }
  0x19   : > { %286 = vst.msk [vmem:[#allocation2 + $0xd0] sm:$0xff] %vm259_vm0, %v6642_v0  ;;  %287 = vst.msk [vmem:[#allocation2 + $0xd8] sm:$0xff] %vm259_vm0, %v6642_v0  ;;  %6055 = vmatpush3.msra.mxu0 %v518_v11  ;;  %6062 = vmatprep.mubr.msk.f32.mxu0 %vm259_vm0, %v467_v17  ;;  %v6833_v29 = vld [vmem:[#allocation2 + $0x30] sm:$0xff]  ;;  %v5413_v39 = vld [vmem:[%s8578_s1 + $0xe8] sm:$0xff] }
  0x1a   : > { %288 = vst.msk [vmem:[#allocation2 + $0xe0] sm:$0xff] %vm259_vm0, %v6642_v0  ;;  %289 = vst.msk [vmem:[#allocation2 + $0xe8] sm:$0xff] %vm259_vm0, %v6642_v0  ;;  %6056 = vmatprep.subr.mxu0 %v517_v13  ;;  %6107 = vmatpush3.msra.mxu1 %v5375_v16  ;;  %v5412_v40 = vld [vmem:[%s8578_s1 + $0xe0] sm:$0xff]  ;;  %v5411_v41 = vld [vmem:[%s8578_s1 + $0xd8] sm:$0xff] }
  0x1b   : > { %290 = vst.msk [vmem:[#allocation2 + $0xf0] sm:$0xff] %vm259_vm0, %v6642_v0  ;;  %291 = vst.msk [vmem:[#allocation2 + $0xf8] sm:$0xff] %vm259_vm0, %v6642_v0  ;;  %6057 = vmatpush3.msra.mxu0 %v517_v13  ;;  %6108 = vmatprep.subr.mxu1 %v5374_v19  ;;  %v5410_v42 = vld [vmem:[%s8578_s1 + $0xd0] sm:$0xff]  ;;  %v5409_v43 = vld [vmem:[%s8578_s1 + $0xc8] sm:$0xff] }
  0x1c   : > { %6058 = vmatprep.subr.mxu0 %v516_v15  ;;  %6109 = vmatpush3.msra.mxu1 %v5374_v19  ;;  %v5408_v44 = vld [vmem:[%s8578_s1 + $0xc0] sm:$0xff]  ;;  %v5407_v45 = vld [vmem:[%s8578_s1 + $0xb8] sm:$0xff]  ;;  %v5406_v47 = vld [vmem:[%s8578_s1 + $0xb0] sm:$0xff]  ;;  %444 = vst.msk [vmem:[#allocation3 + $0x8] sm:$0xff] %vm442_vm6, %v6642_v0 }
  0x1d   : > { %6059 = vmatpush3.msra.mxu0 %v516_v15  ;;  %6110 = vmatprep.subr.mxu1 %v5373_v21  ;;  %v5447_v46 = vld [vmem:[%s8578_s1 + $0x138] sm:$0xff]  ;;  %v5446_v48 = vld [vmem:[%s8578_s1 + $0x130] sm:$0xff]  ;;  %v5445_v49 = vld [vmem:[%s8578_s1 + $0x128] sm:$0xff]  ;;  %443 = vst.msk [vmem:[#allocation3] sm:$0xff] %vm442_vm6, %v6642_v0 }
  0x1e   : > { %6060 = vmatprep.subr.mxu0 %v515_v18  ;;  %6111 = vmatpush3.msra.mxu1 %v5373_v21  ;;  %v5405_v50 = vld [vmem:[%s8578_s1 + $0xa8] sm:$0xff]  ;;  %v5444_v51 = vld [vmem:[%s8578_s1 + $0x120] sm:$0xff]  ;;  %v5443_v52 = vld [vmem:[%s8578_s1 + $0x118] sm:$0xff]  ;;  %445 = vst.msk [vmem:[#allocation3 + $0x10] sm:$0xff] %vm442_vm6, %v6642_v0 }
  0x1f   : > { %6061 = vmatpush3.msra.mxu0 %v515_v18  ;;  %6118 = vmatprep.mubr.msk.f32.mxu1 %vm259_vm0, %v469_v22  ;;  %v5442_v53 = vld [vmem:[%s8578_s1 + $0x110] sm:$0xff]  ;;  %v5404_v54 = vld [vmem:[%s8578_s1 + $0xa0] sm:$0xff]  ;;  %v5441_v55 = vld [vmem:[%s8578_s1 + $0x108] sm:$0xff]  ;;  %446 = vst.msk [vmem:[#allocation3 + $0x18] sm:$0xff] %vm442_vm6, %v6642_v0 }
  0x20   : > { %6063 = vmatmul.mubr.msk.f32.vlgmr.msra.gmra.mxu0 %vm259_vm0, %v468_v20  ;;  %6112 = vmatprep.subr.mxu1 %v5372_v23  ;;  %v5440_v56 = vld [vmem:[%s8578_s1 + $0x100] sm:$0xff]  ;;  %v6959_v57 = vld [vmem:[%s8578_s1 + $0x188] sm:$0xff]  ;;  %v5439_v58 = vld [vmem:[%s8578_s1 + $0xf8] sm:$0xff]  ;;  %447 = vst.msk [vmem:[#allocation3 + $0x20] sm:$0xff] %vm442_vm6, %v6642_v0 }
  0x21   : > { %6065 = vmatprep.mubr.msk.f32.mxu0 %vm259_vm0, %v469_v22  ;;  %6113 = vmatpush3.msra.mxu1 %v5372_v23  ;;  %v5438_v59 = vld [vmem:[%s8578_s1 + $0xf0] sm:$0xff]  ;;  %448 = vst.msk [vmem:[#allocation3 + $0x28] sm:$0xff] %vm442_vm6, %v6642_v0  ;;  %449 = vst.msk [vmem:[#allocation3 + $0x30] sm:$0xff] %vm442_vm6, %v6642_v0 }
  0x22   : > { %6114 = vmatprep.subr.mxu1 %v5371_v25  ;;  %6154 = vmatprep.subr.mxu0 %v5413_v39  ;;  %450 = vst.msk [vmem:[#allocation3 + $0x38] sm:$0xff] %vm442_vm6, %v6642_v0  ;;  %451 = vst.msk [vmem:[#allocation3 + $0x40] sm:$0xff] %vm442_vm6, %v6642_v0 }
  0x23   : > { %6115 = vmatpush3.msra.mxu1 %v5371_v25  ;;  %6155 = vmatpush3.msra.mxu0 %v5413_v39  ;;  %452 = vst.msk [vmem:[#allocation3 + $0x48] sm:$0xff] %vm442_vm6, %v6642_v0  ;;  %453 = vst.msk [vmem:[#allocation3 + $0x50] sm:$0xff] %vm442_vm6, %v6642_v0 }
  0x24   : > { %6066 = vmatmul.mubr.msk.f32.gmra.mxu0 %vm259_vm0, %v470_v24  ;;  %6116 = vmatprep.subr.mxu1 %v5370_v28  ;;  %454 = vst.msk [vmem:[#allocation3 + $0x58] sm:$0xff] %vm442_vm6, %v6642_v0  ;;  %455 = vst.msk [vmem:[#allocation3 + $0x60] sm:$0xff] %vm442_vm6, %v6642_v0 }
  0x25   : > { %6068 = vmatprep.mubr.msk.f32.mxu0 %vm259_vm0, %v6822_v26  ;;  %6117 = vmatpush3.msra.mxu1 %v5370_v28  ;;  %456 = vst.msk [vmem:[#allocation3 + $0x68] sm:$0xff] %vm442_vm6, %v6642_v0  ;;  %457 = vst.msk [vmem:[#allocation3 + $0x70] sm:$0xff] %vm442_vm6, %v6642_v0 }
  0x26   : > { %6119 = vmatmul.mubr.msk.f32.vlgmr.msra.gmra.mxu1 %vm259_vm0, %v470_v24  ;;  %6156 = vmatprep.subr.mxu0 %v5412_v40  ;;  %458 = vst.msk [vmem:[#allocation3 + $0x78] sm:$0xff] %vm442_vm6, %v6642_v0  ;;  %459 = vst.msk [vmem:[#allocation3 + $0x80] sm:$0xff] %vm442_vm6, %v6642_v0 }
  0x27   : > { %6121 = vmatprep.mubr.msk.f32.mxu1 %vm259_vm0, %v6822_v26  ;;  %6157 = vmatpush3.msra.mxu0 %v5412_v40  ;;  %460 = vst.msk [vmem:[#allocation3 + $0x88] sm:$0xff] %vm442_vm6, %v6642_v0  ;;  %461 = vst.msk [vmem:[#allocation3 + $0x90] sm:$0xff] %vm442_vm6, %v6642_v0 }
  0x28   : > { %6069 = vmatmul.mubr.msk.f32.gmra.mxu0 %vm259_vm0, %v6824_v27  ;;  %6158 = vmatprep.subr.mxu0 %v5411_v41  ;;  %462 = vst.msk [vmem:[#allocation3 + $0x98] sm:$0xff] %vm442_vm6, %v6642_v0  ;;  %463 = vst.msk [vmem:[#allocation3 + $0xa0] sm:$0xff] %vm442_vm6, %v6642_v0 }
  0x29   : > { %6071 = vmatprep.mubr.msk.f32.mxu0 %vm259_vm0, %v6833_v29  ;;  %6159 = vmatpush3.msra.mxu0 %v5411_v41  ;;  %464 = vst.msk [vmem:[#allocation3 + $0xa8] sm:$0xff] %vm442_vm6, %v6642_v0  ;;  %465 = vst.msk [vmem:[#allocation3 + $0xb0] sm:$0xff] %vm442_vm6, %v6642_v0 }
  0x2a   : > { %6122 = vmatmul.mubr.msk.f32.gmra.mxu1 %vm259_vm0, %v6824_v27  ;;  %6160 = vmatprep.subr.mxu0 %v5410_v42  ;;  %466 = vst.msk [vmem:[#allocation3 + $0xb8] sm:$0xff] %vm442_vm6, %v6642_v0 }
  0x2b   : > { %6124 = vmatprep.mubr.msk.f32.mxu1 %vm259_vm0, %v6833_v29  ;;  %6161 = vmatpush3.msra.mxu0 %v5410_v42  ;;  %v493_v42 = vld [vmem:[#allocation3 + $0x10] sm:$0xff]  ;;  %2377 = vst.msk [vmem:[#allocation4 + $0x40] sm:$0xff] %vm2368_vm7, %v6642_v0  ;;  %2378 = vst.msk [vmem:[#allocation4 + $0x48] sm:$0xff] %vm2368_vm7, %v6642_v0 }
  0x2c   : > { %6072 = vmatmul.mubr.msk.f32.gmra.mxu0 %vm259_vm0, %v6835_v30  ;;  %6162 = vmatprep.subr.mxu0 %v5409_v43  ;;  %2369 = vst.msk [vmem:[#allocation4] sm:$0xff] %vm2368_vm7, %v6642_v0  ;;  %2370 = vst.msk [vmem:[#allocation4 + $0x8] sm:$0xff] %vm2368_vm7, %v6642_v0 }
  0x2d   : > { %6163 = vmatpush3.msra.mxu0 %v5409_v43  ;;  %6210 = vmatprep.subr.mxu1 %v5447_v46  ;;  %v496_v43 = vld [vmem:[#allocation3 + $0x28] sm:$0xff]  ;;  %2371 = vst.msk [vmem:[#allocation4 + $0x10] sm:$0xff] %vm2368_vm7, %v6642_v0  ;;  %2372 = vst.msk [vmem:[#allocation4 + $0x18] sm:$0xff] %vm2368_vm7, %v6642_v0 }
  0x2e   : > { %6125 = vmatmul.mubr.msk.f32.gmra.mxu1 %vm259_vm0, %v6835_v30  ;;  %6164 = vmatprep.subr.mxu0 %v5408_v44  ;;  %2373 = vst.msk [vmem:[#allocation4 + $0x20] sm:$0xff] %vm2368_vm7, %v6642_v0  ;;  %2374 = vst.msk [vmem:[#allocation4 + $0x28] sm:$0xff] %vm2368_vm7, %v6642_v0 }
  0x2f   : > { %6165 = vmatpush3.msra.mxu0 %v5408_v44  ;;  %6211 = vmatpush3.msra.mxu1 %v5447_v46  ;;  %2375 = vst.msk [vmem:[#allocation4 + $0x30] sm:$0xff] %vm2368_vm7, %v6642_v0  ;;  %2376 = vst.msk [vmem:[#allocation4 + $0x38] sm:$0xff] %vm2368_vm7, %v6642_v0 }
  0x30   : > { %6166 = vmatprep.subr.mxu0 %v5407_v45  ;;  %6212 = vmatprep.subr.mxu1 %v5446_v48  ;;  %2379 = vst.msk [vmem:[#allocation4 + $0x50] sm:$0xff] %vm2368_vm7, %v6642_v0  ;;  %2380 = vst.msk [vmem:[#allocation4 + $0x58] sm:$0xff] %vm2368_vm7, %v6642_v0 }
  0x31   : > { %6167 = vmatpush3.msra.mxu0 %v5407_v45  ;;  %6213 = vmatpush3.msra.mxu1 %v5446_v48  ;;  %v495_v45 = vld [vmem:[#allocation3 + $0x20] sm:$0xff]  ;;  %2381 = vst.msk [vmem:[#allocation4 + $0x60] sm:$0xff] %vm2368_vm7, %v6642_v0  ;;  %2382 = vst.msk [vmem:[#allocation4 + $0x68] sm:$0xff] %vm2368_vm7, %v6642_v0 }
  0x32   : > { %6168 = vmatprep.subr.mxu0 %v5406_v47  ;;  %6214 = vmatprep.subr.mxu1 %v5445_v49  ;;  %2383 = vst.msk [vmem:[#allocation4 + $0x70] sm:$0xff] %vm2368_vm7, %v6642_v0  ;;  %2384 = vst.msk [vmem:[#allocation4 + $0x78] sm:$0xff] %vm2368_vm7, %v6642_v0 }
  0x33   : > { %6169 = vmatpush3.msra.mxu0 %v5406_v47  ;;  %6215 = vmatpush3.msra.mxu1 %v5445_v49  ;;  %2385 = vst.msk [vmem:[#allocation4 + $0x80] sm:$0xff] %vm2368_vm7, %v6642_v0  ;;  %2386 = vst.msk [vmem:[#allocation4 + $0x88] sm:$0xff] %vm2368_vm7, %v6642_v0 }
  0x34   : > { %6170 = vmatprep.subr.mxu0 %v5405_v50  ;;  %6216 = vmatprep.subr.mxu1 %v5444_v51  ;;  %2387 = vst.msk [vmem:[#allocation4 + $0x90] sm:$0xff] %vm2368_vm7, %v6642_v0  ;;  %2388 = vst.msk [vmem:[#allocation4 + $0x98] sm:$0xff] %vm2368_vm7, %v6642_v0 }
  0x35   : > { %6171 = vmatpush3.msra.mxu0 %v5405_v50  ;;  %6217 = vmatpush3.msra.mxu1 %v5444_v51  ;;  %2389 = vst.msk [vmem:[#allocation4 + $0xa0] sm:$0xff] %vm2368_vm7, %v6642_v0  ;;  %2390 = vst.msk [vmem:[#allocation4 + $0xa8] sm:$0xff] %vm2368_vm7, %v6642_v0 }
  0x36   : > { %6218 = vmatprep.subr.mxu1 %v5443_v52  ;;  %6172 = vmatprep.subr.mxu0 %v5404_v54  ;;  %2391 = vst.msk [vmem:[#allocation4 + $0xb0] sm:$0xff] %vm2368_vm7, %v6642_v0  ;;  %2392 = vst.msk [vmem:[#allocation4 + $0xb8] sm:$0xff] %vm2368_vm7, %v6642_v0 }
  0x37   : > { %6219 = vmatpush3.msra.mxu1 %v5443_v52  ;;  %6173 = vmatpush3.msra.mxu0 %v5404_v54  ;;  %v498_v52 = vld [vmem:[#allocation3 + $0x38] sm:$0xff]  ;;  %v497_v54 = vld [vmem:[#allocation3 + $0x30] sm:$0xff]  ;;  %2393 = vst.msk [vmem:[#allocation4 + $0xc0] sm:$0xff] %vm2368_vm7, %v6642_v0  ;;  %2394 = vst.msk [vmem:[#allocation4 + $0xc8] sm:$0xff] %vm2368_vm7, %v6642_v0 }
  0x38   : > { %6220 = vmatprep.subr.mxu1 %v5442_v53  ;;  %6266 = vmatprep.subr.mxu0 %v6959_v57  ;;  %2395 = vst.msk [vmem:[#allocation4 + $0xd0] sm:$0xff] %vm2368_vm7, %v6642_v0  ;;  %2396 = vst.msk [vmem:[#allocation4 + $0xd8] sm:$0xff] %vm2368_vm7, %v6642_v0 }
  0x39   : > { %6221 = vmatpush3.msra.mxu1 %v5442_v53  ;;  %2397 = vst.msk [vmem:[#allocation4 + $0xe0] sm:$0xff] %vm2368_vm7, %v6642_v0  ;;  %2398 = vst.msk [vmem:[#allocation4 + $0xe8] sm:$0xff] %vm2368_vm7, %v6642_v0 }
  0x3a   : > { %6222 = vmatprep.subr.mxu1 %v5441_v55  ;;  %2399 = vst.msk [vmem:[#allocation4 + $0xf0] sm:$0xff] %vm2368_vm7, %v6642_v0  ;;  %2400 = vst.msk [vmem:[#allocation4 + $0xf8] sm:$0xff] %vm2368_vm7, %v6642_v0 }
  0x3b   : > { %6223 = vmatpush3.msra.mxu1 %v5441_v55  ;;  %2401 = vst.msk [vmem:[#allocation4 + $0x100] sm:$0xff] %vm2368_vm7, %v6642_v0  ;;  %2402 = vst.msk [vmem:[#allocation4 + $0x108] sm:$0xff] %vm2368_vm7, %v6642_v0 }
  0x3c   : > { %6224 = vmatprep.subr.mxu1 %v5440_v56  ;;  %2403 = vst.msk [vmem:[#allocation4 + $0x110] sm:$0xff] %vm2368_vm7, %v6642_v0  ;;  %2404 = vst.msk [vmem:[#allocation4 + $0x118] sm:$0xff] %vm2368_vm7, %v6642_v0 }
  0x3d   : > { %6225 = vmatpush3.msra.mxu1 %v5440_v56  ;;  %2405 = vst.msk [vmem:[#allocation4 + $0x120] sm:$0xff] %vm2368_vm7, %v6642_v0  ;;  %2406 = vst.msk [vmem:[#allocation4 + $0x128] sm:$0xff] %vm2368_vm7, %v6642_v0 }
  0x3e   : > { %6226 = vmatprep.subr.mxu1 %v5439_v58  ;;  %2407 = vst.msk [vmem:[#allocation4 + $0x130] sm:$0xff] %vm2368_vm7, %v6642_v0  ;;  %2408 = vst.msk [vmem:[#allocation4 + $0x138] sm:$0xff] %vm2368_vm7, %v6642_v0  ;;  %v506_v0 = vld [vmem:[#allocation3 + $0x78] sm:$0xff] }
  0x3f   : > { %6227 = vmatpush3.msra.mxu1 %v5439_v58 }
  0x40   : > { %6228 = vmatprep.subr.mxu1 %v5438_v59 }
  0x41   : > { %6229 = vmatpush3.msra.mxu1 %v5438_v59 }
  0x8b   : > { %v243_v31 = vpop.trf.xlu0 }
  0x8c   : > { %376 = vrot.lane.b32.xlu0 %v243_v31, %s6643_s16  ;;  %310 = vrot.lane.b32.xlu1 %v243_v31, %s6644_s17  ;;  %294 = vst.msk [vmem:[#allocation2 + $0x44] sm:$0xff] %vm293_vm1, %v243_v31 }
  0x8f   : > { %v244_v32 = vpop.trf.xlu0 }
  0x90   : > { %343 = vrot.lane.b32.xlu1 %v243_v31, %s6645_s20  ;;  %295 = vst.msk [vmem:[#allocation2 + $0x54] sm:$0xff] %vm293_vm1, %v244_v32 }
  0x93   : > { %v245_v33 = vpop.trf.xlu0 }
  0x94   : > { %409 = vrot.lane.b32.xlu1 %v243_v31, %s6646_s21  ;;  %296 = vst.msk [vmem:[#allocation2 + $0x64] sm:$0xff] %vm293_vm1, %v245_v33 }
  0x97   : > { %v246_v34 = vpop.trf.xlu0 }
  0x98   : > { %312 = vrot.lane.b32.xlu1 %v244_v32, %s6644_s17  ;;  %297 = vst.msk [vmem:[#allocation2 + $0x74] sm:$0xff] %vm293_vm1, %v246_v34 }
  0x9b   : > { %v247_v35 = vpop.trf.xlu0 }
  0x9c   : > { %345 = vrot.lane.b32.xlu1 %v244_v32, %s6645_s20  ;;  %298 = vst.msk [vmem:[#allocation2 + $0x84] sm:$0xff] %vm293_vm1, %v247_v35 }
  0x9f   : > { %v248_v36 = vpop.trf.xlu0 }
  0xa0   : > { %378 = vrot.lane.b32.xlu1 %v244_v32, %s6643_s16  ;;  %320 = vrot.lane.b32.xlu0 %v248_v36, %s6644_s17  ;;  %299 = vst.msk [vmem:[#allocation2 + $0x94] sm:$0xff] %vm293_vm1, %v248_v36 }
  0xa3   : > { %v6864_v37 = vpop.trf.xlu0 }
  0xa4   : > { %411 = vrot.lane.b32.xlu1 %v244_v32, %s6646_s21  ;;  %386 = vrot.lane.b32.xlu0 %v248_v36, %s6643_s16  ;;  %300 = vst.msk [vmem:[#allocation2 + $0xa4] sm:$0xff] %vm293_vm1, %v6864_v37 }
  0xa7   : > { %v6870_v38 = vpop.trf.xlu0 }
  0xa8   : > { %314 = vrot.lane.b32.xlu1 %v245_v33, %s6644_s17  ;;  %322 = vrot.lane.b32.xlu0 %v6864_v37, %s6644_s17  ;;  %301 = vst.msk [vmem:[#allocation2 + $0xb4] sm:$0xff] %vm293_vm1, %v6870_v38  ;;  %vm2825_vm1 = vcmask 244928  }
  0xac   : > { %347 = vrot.lane.b32.xlu1 %v245_v33, %s6645_s20  ;;  %388 = vrot.lane.b32.xlu0 %v6864_v37, %s6643_s16 }
  0xb0   : > { %380 = vrot.lane.b32.xlu1 %v245_v33, %s6643_s16  ;;  %324 = vrot.lane.b32.xlu0 %v6870_v38, %s6644_s17 }
  0xb4   : > { %413 = vrot.lane.b32.xlu1 %v245_v33, %s6646_s21  ;;  %390 = vrot.lane.b32.xlu0 %v6870_v38, %s6643_s16 }
  0xb8   : > { %316 = vrot.lane.b32.xlu1 %v246_v34, %s6644_s17 }
  0xbc   : > { %349 = vrot.lane.b32.xlu1 %v246_v34, %s6645_s20 }
  0xc0   : > { %382 = vrot.lane.b32.xlu1 %v246_v34, %s6643_s16 }
  0xc4   : > { %415 = vrot.lane.b32.xlu1 %v246_v34, %s6646_s21 }
  0xc8   : > { %318 = vrot.lane.b32.xlu1 %v247_v35, %s6644_s17 }
  0xcc   : > { %351 = vrot.lane.b32.xlu1 %v247_v35, %s6645_s20 }
  0xd0   : > { %384 = vrot.lane.b32.xlu1 %v247_v35, %s6643_s16 }
  0xd4   : > { %417 = vrot.lane.b32.xlu1 %v247_v35, %s6646_s21 }
  0xd8   : > { %353 = vrot.lane.b32.xlu1 %v248_v36, %s6645_s20 }
  0xdc   : > { %419 = vrot.lane.b32.xlu1 %v248_v36, %s6646_s21  ;;  %v492_v36 = vld [vmem:[#allocation3 + $0x8] sm:$0xff] }
  0xe0   : > { %355 = vrot.lane.b32.xlu1 %v6864_v37, %s6645_s20  ;;  %v6064_v24 = vpop.f32.mrf.mxu0 }
  0xe1   : > { %v783_v39 = vadd.f32 %v6064_v24, %v492_v36 }
  0xe2   : > { %v663_v28 = vpop.f32.mrf.mxu0 }
  0xe3   : > { %807 = vst.msk [vmem:[#allocation3 + $0x8] sm:$0xff] %vm442_vm6, %v783_v39 }
  0xe4   : > { %421 = vrot.lane.b32.xlu1 %v6864_v37, %s6646_s21  ;;  %v6067_v31 = vpop.f32.mrf.mxu0  ;;  %v491_v37 = vld [vmem:[#allocation3] sm:$0xff] }
  0xe5   : > { %v782_v40 = vadd.f32 %v663_v28, %v491_v37 }
  0xe6   : > { %v673_v35 = vpop.f32.mrf.mxu0  ;;  %v6120_v51 = vpop.f32.mrf.mxu1 }
  0xe7   : > { %v784_v47 = vadd.f32 %v673_v35, %v493_v42  ;;  %806 = vst.msk [vmem:[#allocation3] sm:$0xff] %vm442_vm6, %v782_v40  ;;  %v7156_v40 = vld [vmem:[#allocation2 + $0xc0] sm:$0xff]  ;;  %v7172_v42 = vld [vmem:[#allocation2 + $0xc8] sm:$0xff] }
  0xe8   : > { %357 = vrot.lane.b32.xlu1 %v6870_v38, %s6645_s20  ;;  %v6070_v44 = vpop.f32.mrf.mxu0  ;;  %v1028_v58 = vpop.f32.mrf.mxu1 }
  0xe9   : > { %v787_v48 = vadd.f32 %v6070_v44, %v496_v43  ;;  %808 = vst.msk [vmem:[#allocation3 + $0x10] sm:$0xff] %vm442_vm6, %v784_v47  ;;  %v5480_v43 = vld [vmem:[%s8578_s1 + $0x180] sm:$0xff]  ;;  %v5474_v44 = vld [vmem:[%s8578_s1 + $0x150] sm:$0xff] }
  0xea   : > { %v683_v49 = vpop.f32.mrf.mxu0  ;;  %v1218_v47 = vld [vmem:[#allocation2 + $0xd0] sm:$0xff] }
  0xeb   : > { %811 = vst.msk [vmem:[#allocation3 + $0x28] sm:$0xff] %vm442_vm6, %v787_v48  ;;  %v786_v50 = vadd.f32 %v683_v49, %v495_v45  ;;  %v5473_v45 = vld [vmem:[%s8578_s1 + $0x148] sm:$0xff]  ;;  %v1219_v48 = vld [vmem:[#allocation2 + $0xd8] sm:$0xff]  ;;  %v1583_v49 = vld [vmem:[#allocation2 + $0xe0] sm:$0xff] }
  0xec   : > { %423 = vrot.lane.b32.xlu1 %v6870_v38, %s6646_s21  ;;  %v494_v38 = vld [vmem:[#allocation3 + $0x18] sm:$0xff]  ;;  %v6073_v53 = vpop.f32.mrf.mxu0  ;;  %s224_s21 = scalar_lea.vmem %s8582_s5, %s5691_s15 }
  0xed   : > { %v785_v41 = vadd.f32 %v6067_v31, %v494_v38  ;;  %810 = vst.msk [vmem:[#allocation3 + $0x20] sm:$0xff] %vm442_vm6, %v786_v50  ;;  %v789_v56 = vadd.f32 %v6073_v53, %v498_v52  ;;  %v1584_v50 = vld [vmem:[#allocation2 + $0xe8] sm:$0xff] }
  0xee   : > { %v693_v59 = vpop.f32.mrf.mxu0 }
  0xef   : > { %809 = vst.msk [vmem:[#allocation3 + $0x18] sm:$0xff] %vm442_vm6, %v785_v41  ;;  %813 = vst.msk [vmem:[#allocation3 + $0x38] sm:$0xff] %vm442_vm6, %v789_v56 }
  0xfe   : > { %v311_v60 = vpop.permute.xlu1 %310  ;;  %v377_v62 = vpop.permute.xlu0 %376 }
  0xff   : > { %335 = vst.msk [vmem:[#allocation2 + $0x43] sm:$0xff] %vm334_vm2, %v311_v60  ;;  %v788_v60 = vadd.f32 %v693_v59, %v497_v54 }
 0x101   : > { %812 = vst.msk [vmem:[#allocation3 + $0x30] sm:$0xff] %vm442_vm6, %v788_v60 }
 0x102   : > { %v344_v61 = vpop.permute.xlu1 %343 }
 0x103   : > { %368 = vst.msk [vmem:[#allocation2 + $0x42] sm:$0xff] %vm367_vm3, %v344_v61  ;;  %v6123_v61 = vpop.f32.mrf.mxu1 }
 0x104   : > { %401 = vst.msk [vmem:[#allocation2 + $0x41] sm:$0xff] %vm400_vm4, %v377_v62 }
 0x106   : > { %v410_v63 = vpop.permute.xlu1 %409 }
 0x107   : > { %434 = vst.msk [vmem:[#allocation2 + $0x40] sm:$0xff] %vm433_vm5, %v410_v63  ;;  %v856_v63 = vld [vmem:[#allocation3 + $0x8] sm:$0xff] }
 0x10a   : > { %v313_v1 = vpop.permute.xlu1 %312 }
 0x10b   : > { %336 = vst.msk [vmem:[#allocation2 + $0x53] sm:$0xff] %vm334_vm2, %v313_v1  ;;  %v6982_v4 = vld [vmem:[#allocation2 + $0x48] sm:$0xff]  ;;  %v855_v1 = vld [vmem:[#allocation3] sm:$0xff] }
 0x10e   : > { %v346_v2 = vpop.permute.xlu1 %345  ;;  %v6975_v3 = vld [vmem:[#allocation2 + $0x40] sm:$0xff] }
 0x10f   : > { %369 = vst.msk [vmem:[#allocation2 + $0x52] sm:$0xff] %vm367_vm3, %v346_v2  ;;  %6074 = vmatprep.mubr.msk.f32.mxu0 %vm259_vm0, %v6975_v3  ;;  %6127 = vmatprep.mubr.msk.f32.mxu1 %vm259_vm0, %v6975_v3  ;;  %v1038_v2 = vpop.f32.mrf.mxu1 }
 0x110   : > { %6075 = vmatmul.mubr.msk.f32.gmra.mxu0 %vm259_vm0, %v6982_v4  ;;  %6128 = vmatmul.mubr.msk.f32.gmra.mxu1 %vm259_vm0, %v6982_v4 }
 0x112   : > { %v379_v5 = vpop.permute.xlu1 %378  ;;  %v321_v6 = vpop.permute.xlu0 %320 }
 0x113   : > { %402 = vst.msk [vmem:[#allocation2 + $0x51] sm:$0xff] %vm400_vm4, %v379_v5  ;;  %v1148_v5 = vadd.f32 %v6120_v51, %v856_v63 }
 0x114   : > { %340 = vst.msk [vmem:[#allocation2 + $0x93] sm:$0xff] %vm334_vm2, %v321_v6  ;;  %v1147_v6 = vadd.f32 %v1028_v58, %v855_v1  ;;  %v502_v58 = vld [vmem:[#allocation3 + $0x58] sm:$0xff] }
 0x115   : > { %1172 = vst.msk [vmem:[#allocation3 + $0x8] sm:$0xff] %vm442_vm6, %v1148_v5 }
 0x116   : > { %v412_v7 = vpop.permute.xlu1 %411  ;;  %v6990_v8 = vpop.permute.xlu0 %386  ;;  %1171 = vst.msk [vmem:[#allocation3] sm:$0xff] %vm442_vm6, %v1147_v6 }
 0x117   : > { %435 = vst.msk [vmem:[#allocation2 + $0x50] sm:$0xff] %vm433_vm5, %v412_v7  ;;  %v858_v7 = vld [vmem:[#allocation3 + $0x18] sm:$0xff] }
 0x11a   : > { %v315_v9 = vpop.permute.xlu1 %314  ;;  %v323_v10 = vpop.permute.xlu0 %322  ;;  %v7004_v14 = vld [vmem:[#allocation2 + $0x58] sm:$0xff] }
 0x11b   : > { %337 = vst.msk [vmem:[#allocation2 + $0x63] sm:$0xff] %vm334_vm2, %v315_v9  ;;  %341 = vst.msk [vmem:[#allocation2 + $0xa3] sm:$0xff] %vm334_vm2, %v323_v10  ;;  %v857_v9 = vld [vmem:[#allocation3 + $0x10] sm:$0xff]  ;;  %v860_v10 = vld [vmem:[#allocation3 + $0x28] sm:$0xff] }
 0x11e   : > { %v348_v11 = vpop.permute.xlu1 %347  ;;  %v6995_v12 = vld [vmem:[#allocation2 + $0x50] sm:$0xff]  ;;  %v6997_v13 = vpop.permute.xlu0 %388 }
 0x11f   : > { %370 = vst.msk [vmem:[#allocation2 + $0x62] sm:$0xff] %vm367_vm3, %v348_v11  ;;  %6077 = vmatprep.mubr.msk.f32.mxu0 %vm259_vm0, %v6995_v12  ;;  %6130 = vmatprep.mubr.msk.f32.mxu1 %vm259_vm0, %v6995_v12  ;;  %v1150_v11 = vadd.f32 %v6123_v61, %v858_v7 }
 0x120   : > { %6078 = vmatmul.mubr.msk.f32.gmra.mxu0 %vm259_vm0, %v7004_v14  ;;  %6131 = vmatmul.mubr.msk.f32.gmra.mxu1 %vm259_vm0, %v7004_v14 }
 0x121   : > { %1174 = vst.msk [vmem:[#allocation3 + $0x18] sm:$0xff] %vm442_vm6, %v1150_v11 }
 0x122   : > { %v381_v15 = vpop.permute.xlu1 %380  ;;  %v325_v16 = vpop.permute.xlu0 %324 }
 0x123   : > { %403 = vst.msk [vmem:[#allocation2 + $0x61] sm:$0xff] %vm400_vm4, %v381_v15  ;;  %v1149_v15 = vadd.f32 %v1038_v2, %v857_v9 }
 0x124   : > { %342 = vst.msk [vmem:[#allocation2 + $0xb3] sm:$0xff] %vm334_vm2, %v325_v16  ;;  %v6126_v16 = vpop.f32.mrf.mxu1 }
 0x125   : > { %1173 = vst.msk [vmem:[#allocation3 + $0x10] sm:$0xff] %vm442_vm6, %v1149_v15 }
 0x126   : > { %v414_v17 = vpop.permute.xlu1 %413  ;;  %v391_v35 = vpop.permute.xlu0 %390 }
 0x127   : > { %436 = vst.msk [vmem:[#allocation2 + $0x60] sm:$0xff] %vm433_vm5, %v414_v17  ;;  %v859_v17 = vld [vmem:[#allocation3 + $0x20] sm:$0xff] }
 0x12a   : > { %v317_v18 = vpop.permute.xlu1 %316  ;;  %v7021_v21 = vld [vmem:[#allocation2 + $0x68] sm:$0xff] }
 0x12b   : > { %338 = vst.msk [vmem:[#allocation2 + $0x73] sm:$0xff] %vm334_vm2, %v317_v18 }
 0x12e   : > { %v350_v19 = vpop.permute.xlu1 %349  ;;  %v7014_v20 = vld [vmem:[#allocation2 + $0x60] sm:$0xff] }
 0x12f   : > { %371 = vst.msk [vmem:[#allocation2 + $0x72] sm:$0xff] %vm367_vm3, %v350_v19  ;;  %6080 = vmatprep.mubr.msk.f32.mxu0 %vm259_vm0, %v7014_v20  ;;  %6133 = vmatprep.mubr.msk.f32.mxu1 %vm259_vm0, %v7014_v20 }
 0x130   : > { %6081 = vmatmul.mubr.msk.f32.gmra.mxu0 %vm259_vm0, %v7021_v21  ;;  %6134 = vmatmul.mubr.msk.f32.gmra.mxu1 %vm259_vm0, %v7021_v21 }
 0x132   : > { %v383_v22 = vpop.permute.xlu1 %382 }
 0x133   : > { %404 = vst.msk [vmem:[#allocation2 + $0x71] sm:$0xff] %vm400_vm4, %v383_v22  ;;  %v1152_v22 = vadd.f32 %v6126_v16, %v860_v10  ;;  %v504_v10 = vld [vmem:[#allocation3 + $0x68] sm:$0xff] }
 0x135   : > { %1176 = vst.msk [vmem:[#allocation3 + $0x28] sm:$0xff] %vm442_vm6, %v1152_v22 }
 0x136   : > { %v416_v23 = vpop.permute.xlu1 %415 }
 0x137   : > { %437 = vst.msk [vmem:[#allocation2 + $0x70] sm:$0xff] %vm433_vm5, %v416_v23  ;;  %v1048_v23 = vpop.f32.mrf.mxu1 }
 0x138   : > { %v1151_v24 = vadd.f32 %v1048_v23, %v859_v17  ;;  %v503_v17 = vld [vmem:[#allocation3 + $0x60] sm:$0xff] }
 0x13a   : > { %v319_v25 = vpop.permute.xlu1 %318  ;;  %v7085_v34 = vld [vmem:[#allocation2 + $0x78] sm:$0xff]  ;;  %1175 = vst.msk [vmem:[#allocation3 + $0x20] sm:$0xff] %vm442_vm6, %v1151_v24 }
 0x13b   : > { %339 = vst.msk [vmem:[#allocation2 + $0x83] sm:$0xff] %vm334_vm2, %v319_v25 }
 0x13e   : > { %v352_v32 = vpop.permute.xlu1 %351  ;;  %v7078_v33 = vld [vmem:[#allocation2 + $0x70] sm:$0xff] }
 0x13f   : > { %372 = vst.msk [vmem:[#allocation2 + $0x82] sm:$0xff] %vm367_vm3, %v352_v32  ;;  %6083 = vmatprep.mubr.msk.f32.mxu0 %vm259_vm0, %v7078_v33  ;;  %6136 = vmatprep.mubr.msk.f32.mxu1 %vm259_vm0, %v7078_v33 }
 0x140   : > { %6084 = vmatmul.mubr.msk.f32.gmra.mxu0 %vm259_vm0, %v7085_v34  ;;  %6137 = vmatmul.mubr.msk.f32.gmra.mxu1 %vm259_vm0, %v7085_v34 }
 0x142   : > { %v385_v46 = vpop.permute.xlu1 %384 }
 0x143   : > { %405 = vst.msk [vmem:[#allocation2 + $0x81] sm:$0xff] %vm400_vm4, %v385_v46  ;;  %v5472_v46 = vld [vmem:[%s8578_s1 + $0x140] sm:$0xff] }
 0x146   : > { %v418_v55 = vpop.permute.xlu1 %417 }
 0x147   : > { %438 = vst.msk [vmem:[#allocation2 + $0x80] sm:$0xff] %vm433_vm5, %v418_v55 }
 0x14a   : > { %v354_v62 = vpop.permute.xlu1 %353 }
 0x14b   : > { %373 = vst.msk [vmem:[#allocation2 + $0x92] sm:$0xff] %vm367_vm3, %v354_v62  ;;  %v501_v62 = vld [vmem:[#allocation3 + $0x50] sm:$0xff] }
 0x14c   : > { %406 = vst.msk [vmem:[#allocation2 + $0x91] sm:$0xff] %vm400_vm4, %v6990_v8  ;;  %v7115_v8 = vld [vmem:[#allocation2 + $0x88] sm:$0xff] }
 0x14e   : > { %v420_v18 = vpop.permute.xlu1 %419  ;;  %v7106_v19 = vld [vmem:[#allocation2 + $0x80] sm:$0xff] }
 0x14f   : > { %439 = vst.msk [vmem:[#allocation2 + $0x90] sm:$0xff] %vm433_vm5, %v420_v18  ;;  %6086 = vmatprep.mubr.msk.f32.mxu0 %vm259_vm0, %v7106_v19  ;;  %6139 = vmatprep.mubr.msk.f32.mxu1 %vm259_vm0, %v7106_v19 }
 0x150   : > { %6087 = vmatmul.mubr.msk.f32.gmra.mxu0 %vm259_vm0, %v7115_v8  ;;  %6140 = vmatmul.mubr.msk.f32.gmra.mxu1 %vm259_vm0, %v7115_v8 }
 0x152   : > { %v356_v25 = vpop.permute.xlu1 %355 }
 0x153   : > { %374 = vst.msk [vmem:[#allocation2 + $0xa2] sm:$0xff] %vm367_vm3, %v356_v25  ;;  %v7133_v32 = vld [vmem:[#allocation2 + $0x98] sm:$0xff] }
 0x154   : > { %407 = vst.msk [vmem:[#allocation2 + $0xa1] sm:$0xff] %vm400_vm4, %v6997_v13 }
 0x156   : > { %v422_v28 = vpop.permute.xlu1 %421  ;;  %v7126_v31 = vld [vmem:[#allocation2 + $0x90] sm:$0xff] }
 0x157   : > { %440 = vst.msk [vmem:[#allocation2 + $0xa0] sm:$0xff] %vm433_vm5, %v422_v28  ;;  %6089 = vmatprep.mubr.msk.f32.mxu0 %vm259_vm0, %v7126_v31  ;;  %6142 = vmatprep.mubr.msk.f32.mxu1 %vm259_vm0, %v7126_v31 }
 0x158   : > { %6090 = vmatmul.mubr.msk.f32.gmra.mxu0 %vm259_vm0, %v7133_v32  ;;  %6143 = vmatmul.mubr.msk.f32.gmra.mxu1 %vm259_vm0, %v7133_v32 }
 0x15a   : > { %v358_v13 = vpop.permute.xlu1 %357 }
 0x15b   : > { %375 = vst.msk [vmem:[#allocation2 + $0xb2] sm:$0xff] %vm367_vm3, %v358_v13  ;;  %v7148_v38 = vld [vmem:[#allocation2 + $0xa8] sm:$0xff]  ;;  %v505_v13 = vld [vmem:[#allocation3 + $0x70] sm:$0xff] }
 0x15c   : > { %408 = vst.msk [vmem:[#allocation2 + $0xb1] sm:$0xff] %vm400_vm4, %v391_v35 }
 0x15e   : > { %v424_v36 = vpop.permute.xlu1 %423  ;;  %v7141_v37 = vld [vmem:[#allocation2 + $0xa0] sm:$0xff] }
 0x15f   : > { %441 = vst.msk [vmem:[#allocation2 + $0xb0] sm:$0xff] %vm433_vm5, %v424_v36  ;;  %6092 = vmatprep.mubr.msk.f32.mxu0 %vm259_vm0, %v7141_v37  ;;  %6145 = vmatprep.mubr.msk.f32.mxu1 %vm259_vm0, %v7141_v37 }
 0x160   : > { %6093 = vmatmul.mubr.msk.f32.gmra.mxu0 %vm259_vm0, %v7148_v38  ;;  %6146 = vmatmul.mubr.msk.f32.gmra.mxu1 %vm259_vm0, %v7148_v38 }
 0x163   : > { %v7162_v41 = vld [vmem:[#allocation2 + $0xb8] sm:$0xff] }
 0x166   : > { %v7154_v39 = vld [vmem:[#allocation2 + $0xb0] sm:$0xff] }
 0x167   : > { %6095 = vmatprep.mubr.msk.f32.mxu0 %vm259_vm0, %v7154_v39  ;;  %6148 = vmatprep.mubr.msk.f32.mxu1 %vm259_vm0, %v7154_v39 }
 0x168   : > { %6096 = vmatmul.mubr.msk.f32.gmra.mxu0 %vm259_vm0, %v7162_v41  ;;  %6149 = vmatmul.mubr.msk.f32.gmra.mxu1 %vm259_vm0, %v7162_v41 }
 0x169   : > { %6151 = vmatprep.mubr.msk.f32.mxu1 %vm259_vm0, %v7156_v40  ;;  %6174 = vmatprep.mubr.msk.f32.mxu0 %vm259_vm0, %v6822_v26  ;;  %v5479_v26 = vld [vmem:[%s8578_s1 + $0x178] sm:$0xff] }
 0x16c   : > { %6152 = vmatmul.mubr.msk.f32.gmra.mxu1 %vm259_vm0, %v7172_v42  ;;  %6175 = vmatmul.mubr.msk.f32.vlgmr.msra.gmra.mxu0 %vm259_vm0, %v6824_v27  ;;  %v5478_v27 = vld [vmem:[%s8578_s1 + $0x170] sm:$0xff] }
 0x16d   : > { %6267 = vmatpush3.msra.mxu0 %v6959_v57  ;;  %6177 = vmatprep.mubr.msk.f32.mxu0 %vm259_vm0, %v6833_v29  ;;  %v5475_v57 = vld [vmem:[%s8578_s1 + $0x158] sm:$0xff] }
 0x16e   : > { %6230 = vmatprep.mubr.msk.f32.mxu1 %vm259_vm0, %v6833_v29  ;;  %6268 = vmatprep.subr.mxu0 %v5480_v43  ;;  %v5477_v29 = vld [vmem:[%s8578_s1 + $0x168] sm:$0xff] }
 0x16f   : > { %6269 = vmatpush3.msra.mxu0 %v5480_v43 }
 0x170   : > { %6178 = vmatmul.mubr.msk.f32.gmra.mxu0 %vm259_vm0, %v6835_v30  ;;  %6231 = vmatmul.mubr.msk.f32.vlgmr.msra.gmra.mxu1 %vm259_vm0, %v6835_v30  ;;  %v5476_v30 = vld [vmem:[%s8578_s1 + $0x160] sm:$0xff] }
 0x171   : > { %6180 = vmatprep.mubr.msk.f32.mxu0 %vm259_vm0, %v6975_v3  ;;  %6233 = vmatprep.mubr.msk.f32.mxu1 %vm259_vm0, %v6975_v3 }
 0x172   : > { %6270 = vmatprep.subr.mxu0 %v5479_v26 }
 0x173   : > { %6271 = vmatpush3.msra.mxu0 %v5479_v26 }
 0x174   : > { %6181 = vmatmul.mubr.msk.f32.gmra.mxu0 %vm259_vm0, %v6982_v4  ;;  %6234 = vmatmul.mubr.msk.f32.gmra.mxu1 %vm259_vm0, %v6982_v4 }
 0x175   : > { %6183 = vmatprep.mubr.msk.f32.mxu0 %vm259_vm0, %v6995_v12  ;;  %6236 = vmatprep.mubr.msk.f32.mxu1 %vm259_vm0, %v6995_v12 }
 0x176   : > { %6272 = vmatprep.subr.mxu0 %v5478_v27 }
 0x177   : > { %6273 = vmatpush3.msra.mxu0 %v5478_v27 }
 0x178   : > { %6184 = vmatmul.mubr.msk.f32.gmra.mxu0 %vm259_vm0, %v7004_v14  ;;  %6237 = vmatmul.mubr.msk.f32.gmra.mxu1 %vm259_vm0, %v7004_v14 }
 0x179   : > { %6186 = vmatprep.mubr.msk.f32.mxu0 %vm259_vm0, %v7014_v20  ;;  %6239 = vmatprep.mubr.msk.f32.mxu1 %vm259_vm0, %v7014_v20 }
 0x17a   : > { %6274 = vmatprep.subr.mxu0 %v5477_v29 }
 0x17b   : > { %6275 = vmatpush3.msra.mxu0 %v5477_v29  ;;  %v507_v29 = vld [vmem:[#allocation3 + $0x80] sm:$0xff] }
 0x17c   : > { %6187 = vmatmul.mubr.msk.f32.gmra.mxu0 %vm259_vm0, %v7021_v21  ;;  %6240 = vmatmul.mubr.msk.f32.gmra.mxu1 %vm259_vm0, %v7021_v21 }
 0x17d   : > { %6189 = vmatprep.mubr.msk.f32.mxu0 %vm259_vm0, %v7078_v33  ;;  %6242 = vmatprep.mubr.msk.f32.mxu1 %vm259_vm0, %v7078_v33 }
 0x17e   : > { %6276 = vmatprep.subr.mxu0 %v5476_v30 }
 0x17f   : > { %6277 = vmatpush3.msra.mxu0 %v5476_v30 }
 0x180   : > { %6190 = vmatmul.mubr.msk.f32.gmra.mxu0 %vm259_vm0, %v7085_v34  ;;  %6243 = vmatmul.mubr.msk.f32.gmra.mxu1 %vm259_vm0, %v7085_v34 }
 0x181   : > { %6192 = vmatprep.mubr.msk.f32.mxu0 %vm259_vm0, %v7106_v19  ;;  %6245 = vmatprep.mubr.msk.f32.mxu1 %vm259_vm0, %v7106_v19 }
 0x182   : > { %6278 = vmatprep.subr.mxu0 %v5475_v57 }
 0x183   : > { %6279 = vmatpush3.msra.mxu0 %v5475_v57 }
 0x184   : > { %6193 = vmatmul.mubr.msk.f32.gmra.mxu0 %vm259_vm0, %v7115_v8  ;;  %6246 = vmatmul.mubr.msk.f32.gmra.mxu1 %vm259_vm0, %v7115_v8 }
 0x185   : > { %6195 = vmatprep.mubr.msk.f32.mxu0 %vm259_vm0, %v7126_v31  ;;  %6248 = vmatprep.mubr.msk.f32.mxu1 %vm259_vm0, %v7126_v31 }
 0x186   : > { %6280 = vmatprep.subr.mxu0 %v5474_v44 }
 0x187   : > { %6281 = vmatpush3.msra.mxu0 %v5474_v44 }
 0x188   : > { %6196 = vmatmul.mubr.msk.f32.gmra.mxu0 %vm259_vm0, %v7133_v32  ;;  %6249 = vmatmul.mubr.msk.f32.gmra.mxu1 %vm259_vm0, %v7133_v32 }
 0x189   : > { %6198 = vmatprep.mubr.msk.f32.mxu0 %vm259_vm0, %v7141_v37  ;;  %6251 = vmatprep.mubr.msk.f32.mxu1 %vm259_vm0, %v7141_v37 }
 0x18a   : > { %6282 = vmatprep.subr.mxu0 %v5473_v45 }
 0x18b   : > { %6283 = vmatpush3.msra.mxu0 %v5473_v45 }
 0x18c   : > { %6199 = vmatmul.mubr.msk.f32.gmra.mxu0 %vm259_vm0, %v7148_v38  ;;  %6252 = vmatmul.mubr.msk.f32.gmra.mxu1 %vm259_vm0, %v7148_v38 }
 0x18d   : > { %6201 = vmatprep.mubr.msk.f32.mxu0 %vm259_vm0, %v7154_v39  ;;  %6254 = vmatprep.mubr.msk.f32.mxu1 %vm259_vm0, %v7154_v39 }
 0x18e   : > { %6284 = vmatprep.subr.mxu0 %v5472_v46 }
 0x18f   : > { %6285 = vmatpush3.msra.mxu0 %v5472_v46 }
 0x190   : > { %6202 = vmatmul.mubr.msk.f32.gmra.mxu0 %vm259_vm0, %v7162_v41  ;;  %6255 = vmatmul.mubr.msk.f32.gmra.mxu1 %vm259_vm0, %v7162_v41 }
 0x191   : > { %6204 = vmatprep.mubr.msk.f32.mxu0 %vm259_vm0, %v7156_v40  ;;  %6257 = vmatprep.mubr.msk.f32.mxu1 %vm259_vm0, %v7156_v40 }
 0x194   : > { %6205 = vmatmul.mubr.msk.f32.gmra.mxu0 %vm259_vm0, %v7172_v42  ;;  %6258 = vmatmul.mubr.msk.f32.gmra.mxu1 %vm259_vm0, %v7172_v42 }
 0x195   : > { %6207 = vmatprep.mubr.msk.f32.mxu0 %vm259_vm0, %v1218_v47  ;;  %6260 = vmatprep.mubr.msk.f32.mxu1 %vm259_vm0, %v1218_v47 }
 0x198   : > { %6208 = vmatmul.mubr.msk.f32.gmra.mxu0 %vm259_vm0, %v1219_v48  ;;  %6261 = vmatmul.mubr.msk.f32.gmra.mxu1 %vm259_vm0, %v1219_v48 }
 0x199   : > { %6286 = vmatprep.mubr.msk.f32.mxu0 %vm259_vm0, %v6975_v3  ;;  %6263 = vmatprep.mubr.msk.f32.mxu1 %vm259_vm0, %v1583_v49  ;;  %v1947_v3 = vld [vmem:[#allocation2 + $0xf0] sm:$0xff] }
 0x19c   : > { %6287 = vmatmul.mubr.msk.f32.vlgmr.msra.gmra.mxu0 %vm259_vm0, %v6982_v4  ;;  %6264 = vmatmul.mubr.msk.f32.gmra.mxu1 %vm259_vm0, %v1584_v50  ;;  %v1948_v4 = vld [vmem:[#allocation2 + $0xf8] sm:$0xff] }
 0x19d   : > { %6289 = vmatprep.mubr.msk.f32.mxu0 %vm259_vm0, %v6995_v12  ;;  %v500_v12 = vld [vmem:[#allocation3 + $0x48] sm:$0xff] }
 0x1a0   : > { %6290 = vmatmul.mubr.msk.f32.gmra.mxu0 %vm259_vm0, %v7004_v14  ;;  %v862_v14 = vld [vmem:[#allocation3 + $0x38] sm:$0xff] }
 0x1a1   : > { %6292 = vmatprep.mubr.msk.f32.mxu0 %vm259_vm0, %v7014_v20 }
 0x1a4   : > { %6293 = vmatmul.mubr.msk.f32.gmra.mxu0 %vm259_vm0, %v7021_v21 }
 0x1a5   : > { %6295 = vmatprep.mubr.msk.f32.mxu0 %vm259_vm0, %v7078_v33  ;;  %v499_v33 = vld [vmem:[#allocation3 + $0x40] sm:$0xff] }
 0x1a8   : > { %6296 = vmatmul.mubr.msk.f32.gmra.mxu0 %vm259_vm0, %v7085_v34  ;;  %v861_v34 = vld [vmem:[#allocation3 + $0x30] sm:$0xff] }
 0x1a9   : > { %6298 = vmatprep.mubr.msk.f32.mxu0 %vm259_vm0, %v7106_v19 }
 0x1ac   : > { %6299 = vmatmul.mubr.msk.f32.gmra.mxu0 %vm259_vm0, %v7115_v8 }
 0x1ad   : > { %6301 = vmatprep.mubr.msk.f32.mxu0 %vm259_vm0, %v7126_v31 }
 0x1b0   : > { %6302 = vmatmul.mubr.msk.f32.gmra.mxu0 %vm259_vm0, %v7133_v32 }
 0x1b1   : > { %6304 = vmatprep.mubr.msk.f32.mxu0 %vm259_vm0, %v7141_v37 }
 0x1b4   : > { %6305 = vmatmul.mubr.msk.f32.gmra.mxu0 %vm259_vm0, %v7148_v38 }
 0x1b5   : > { %6307 = vmatprep.mubr.msk.f32.mxu0 %vm259_vm0, %v7154_v39 }
 0x1b8   : > { %6308 = vmatmul.mubr.msk.f32.gmra.mxu0 %vm259_vm0, %v7162_v41 }
 0x1b9   : > { %6310 = vmatprep.mubr.msk.f32.mxu0 %vm259_vm0, %v7156_v40 }
 0x1bc   : > { %6311 = vmatmul.mubr.msk.f32.gmra.mxu0 %vm259_vm0, %v7172_v42  ;;  %v508_v42 = vld [vmem:[#allocation3 + $0x88] sm:$0xff] }
 0x1bd   : > { %6313 = vmatprep.mubr.msk.f32.mxu0 %vm259_vm0, %v1218_v47 }
 0x1c0   : > { %6314 = vmatmul.mubr.msk.f32.gmra.mxu0 %vm259_vm0, %v1219_v48 }
 0x1c1   : > { %6316 = vmatprep.mubr.msk.f32.mxu0 %vm259_vm0, %v1583_v49  ;;  %v510_v49 = vld [vmem:[#allocation3 + $0x98] sm:$0xff] }
 0x1c4   : > { %6317 = vmatmul.mubr.msk.f32.gmra.mxu0 %vm259_vm0, %v1584_v50 }
 0x1c5   : > { %6319 = vmatprep.mubr.msk.f32.mxu0 %vm259_vm0, %v1947_v3 }
 0x1c8   : > { %6320 = vmatmul.mubr.msk.f32.gmra.mxu0 %vm259_vm0, %v1948_v4  ;;  %v509_v4 = vld [vmem:[#allocation3 + $0x90] sm:$0xff]  ;;  %vm2827_vm0 = vcmask 240832  }
 0x1d0   : > { %v6076_v20 = vpop.f32.mrf.mxu0  ;;  %v6129_v21 = vpop.f32.mrf.mxu1 }
 0x1d1   : > { %v791_v51 = vadd.f32 %v6076_v20, %v500_v12  ;;  %v1154_v52 = vadd.f32 %v6129_v21, %v862_v14 }
 0x1d2   : > { %v703_v53 = vpop.f32.mrf.mxu0  ;;  %v1058_v54 = vpop.f32.mrf.mxu1 }
 0x1d3   : > { %815 = vst.msk [vmem:[#allocation3 + $0x48] sm:$0xff] %vm442_vm6, %v791_v51  ;;  %1178 = vst.msk [vmem:[#allocation3 + $0x38] sm:$0xff] %vm442_vm6, %v1154_v52  ;;  %v790_v55 = vadd.f32 %v703_v53, %v499_v33  ;;  %v1153_v56 = vadd.f32 %v1058_v54, %v861_v34  ;;  %v512_v53 = vld [vmem:[#allocation3 + $0xa8] sm:$0xff] }
 0x1d5   : > { %814 = vst.msk [vmem:[#allocation3 + $0x40] sm:$0xff] %vm442_vm6, %v790_v55  ;;  %1177 = vst.msk [vmem:[#allocation3 + $0x30] sm:$0xff] %vm442_vm6, %v1153_v56  ;;  %v511_v56 = vld [vmem:[#allocation3 + $0xa0] sm:$0xff] }
 0x1da   : > { %v864_v60 = vld [vmem:[#allocation3 + $0x48] sm:$0xff] }
 0x1dc   : > { %v863_v5 = vld [vmem:[#allocation3 + $0x40] sm:$0xff] }
 0x1e0   : > { %v6079_v59 = vpop.f32.mrf.mxu0  ;;  %v6132_v61 = vpop.f32.mrf.mxu1 }
 0x1e1   : > { %v793_v63 = vadd.f32 %v6079_v59, %v502_v58  ;;  %v1156_v1 = vadd.f32 %v6132_v61, %v864_v60 }
 0x1e2   : > { %v713_v2 = vpop.f32.mrf.mxu0  ;;  %v1068_v6 = vpop.f32.mrf.mxu1 }
 0x1e3   : > { %817 = vst.msk [vmem:[#allocation3 + $0x58] sm:$0xff] %vm442_vm6, %v793_v63  ;;  %1180 = vst.msk [vmem:[#allocation3 + $0x48] sm:$0xff] %vm442_vm6, %v1156_v1  ;;  %v792_v7 = vadd.f32 %v713_v2, %v501_v62  ;;  %v1155_v9 = vadd.f32 %v1068_v6, %v863_v5  ;;  %v514_v5 = vld [vmem:[#allocation3 + $0xb8] sm:$0xff] }
 0x1e5   : > { %816 = vst.msk [vmem:[#allocation3 + $0x50] sm:$0xff] %vm442_vm6, %v792_v7  ;;  %1179 = vst.msk [vmem:[#allocation3 + $0x40] sm:$0xff] %vm442_vm6, %v1155_v9  ;;  %v513_v9 = vld [vmem:[#allocation3 + $0xb0] sm:$0xff] }
 0x1ea   : > { %v866_v15 = vld [vmem:[#allocation3 + $0x58] sm:$0xff] }
 0x1ec   : > { %v865_v8 = vld [vmem:[#allocation3 + $0x50] sm:$0xff] }
 0x1f0   : > { %v6082_v11 = vpop.f32.mrf.mxu0  ;;  %v6135_v16 = vpop.f32.mrf.mxu1 }
 0x1f1   : > { %v795_v18 = vadd.f32 %v6082_v11, %v504_v10  ;;  %v1158_v19 = vadd.f32 %v6135_v16, %v866_v15 }
 0x1f2   : > { %v723_v22 = vpop.f32.mrf.mxu0  ;;  %v1078_v23 = vpop.f32.mrf.mxu1 }
 0x1f3   : > { %819 = vst.msk [vmem:[#allocation3 + $0x68] sm:$0xff] %vm442_vm6, %v795_v18  ;;  %1182 = vst.msk [vmem:[#allocation3 + $0x58] sm:$0xff] %vm442_vm6, %v1158_v19  ;;  %v794_v24 = vadd.f32 %v723_v22, %v503_v17  ;;  %v1157_v25 = vadd.f32 %v1078_v23, %v865_v8  ;;  %v1221_v8 = vld [vmem:[#allocation3 + $0x8] sm:$0xff] }
 0x1f5   : > { %818 = vst.msk [vmem:[#allocation3 + $0x60] sm:$0xff] %vm442_vm6, %v794_v24  ;;  %1181 = vst.msk [vmem:[#allocation3 + $0x50] sm:$0xff] %vm442_vm6, %v1157_v25 }
 0x1fa   : > { %v868_v31 = vld [vmem:[#allocation3 + $0x68] sm:$0xff] }
 0x1fc   : > { %v867_v38 = vld [vmem:[#allocation3 + $0x60] sm:$0xff] }
 0x200   : > { %v6085_v28 = vpop.f32.mrf.mxu0  ;;  %v6138_v32 = vpop.f32.mrf.mxu1 }
 0x201   : > { %v797_v35 = vadd.f32 %v6085_v28, %v506_v0  ;;  %v1160_v36 = vadd.f32 %v6138_v32, %v868_v31  ;;  %v1220_v28 = vld [vmem:[#allocation3] sm:$0xff] }
 0x202   : > { %v733_v37 = vpop.f32.mrf.mxu0  ;;  %v1088_v39 = vpop.f32.mrf.mxu1 }
 0x203   : > { %821 = vst.msk [vmem:[#allocation3 + $0x78] sm:$0xff] %vm442_vm6, %v797_v35  ;;  %1184 = vst.msk [vmem:[#allocation3 + $0x68] sm:$0xff] %vm442_vm6, %v1160_v36  ;;  %v796_v40 = vadd.f32 %v733_v37, %v505_v13  ;;  %v1159_v41 = vadd.f32 %v1088_v39, %v867_v38  ;;  %v1223_v13 = vld [vmem:[#allocation3 + $0x18] sm:$0xff]  ;;  %v1222_v39 = vld [vmem:[#allocation3 + $0x10] sm:$0xff] }
 0x205   : > { %820 = vst.msk [vmem:[#allocation3 + $0x70] sm:$0xff] %vm442_vm6, %v796_v40  ;;  %1183 = vst.msk [vmem:[#allocation3 + $0x60] sm:$0xff] %vm442_vm6, %v1159_v41 }
 0x20a   : > { %v870_v26 = vld [vmem:[#allocation3 + $0x78] sm:$0xff] }
 0x20c   : > { %v869_v45 = vld [vmem:[#allocation3 + $0x70] sm:$0xff] }
 0x210   : > { %v6088_v43 = vpop.f32.mrf.mxu0  ;;  %v6141_v27 = vpop.f32.mrf.mxu1 }
 0x211   : > { %v799_v30 = vadd.f32 %v6088_v43, %v508_v42  ;;  %v1162_v57 = vadd.f32 %v6141_v27, %v870_v26  ;;  %v1225_v27 = vld [vmem:[#allocation3 + $0x28] sm:$0xff] }
 0x212   : > { %v743_v44 = vpop.f32.mrf.mxu0  ;;  %v1098_v46 = vpop.f32.mrf.mxu1 }
 0x213   : > { %823 = vst.msk [vmem:[#allocation3 + $0x88] sm:$0xff] %vm442_vm6, %v799_v30  ;;  %1186 = vst.msk [vmem:[#allocation3 + $0x78] sm:$0xff] %vm442_vm6, %v1162_v57  ;;  %v798_v47 = vadd.f32 %v743_v44, %v507_v29  ;;  %v1161_v48 = vadd.f32 %v1098_v46, %v869_v45  ;;  %v1224_v46 = vld [vmem:[#allocation3 + $0x20] sm:$0xff] }
 0x215   : > { %822 = vst.msk [vmem:[#allocation3 + $0x80] sm:$0xff] %vm442_vm6, %v798_v47  ;;  %1185 = vst.msk [vmem:[#allocation3 + $0x70] sm:$0xff] %vm442_vm6, %v1161_v48 }
 0x218   : > { %v6091_v50 = vpop.f32.mrf.mxu0  ;;  %v6144_v3 = vpop.f32.mrf.mxu1 }
 0x219   : > { %v801_v12 = vadd.f32 %v6091_v50, %v510_v49 }
 0x21a   : > { %v872_v14 = vld [vmem:[#allocation3 + $0x88] sm:$0xff]  ;;  %v753_v20 = vpop.f32.mrf.mxu0  ;;  %v1108_v51 = vpop.f32.mrf.mxu1 }
 0x21b   : > { %825 = vst.msk [vmem:[#allocation3 + $0x98] sm:$0xff] %vm442_vm6, %v801_v12  ;;  %v1164_v21 = vadd.f32 %v6144_v3, %v872_v14  ;;  %v800_v33 = vadd.f32 %v753_v20, %v509_v4  ;;  %v1227_v4 = vld [vmem:[#allocation3 + $0x38] sm:$0xff] }
 0x21c   : > { %v871_v34 = vld [vmem:[#allocation3 + $0x80] sm:$0xff] }
 0x21d   : > { %1188 = vst.msk [vmem:[#allocation3 + $0x88] sm:$0xff] %vm442_vm6, %v1164_v21  ;;  %824 = vst.msk [vmem:[#allocation3 + $0x90] sm:$0xff] %vm442_vm6, %v800_v33  ;;  %v1163_v52 = vadd.f32 %v1108_v51, %v871_v34  ;;  %v1226_v34 = vld [vmem:[#allocation3 + $0x30] sm:$0xff] }
 0x21f   : > { %1187 = vst.msk [vmem:[#allocation3 + $0x80] sm:$0xff] %vm442_vm6, %v1163_v52 }
 0x220   : > { %v6094_v54 = vpop.f32.mrf.mxu0  ;;  %v6147_v55 = vpop.f32.mrf.mxu1 }
 0x221   : > { %v803_v58 = vadd.f32 %v6094_v54, %v512_v53 }
 0x222   : > { %v874_v59 = vld [vmem:[#allocation3 + $0x98] sm:$0xff]  ;;  %v763_v60 = vpop.f32.mrf.mxu0  ;;  %v1118_v1 = vpop.f32.mrf.mxu1 }
 0x223   : > { %827 = vst.msk [vmem:[#allocation3 + $0xa8] sm:$0xff] %vm442_vm6, %v803_v58  ;;  %v1166_v61 = vadd.f32 %v6147_v55, %v874_v59  ;;  %v802_v62 = vadd.f32 %v763_v60, %v511_v56  ;;  %v1229_v56 = vld [vmem:[#allocation3 + $0x48] sm:$0xff] }
 0x224   : > { %v873_v63 = vld [vmem:[#allocation3 + $0x90] sm:$0xff] }
 0x225   : > { %1190 = vst.msk [vmem:[#allocation3 + $0x98] sm:$0xff] %vm442_vm6, %v1166_v61  ;;  %826 = vst.msk [vmem:[#allocation3 + $0xa0] sm:$0xff] %vm442_vm6, %v802_v62  ;;  %v1165_v2 = vadd.f32 %v1118_v1, %v873_v63  ;;  %v1228_v63 = vld [vmem:[#allocation3 + $0x40] sm:$0xff] }
 0x227   : > { %1189 = vst.msk [vmem:[#allocation3 + $0x90] sm:$0xff] %vm442_vm6, %v1165_v2 }
 0x228   : > { %v6097_v6 = vpop.f32.mrf.mxu0  ;;  %v6150_v7 = vpop.f32.mrf.mxu1 }
 0x229   : > { %v805_v10 = vadd.f32 %v6097_v6, %v514_v5 }
 0x22a   : > { %v876_v11 = vld [vmem:[#allocation3 + $0xa8] sm:$0xff]  ;;  %v773_v15 = vpop.f32.mrf.mxu0  ;;  %v1128_v16 = vpop.f32.mrf.mxu1 }
 0x22b   : > { %829 = vst.msk [vmem:[#allocation3 + $0xb8] sm:$0xff] %vm442_vm6, %v805_v10  ;;  %v1168_v17 = vadd.f32 %v6150_v7, %v876_v11  ;;  %v804_v18 = vadd.f32 %v773_v15, %v513_v9  ;;  %v1231_v9 = vld [vmem:[#allocation3 + $0x58] sm:$0xff] }
 0x22c   : > { %v875_v19 = vld [vmem:[#allocation3 + $0xa0] sm:$0xff]  ;;  %v6153_v22 = vpop.f32.mrf.mxu1  ;;  %v6176_v23 = vpop.f32.mrf.mxu0 }
 0x22d   : > { %1192 = vst.msk [vmem:[#allocation3 + $0xa8] sm:$0xff] %vm442_vm6, %v1168_v17  ;;  %828 = vst.msk [vmem:[#allocation3 + $0xb0] sm:$0xff] %vm442_vm6, %v804_v18  ;;  %v1167_v24 = vadd.f32 %v1128_v16, %v875_v19  ;;  %v1513_v25 = vadd.f32 %v6176_v23, %v1221_v8  ;;  %v1230_v18 = vld [vmem:[#allocation3 + $0x50] sm:$0xff] }
 0x22e   : > { %v1138_v0 = vpop.f32.mrf.mxu1  ;;  %v1393_v31 = vpop.f32.mrf.mxu0 }
 0x22f   : > { %1191 = vst.msk [vmem:[#allocation3 + $0xa0] sm:$0xff] %vm442_vm6, %v1167_v24  ;;  %1537 = vst.msk [vmem:[#allocation3 + $0x8] sm:$0xff] %vm442_vm6, %v1513_v25  ;;  %v1512_v32 = vadd.f32 %v1393_v31, %v1220_v28  ;;  %v1233_v25 = vld [vmem:[#allocation3 + $0x68] sm:$0xff] }
 0x230   : > { %v6179_v35 = vpop.f32.mrf.mxu0  ;;  %v6232_v36 = vpop.f32.mrf.mxu1 }
 0x231   : > { %1536 = vst.msk [vmem:[#allocation3] sm:$0xff] %vm442_vm6, %v1512_v32  ;;  %v1515_v37 = vadd.f32 %v6179_v35, %v1223_v13  ;;  %v1232_v35 = vld [vmem:[#allocation3 + $0x60] sm:$0xff] }
 0x232   : > { %v878_v38 = vld [vmem:[#allocation3 + $0xb8] sm:$0xff]  ;;  %v1403_v40 = vpop.f32.mrf.mxu0  ;;  %v1758_v41 = vpop.f32.mrf.mxu1 }
 0x233   : > { %v1170_v42 = vadd.f32 %v6153_v22, %v878_v38  ;;  %1539 = vst.msk [vmem:[#allocation3 + $0x18] sm:$0xff] %vm442_vm6, %v1515_v37  ;;  %v1514_v43 = vadd.f32 %v1403_v40, %v1222_v39 }
 0x234   : > { %v877_v26 = vld [vmem:[#allocation3 + $0xb0] sm:$0xff]  ;;  %v6182_v29 = vpop.f32.mrf.mxu0  ;;  %v6235_v30 = vpop.f32.mrf.mxu1 }
 0x235   : > { %1194 = vst.msk [vmem:[#allocation3 + $0xb8] sm:$0xff] %vm442_vm6, %v1170_v42  ;;  %v1169_v57 = vadd.f32 %v1138_v0, %v877_v26  ;;  %1538 = vst.msk [vmem:[#allocation3 + $0x10] sm:$0xff] %vm442_vm6, %v1514_v43  ;;  %v1517_v44 = vadd.f32 %v6182_v29, %v1225_v27 }
 0x236   : > { %v1586_v45 = vld [vmem:[#allocation3 + $0x8] sm:$0xff]  ;;  %v1413_v47 = vpop.f32.mrf.mxu0  ;;  %v1768_v48 = vpop.f32.mrf.mxu1 }
 0x237   : > { %1193 = vst.msk [vmem:[#allocation3 + $0xb0] sm:$0xff] %vm442_vm6, %v1169_v57  ;;  %v1878_v49 = vadd.f32 %v6232_v36, %v1586_v45  ;;  %1541 = vst.msk [vmem:[#allocation3 + $0x28] sm:$0xff] %vm442_vm6, %v1517_v44  ;;  %v1516_v50 = vadd.f32 %v1413_v47, %v1224_v46 }
 0x238   : > { %v1585_v3 = vld [vmem:[#allocation3] sm:$0xff]  ;;  %v6185_v12 = vpop.f32.mrf.mxu0  ;;  %v6238_v14 = vpop.f32.mrf.mxu1 }
 0x239   : > { %1902 = vst.msk [vmem:[#allocation3 + $0x8] sm:$0xff] %vm442_vm6, %v1878_v49  ;;  %v1877_v20 = vadd.f32 %v1758_v41, %v1585_v3  ;;  %1540 = vst.msk [vmem:[#allocation3 + $0x20] sm:$0xff] %vm442_vm6, %v1516_v50  ;;  %v1519_v21 = vadd.f32 %v6185_v12, %v1227_v4  ;;  %v1235_v41 = vld [vmem:[#allocation3 + $0x78] sm:$0xff] }
 0x23a   : > { %v1588_v33 = vld [vmem:[#allocation3 + $0x18] sm:$0xff]  ;;  %v1423_v51 = vpop.f32.mrf.mxu0  ;;  %v1778_v52 = vpop.f32.mrf.mxu1 }
 0x23b   : > { %1901 = vst.msk [vmem:[#allocation3] sm:$0xff] %vm442_vm6, %v1877_v20  ;;  %v1880_v53 = vadd.f32 %v6235_v30, %v1588_v33  ;;  %1543 = vst.msk [vmem:[#allocation3 + $0x38] sm:$0xff] %vm442_vm6, %v1519_v21  ;;  %v1518_v54 = vadd.f32 %v1423_v51, %v1226_v34  ;;  %v1234_v30 = vld [vmem:[#allocation3 + $0x70] sm:$0xff] }
 0x23c   : > { %v1587_v55 = vld [vmem:[#allocation3 + $0x10] sm:$0xff]  ;;  %v6188_v58 = vpop.f32.mrf.mxu0  ;;  %v6241_v59 = vpop.f32.mrf.mxu1 }
 0x23d   : > { %1904 = vst.msk [vmem:[#allocation3 + $0x18] sm:$0xff] %vm442_vm6, %v1880_v53  ;;  %v1879_v60 = vadd.f32 %v1768_v48, %v1587_v55  ;;  %1542 = vst.msk [vmem:[#allocation3 + $0x30] sm:$0xff] %vm442_vm6, %v1518_v54  ;;  %v1521_v61 = vadd.f32 %v6188_v58, %v1229_v56  ;;  %v1237_v48 = vld [vmem:[#allocation3 + $0x88] sm:$0xff] }
 0x23e   : > { %v1590_v62 = vld [vmem:[#allocation3 + $0x28] sm:$0xff]  ;;  %v1433_v1 = vpop.f32.mrf.mxu0  ;;  %v1788_v2 = vpop.f32.mrf.mxu1 }
 0x23f   : > { %1903 = vst.msk [vmem:[#allocation3 + $0x10] sm:$0xff] %vm442_vm6, %v1879_v60  ;;  %v1882_v5 = vadd.f32 %v6238_v14, %v1590_v62  ;;  %1545 = vst.msk [vmem:[#allocation3 + $0x48] sm:$0xff] %vm442_vm6, %v1521_v61  ;;  %v1520_v6 = vadd.f32 %v1433_v1, %v1228_v63  ;;  %v1236_v14 = vld [vmem:[#allocation3 + $0x80] sm:$0xff] }
 0x240   : > { %v1589_v7 = vld [vmem:[#allocation3 + $0x20] sm:$0xff]  ;;  %v6191_v10 = vpop.f32.mrf.mxu0  ;;  %v6244_v11 = vpop.f32.mrf.mxu1 }
 0x241   : > { %1906 = vst.msk [vmem:[#allocation3 + $0x28] sm:$0xff] %vm442_vm6, %v1882_v5  ;;  %v1881_v15 = vadd.f32 %v1778_v52, %v1589_v7  ;;  %1544 = vst.msk [vmem:[#allocation3 + $0x40] sm:$0xff] %vm442_vm6, %v1520_v6  ;;  %v1523_v16 = vadd.f32 %v6191_v10, %v1231_v9  ;;  %v1239_v52 = vld [vmem:[#allocation3 + $0x98] sm:$0xff] }
 0x242   : > { %v1592_v17 = vld [vmem:[#allocation3 + $0x38] sm:$0xff]  ;;  %v1443_v19 = vpop.f32.mrf.mxu0  ;;  %v1798_v22 = vpop.f32.mrf.mxu1 }
 0x243   : > { %1905 = vst.msk [vmem:[#allocation3 + $0x20] sm:$0xff] %vm442_vm6, %v1881_v15  ;;  %v1884_v8 = vadd.f32 %v6241_v59, %v1592_v17  ;;  %1547 = vst.msk [vmem:[#allocation3 + $0x58] sm:$0xff] %vm442_vm6, %v1523_v16  ;;  %v1522_v23 = vadd.f32 %v1443_v19, %v1230_v18  ;;  %v1238_v59 = vld [vmem:[#allocation3 + $0x90] sm:$0xff]  ;;  %v2950_v19 = vld [vmem:[%s8580_s3 + $0x18] sm:$0x3f] }
 0x244   : > { %v1591_v24 = vld [vmem:[#allocation3 + $0x30] sm:$0xff]  ;;  %v6194_v0 = vpop.f32.mrf.mxu0  ;;  %v6247_v28 = vpop.f32.mrf.mxu1  ;;  %6322 = vmatprep.subr.msk.mxu0 %vm3047_vm8, %v2950_v19  ;;  %6602 = vmatprep.subr.msk.mxu1 %vm3047_vm8, %v2950_v19 }
 0x245   : > { %1908 = vst.msk [vmem:[#allocation3 + $0x38] sm:$0xff] %vm442_vm6, %v1884_v8  ;;  %v1883_v31 = vadd.f32 %v1788_v2, %v1591_v24  ;;  %1546 = vst.msk [vmem:[#allocation3 + $0x50] sm:$0xff] %vm442_vm6, %v1522_v23  ;;  %v1525_v32 = vadd.f32 %v6194_v0, %v1233_v25  ;;  %v1241_v2 = vld [vmem:[#allocation3 + $0xa8] sm:$0xff]  ;;  %v1243_v8 = vld [vmem:[#allocation3 + $0xb8] sm:$0xff]  ;;  %6323 = vmatpush3.msk.msra.mxu0 %vm3047_vm8, %v2950_v19  ;;  %6606 = vmatpush3.msk.msra.mxu1 %vm3047_vm8, %v2950_v19 }
 0x246   : > { %v1594_v13 = vld [vmem:[#allocation3 + $0x48] sm:$0xff]  ;;  %v1453_v36 = vpop.f32.mrf.mxu0  ;;  %v1808_v37 = vpop.f32.mrf.mxu1 }
 0x247   : > { %1907 = vst.msk [vmem:[#allocation3 + $0x30] sm:$0xff] %vm442_vm6, %v1883_v31  ;;  %v1886_v38 = vadd.f32 %v6244_v11, %v1594_v13  ;;  %1549 = vst.msk [vmem:[#allocation3 + $0x68] sm:$0xff] %vm442_vm6, %v1525_v32  ;;  %v1524_v39 = vadd.f32 %v1453_v36, %v1232_v35  ;;  %v1240_v11 = vld [vmem:[#allocation3 + $0xa0] sm:$0xff] }
 0x248   : > { %v1593_v40 = vld [vmem:[#allocation3 + $0x40] sm:$0xff]  ;;  %v6197_v42 = vpop.f32.mrf.mxu0  ;;  %v6250_v43 = vpop.f32.mrf.mxu1 }
 0x249   : > { %1910 = vst.msk [vmem:[#allocation3 + $0x48] sm:$0xff] %vm442_vm6, %v1886_v38  ;;  %v1885_v26 = vadd.f32 %v1798_v22, %v1593_v40  ;;  %1548 = vst.msk [vmem:[#allocation3 + $0x60] sm:$0xff] %vm442_vm6, %v1524_v39  ;;  %v1527_v27 = vadd.f32 %v6197_v42, %v1235_v41  ;;  %v1950_v39 = vld [vmem:[#allocation3 + $0x8] sm:$0xff] }
 0x24a   : > { %v1596_v29 = vld [vmem:[#allocation3 + $0x58] sm:$0xff]  ;;  %v1463_v57 = vpop.f32.mrf.mxu0  ;;  %v1818_v44 = vpop.f32.mrf.mxu1 }
 0x24b   : > { %1909 = vst.msk [vmem:[#allocation3 + $0x40] sm:$0xff] %vm442_vm6, %v1885_v26  ;;  %v1888_v45 = vadd.f32 %v6247_v28, %v1596_v29  ;;  %1551 = vst.msk [vmem:[#allocation3 + $0x78] sm:$0xff] %vm442_vm6, %v1527_v27  ;;  %v1526_v46 = vadd.f32 %v1463_v57, %v1234_v30  ;;  %v1242_v28 = vld [vmem:[#allocation3 + $0xb0] sm:$0xff]  ;;  %v1949_v26 = vld [vmem:[#allocation3] sm:$0xff] }
 0x24c   : > { %v1595_v47 = vld [vmem:[#allocation3 + $0x50] sm:$0xff]  ;;  %v6200_v49 = vpop.f32.mrf.mxu0  ;;  %v6253_v50 = vpop.f32.mrf.mxu1  ;;  %v2948_v30 = vld [vmem:[%s8580_s3 + $0x8] sm:$0xff] }
 0x24d   : > { %1912 = vst.msk [vmem:[#allocation3 + $0x58] sm:$0xff] %vm442_vm6, %v1888_v45  ;;  %v1887_v3 = vadd.f32 %v1808_v37, %v1595_v47  ;;  %1550 = vst.msk [vmem:[#allocation3 + $0x70] sm:$0xff] %vm442_vm6, %v1526_v46  ;;  %v1529_v4 = vadd.f32 %v6200_v49, %v1237_v48  ;;  %v2949_v37 = vld [vmem:[%s8580_s3 + $0x10] sm:$0xff]  ;;  %v2947_v45 = vld [vmem:[%s8580_s3] sm:$0xff] }
 0x24e   : > { %v1598_v12 = vld [vmem:[#allocation3 + $0x68] sm:$0xff]  ;;  %v1473_v20 = vpop.f32.mrf.mxu0  ;;  %v1828_v21 = vpop.f32.mrf.mxu1  ;;  %6324 = vmatprep.subr.mxu0 %v2949_v37  ;;  %6603 = vmatprep.subr.mxu1 %v2949_v37  ;;  %v1952_v47 = vld [vmem:[#allocation3 + $0x18] sm:$0xff] }
 0x24f   : > { %1911 = vst.msk [vmem:[#allocation3 + $0x50] sm:$0xff] %vm442_vm6, %v1887_v3  ;;  %v1890_v33 = vadd.f32 %v6250_v43, %v1598_v12  ;;  %1553 = vst.msk [vmem:[#allocation3 + $0x88] sm:$0xff] %vm442_vm6, %v1529_v4  ;;  %v1528_v34 = vadd.f32 %v1473_v20, %v1236_v14  ;;  %6325 = vmatpush3.msra.mxu0 %v2949_v37  ;;  %6607 = vmatpush3.msra.mxu1 %v2949_v37  ;;  %v2883_v3 = vld [vmem:[#allocation4] sm:$0xff]  ;;  %v1951_v12 = vld [vmem:[#allocation3 + $0x10] sm:$0xff] }
 0x250   : > { %v1597_v51 = vld [vmem:[#allocation3 + $0x60] sm:$0xff]  ;;  %v6203_v53 = vpop.f32.mrf.mxu0  ;;  %v6256_v54 = vpop.f32.mrf.mxu1  ;;  %6326 = vmatprep.subr.mxu0 %v2948_v30  ;;  %6604 = vmatprep.subr.mxu1 %v2948_v30 }
 0x251   : > { %1914 = vst.msk [vmem:[#allocation3 + $0x68] sm:$0xff] %vm442_vm6, %v1890_v33  ;;  %v1889_v55 = vadd.f32 %v1818_v44, %v1597_v51  ;;  %1552 = vst.msk [vmem:[#allocation3 + $0x80] sm:$0xff] %vm442_vm6, %v1528_v34  ;;  %v1531_v56 = vadd.f32 %v6203_v53, %v1239_v52  ;;  %6327 = vmatpush3.msra.mxu0 %v2948_v30  ;;  %6608 = vmatpush3.msra.mxu1 %v2948_v30  ;;  %v5543_v51 = vld [vmem:[%s8580_s3 + $0x38] sm:$0x3f]  ;;  %v5542_v52 = vld [vmem:[%s8580_s3 + $0x30] sm:$0xff] }
 0x252   : > { %v1600_v58 = vld [vmem:[#allocation3 + $0x78] sm:$0xff]  ;;  %v1483_v60 = vpop.f32.mrf.mxu0  ;;  %v1838_v61 = vpop.f32.mrf.mxu1  ;;  %6328 = vmatprep.subr.mxu0 %v2947_v45  ;;  %6605 = vmatprep.subr.mxu1 %v2947_v45 }
 0x253   : > { %1913 = vst.msk [vmem:[#allocation3 + $0x60] sm:$0xff] %vm442_vm6, %v1889_v55  ;;  %v1892_v62 = vadd.f32 %v6253_v50, %v1600_v58  ;;  %1555 = vst.msk [vmem:[#allocation3 + $0x98] sm:$0xff] %vm442_vm6, %v1531_v56  ;;  %v1530_v63 = vadd.f32 %v1483_v60, %v1238_v59  ;;  %6329 = vmatpush3.msra.mxu0 %v2947_v45  ;;  %6330 = vmatprep.mubr.msk.f32.mxu0 %vm2368_vm7, %v2883_v3  ;;  %v7524_v56 = vld [vmem:[%s8579_s2] ss:$0 sm:$0xff]  ;;  %v2885_v60 = vld [vmem:[#allocation4 + $0x10] sm:$0xff] }
 0x254   : > { %v1599_v1 = vld [vmem:[#allocation3 + $0x70] sm:$0xff]  ;;  %v6206_v5 = vpop.f32.mrf.mxu0  ;;  %v6259_v6 = vpop.f32.mrf.mxu1  ;;  %6609 = vmatpush3.msra.mxu1 %v2947_v45  ;;  %6378 = vmatprep.subr.msk.mxu0 %vm3047_vm8, %v5543_v51  ;;  %v2890_v45 = vld [vmem:[#allocation4 + $0x38] sm:$0xff] }
 0x255   : > { %1916 = vst.msk [vmem:[#allocation3 + $0x78] sm:$0xff] %vm442_vm6, %v1892_v62  ;;  %v1891_v7 = vadd.f32 %v1828_v21, %v1599_v1  ;;  %1554 = vst.msk [vmem:[#allocation3 + $0x90] sm:$0xff] %vm442_vm6, %v1530_v63  ;;  %v1533_v9 = vadd.f32 %v6206_v5, %v1241_v2  ;;  %v2884_v21 = vld [vmem:[#allocation4 + $0x8] sm:$0xff]  ;;  %v2886_v1 = vld [vmem:[#allocation4 + $0x18] sm:$0xff] }
 0x256   : > { %v1602_v10 = vld [vmem:[#allocation3 + $0x88] sm:$0xff]  ;;  %v1493_v15 = vpop.f32.mrf.mxu0  ;;  %v1848_v16 = vpop.f32.mrf.mxu1  ;;  %6331 = vmatmul.mubr.msk.f32.vlgmr.msra.gmra.mxu0 %vm2368_vm7, %v2884_v21 }
 0x257   : > { %1915 = vst.msk [vmem:[#allocation3 + $0x70] sm:$0xff] %vm442_vm6, %v1891_v7  ;;  %v1894_v17 = vadd.f32 %v6256_v54, %v1602_v10  ;;  %1557 = vst.msk [vmem:[#allocation3 + $0xa8] sm:$0xff] %vm442_vm6, %v1533_v9  ;;  %v1532_v18 = vadd.f32 %v1493_v15, %v1240_v11  ;;  %v1954_v54 = vld [vmem:[#allocation3 + $0x28] sm:$0xff]  ;;  %6379 = vmatpush3.msk.msra.mxu0 %vm3047_vm8, %v5543_v51  ;;  %6333 = vmatprep.mubr.msk.f32.mxu0 %vm2368_vm7, %v2885_v60  ;;  %v5540_v7 = vld [vmem:[%s8580_s3 + $0x20] sm:$0xff] }
 0x258   : > { %v1601_v22 = vld [vmem:[#allocation3 + $0x80] sm:$0xff]  ;;  %v6209_v23 = vpop.f32.mrf.mxu0  ;;  %v6262_v24 = vpop.f32.mrf.mxu1  ;;  %6380 = vmatprep.subr.mxu0 %v5542_v52  ;;  %v1956_v9 = vld [vmem:[#allocation3 + $0x38] sm:$0xff] }
 0x259   : > { %1918 = vst.msk [vmem:[#allocation3 + $0x88] sm:$0xff] %vm442_vm6, %v1894_v17  ;;  %v1893_v25 = vadd.f32 %v1838_v61, %v1601_v22  ;;  %1556 = vst.msk [vmem:[#allocation3 + $0xa0] sm:$0xff] %vm442_vm6, %v1532_v18  ;;  %v1535_v0 = vadd.f32 %v6209_v23, %v1243_v8  ;;  %v1953_v61 = vld [vmem:[#allocation3 + $0x20] sm:$0xff]  ;;  %6381 = vmatpush3.msra.mxu0 %v5542_v52  ;;  %v1955_v18 = vld [vmem:[#allocation3 + $0x30] sm:$0xff] }
 0x25a   : > { %v1503_v31 = vpop.f32.mrf.mxu0  ;;  %v1604_v32 = vld [vmem:[#allocation3 + $0x98] sm:$0xff]  ;;  %v1858_v13 = vpop.f32.mrf.mxu1  ;;  %6334 = vmatmul.mubr.msk.f32.gmra.mxu0 %vm2368_vm7, %v2886_v1 }
 0x25b   : > { %1917 = vst.msk [vmem:[#allocation3 + $0x80] sm:$0xff] %vm442_vm6, %v1893_v25  ;;  %1559 = vst.msk [vmem:[#allocation3 + $0xb8] sm:$0xff] %vm442_vm6, %v1535_v0  ;;  %v1534_v35 = vadd.f32 %v1503_v31, %v1242_v28  ;;  %v1896_v36 = vadd.f32 %v6259_v6, %v1604_v32  ;;  %v5541_v6 = vld [vmem:[%s8580_s3 + $0x28] sm:$0xff]  ;;  %6386 = vmatprep.mubr.msk.f32.mxu0 %vm2368_vm7, %v2885_v60 }
 0x25c   : > { %v1603_v38 = vld [vmem:[#allocation3 + $0x90] sm:$0xff]  ;;  %v6288_v40 = vpop.f32.mrf.mxu0  ;;  %v6265_v29 = vpop.f32.mrf.mxu1  ;;  %6382 = vmatprep.subr.mxu0 %v5541_v6  ;;  %v1958_v25 = vld [vmem:[#allocation3 + $0x48] sm:$0xff] }
 0x25d   : > { %1558 = vst.msk [vmem:[#allocation3 + $0xb0] sm:$0xff] %vm442_vm6, %v1534_v35  ;;  %1920 = vst.msk [vmem:[#allocation3 + $0x98] sm:$0xff] %vm442_vm6, %v1896_v36  ;;  %v1895_v41 = vadd.f32 %v1848_v16, %v1603_v38  ;;  %v2242_v42 = vadd.f32 %v6288_v40, %v1950_v39  ;;  %6383 = vmatpush3.msra.mxu0 %v5541_v6  ;;  %v2887_v35 = vld [vmem:[#allocation4 + $0x20] sm:$0xff]  ;;  %v2888_v39 = vld [vmem:[#allocation4 + $0x28] sm:$0xff] }
 0x25e   : > { %v1606_v43 = vld [vmem:[#allocation3 + $0xa8] sm:$0xff]  ;;  %v2122_v27 = vpop.f32.mrf.mxu0  ;;  %v1868_v20 = vpop.f32.mrf.mxu1  ;;  %6384 = vmatprep.subr.mxu0 %v5540_v7  ;;  %v1957_v36 = vld [vmem:[#allocation3 + $0x40] sm:$0xff]  ;;  %6336 = vmatprep.mubr.msk.f32.mxu1 %vm2368_vm7, %v2887_v35 }
 0x25f   : > { %1919 = vst.msk [vmem:[#allocation3 + $0x90] sm:$0xff] %vm442_vm6, %v1895_v41  ;;  %2266 = vst.msk [vmem:[#allocation3 + $0x8] sm:$0xff] %vm442_vm6, %v2242_v42  ;;  %v1898_v57 = vadd.f32 %v6262_v24, %v1606_v43  ;;  %v2241_v44 = vadd.f32 %v2122_v27, %v1949_v26  ;;  %6385 = vmatpush3.msra.mxu0 %v5540_v7  ;;  %v1960_v43 = vld [vmem:[#allocation3 + $0x58] sm:$0xff]  ;;  %6337 = vmatmul.mubr.msk.f32.vlgmr.msra.gmra.mxu1 %vm2368_vm7, %v2888_v39 }
 0x260   : > { %v1605_v46 = vld [vmem:[#allocation3 + $0xa0] sm:$0xff]  ;;  %v6291_v48 = vpop.f32.mrf.mxu0  ;;  %6387 = vmatmul.mubr.msk.f32.vlgmr.msra.gmra.mxu0 %vm2368_vm7, %v2886_v1  ;;  %v1963_v1 = vld [vmem:[#allocation3 + $0x70] sm:$0xff] }
 0x261   : > { %1922 = vst.msk [vmem:[#allocation3 + $0xa8] sm:$0xff] %vm442_vm6, %v1898_v57  ;;  %2265 = vst.msk [vmem:[#allocation3] sm:$0xff] %vm442_vm6, %v2241_v44  ;;  %v1897_v49 = vadd.f32 %v1858_v13, %v1605_v46  ;;  %v2244_v50 = vadd.f32 %v6291_v48, %v1952_v47  ;;  %6389 = vmatprep.mubr.msk.f32.mxu0 %vm2368_vm7, %v2887_v35  ;;  %v2889_v44 = vld [vmem:[#allocation4 + $0x30] sm:$0xff] }
 0x262   : > { %v1608_v4 = vld [vmem:[#allocation3 + $0xb8] sm:$0xff]  ;;  %v2132_v14 = vpop.f32.mrf.mxu0  ;;  %v1959_v46 = vld [vmem:[#allocation3 + $0x50] sm:$0xff]  ;;  %6339 = vmatprep.mubr.msk.f32.mxu1 %vm2368_vm7, %v2889_v44 }
 0x263   : > { %1921 = vst.msk [vmem:[#allocation3 + $0xa0] sm:$0xff] %vm442_vm6, %v1897_v49  ;;  %2268 = vst.msk [vmem:[#allocation3 + $0x18] sm:$0xff] %vm442_vm6, %v2244_v50  ;;  %v1900_v33 = vadd.f32 %v6265_v29, %v1608_v4  ;;  %v2243_v34 = vadd.f32 %v2132_v14, %v1951_v12  ;;  %v1962_v4 = vld [vmem:[#allocation3 + $0x68] sm:$0xff]  ;;  %6340 = vmatmul.mubr.msk.f32.gmra.mxu1 %vm2368_vm7, %v2890_v45 }
 0x264   : > { %v1607_v53 = vld [vmem:[#allocation3 + $0xb0] sm:$0xff]  ;;  %v6294_v55 = vpop.f32.mrf.mxu0  ;;  %6390 = vmatmul.mubr.msk.f32.gmra.mxu0 %vm2368_vm7, %v2888_v39 }
 0x265   : > { %1924 = vst.msk [vmem:[#allocation3 + $0xb8] sm:$0xff] %vm442_vm6, %v1900_v33  ;;  %2267 = vst.msk [vmem:[#allocation3 + $0x10] sm:$0xff] %vm442_vm6, %v2243_v34  ;;  %v1899_v58 = vadd.f32 %v1868_v20, %v1607_v53  ;;  %v2246_v59 = vadd.f32 %v6294_v55, %v1954_v54  ;;  %6392 = vmatprep.mubr.msk.f32.mxu0 %vm2368_vm7, %v2889_v44  ;;  %v1961_v34 = vld [vmem:[#allocation3 + $0x60] sm:$0xff] }
 0x266   : > { %v2142_v62 = vpop.f32.mrf.mxu0  ;;  %v2290_v63 = vld [vmem:[#allocation3 + $0x8] sm:$0xff] }
 0x267   : > { %1923 = vst.msk [vmem:[#allocation3 + $0xb0] sm:$0xff] %vm442_vm6, %v1899_v58  ;;  %2270 = vst.msk [vmem:[#allocation3 + $0x28] sm:$0xff] %vm442_vm6, %v2246_v59  ;;  %v2245_v2 = vadd.f32 %v2142_v62, %v1953_v61  ;;  %v2321_v5 = vadd.f32 %v7524_v56, %v2290_v63  ;;  %v1964_v58 = vld [vmem:[#allocation3 + $0x78] sm:$0xff] }
 0x268   : > { %v6297_v10 = vpop.f32.mrf.mxu0  ;;  %v2289_v11 = vld [vmem:[#allocation3] sm:$0xff]  ;;  %6393 = vmatmul.mubr.msk.f32.gmra.mxu0 %vm2368_vm7, %v2890_v45 }
 0x269   : > { %2269 = vst.msk [vmem:[#allocation3 + $0x20] sm:$0xff] %vm442_vm6, %v2245_v2  ;;  %v2248_v15 = vadd.f32 %v6297_v10, %v1956_v9  ;;  %v2345_v16 = vmax.f32 %v2321_v5, 0.0  ;;  %v2320_v17 = vadd.f32 %v7524_v56, %v2289_v11  ;;  %v1966_v10 = vld [vmem:[#allocation3 + $0x88] sm:$0xff] }
 0x26a   : > { %v2152_v19 = vpop.f32.mrf.mxu0  ;;  %v2292_v22 = vld [vmem:[#allocation3 + $0x18] sm:$0xff]  ;;  %v1969_v45 = vld [vmem:[#allocation3 + $0xa0] sm:$0xff] }
 0x26b   : > { %2272 = vst.msk [vmem:[#allocation3 + $0x38] sm:$0xff] %vm442_vm6, %v2248_v15  ;;  %v2247_v8 = vadd.f32 %v2152_v19, %v1955_v18  ;;  %2755 = vrot.lane.b32.xlu0 %v2345_v16, %s6647_s8  ;;  %2461 = vrot.lane.b32.xlu1 %v2345_v16, %s6648_s9  ;;  %v7547_v23 = vmax.f32 %v2320_v17, 0.0  ;;  %v2323_v24 = vadd.f32 %v7524_v56, %v2292_v22  ;;  %v1965_v19 = vld [vmem:[#allocation3 + $0x80] sm:$0xff] }
 0x26c   : > { %2412 = vst.msk [vmem:[#allocation4 + $0x4c] sm:$0xf] %vm2411_vm9, %v2345_v16  ;;  %v6300_v0 = vpop.f32.mrf.mxu0  ;;  %v2291_v28 = vld [vmem:[#allocation3 + $0x10] sm:$0xff] }
 0x26d   : > { %2271 = vst.msk [vmem:[#allocation3 + $0x30] sm:$0xff] %vm442_vm6, %v2247_v8  ;;  %v2250_v31 = vadd.f32 %v6300_v0, %v1958_v25  ;;  %v7552_v32 = vmax.f32 %v2323_v24, 0.0  ;;  %v2322_v13 = vadd.f32 %v7524_v56, %v2291_v28  ;;  %2410 = vst.msk [vmem:[#allocation4 + $0x44] sm:$0xff] %vm442_vm6, %v7547_v23  ;;  %v1968_v0 = vld [vmem:[#allocation3 + $0x98] sm:$0xff] }
 0x26e   : > { %v2162_v37 = vpop.f32.mrf.mxu0  ;;  %v2294_v38 = vld [vmem:[#allocation3 + $0x28] sm:$0xff] }
 0x26f   : > { %2274 = vst.msk [vmem:[#allocation3 + $0x48] sm:$0xff] %vm442_vm6, %v2250_v31  ;;  %v2249_v40 = vadd.f32 %v2162_v37, %v1957_v36  ;;  %2559 = vrot.lane.b32.xlu1 %v2345_v16, %s6649_s10  ;;  %2459 = vrot.lane.b32.xlu0 %v7547_v23, %s6648_s9  ;;  %v7564_v41 = vmax.f32 %v2322_v13, 0.0  ;;  %v2325_v42 = vadd.f32 %v7524_v56, %v2294_v38 }
 0x270   : > { %2414 = vst.msk [vmem:[#allocation4 + $0x5c] sm:$0xf] %vm2411_vm9, %v7552_v32  ;;  %v6303_v26 = vpop.f32.mrf.mxu0  ;;  %v2293_v27 = vld [vmem:[#allocation3 + $0x20] sm:$0xff] }
 0x271   : > { %2273 = vst.msk [vmem:[#allocation3 + $0x40] sm:$0xff] %vm442_vm6, %v2249_v40  ;;  %v2252_v29 = vadd.f32 %v6303_v26, %v1960_v43  ;;  %v7571_v30 = vmax.f32 %v2325_v42, 0.0  ;;  %v2324_v57 = vadd.f32 %v7524_v56, %v2293_v27  ;;  %2413 = vst.msk [vmem:[#allocation4 + $0x54] sm:$0xff] %vm442_vm6, %v7564_v41  ;;  %v1970_v43 = vld [vmem:[#allocation3 + $0xa8] sm:$0xff] }
 0x272   : > { %v2172_v47 = vpop.f32.mrf.mxu0  ;;  %v2296_v48 = vld [vmem:[#allocation3 + $0x38] sm:$0xff] }
 0x273   : > { %2276 = vst.msk [vmem:[#allocation3 + $0x58] sm:$0xff] %vm442_vm6, %v2252_v29  ;;  %v2251_v49 = vadd.f32 %v2172_v47, %v1959_v46  ;;  %2657 = vrot.lane.b32.xlu1 %v2345_v16, %s6650_s11  ;;  %2557 = vrot.lane.b32.xlu0 %v7547_v23, %s6649_s10  ;;  %v7583_v50 = vmax.f32 %v2324_v57, 0.0  ;;  %v2327_v3 = vadd.f32 %v7524_v56, %v2296_v48 }
 0x274   : > { %2416 = vst.msk [vmem:[#allocation4 + $0x6c] sm:$0xf] %vm2411_vm9, %v7571_v30  ;;  %v6306_v12 = vpop.f32.mrf.mxu0  ;;  %v2295_v14 = vld [vmem:[#allocation3 + $0x30] sm:$0xff] }
 0x275   : > { %2275 = vst.msk [vmem:[#allocation3 + $0x50] sm:$0xff] %vm442_vm6, %v2251_v49  ;;  %v2254_v20 = vadd.f32 %v6306_v12, %v1962_v4  ;;  %v7590_v21 = vmax.f32 %v2327_v3, 0.0  ;;  %v2326_v33 = vadd.f32 %v7524_v56, %v2295_v14  ;;  %2415 = vst.msk [vmem:[#allocation4 + $0x64] sm:$0xff] %vm442_vm6, %v7583_v50  ;;  %v1972_v4 = vld [vmem:[#allocation3 + $0xb8] sm:$0xff] }
 0x276   : > { %v2182_v51 = vpop.f32.mrf.mxu0  ;;  %v2298_v52 = vld [vmem:[#allocation3 + $0x48] sm:$0xff] }
 0x277   : > { %2278 = vst.msk [vmem:[#allocation3 + $0x68] sm:$0xff] %vm442_vm6, %v2254_v20  ;;  %v2253_v53 = vadd.f32 %v2182_v51, %v1961_v34  ;;  %2655 = vrot.lane.b32.xlu0 %v7547_v23, %s6650_s11  ;;  %2465 = vrot.lane.b32.xlu1 %v7552_v32, %s6648_s9  ;;  %v7601_v54 = vmax.f32 %v2326_v33, 0.0  ;;  %v2329_v55 = vadd.f32 %v7524_v56, %v2298_v52  ;;  %v1971_v51 = vld [vmem:[#allocation3 + $0xb0] sm:$0xff] }
 0x278   : > { %2418 = vst.msk [vmem:[#allocation4 + $0x7c] sm:$0xf] %vm2411_vm9, %v7590_v21  ;;  %v6309_v59 = vpop.f32.mrf.mxu0  ;;  %v2297_v60 = vld [vmem:[#allocation3 + $0x40] sm:$0xff] }
 0x279   : > { %2277 = vst.msk [vmem:[#allocation3 + $0x60] sm:$0xff] %vm442_vm6, %v2253_v53  ;;  %v2256_v61 = vadd.f32 %v6309_v59, %v1964_v58  ;;  %v7607_v62 = vmax.f32 %v2329_v55, 0.0  ;;  %v2328_v63 = vadd.f32 %v7524_v56, %v2297_v60  ;;  %2417 = vst.msk [vmem:[#allocation4 + $0x74] sm:$0xff] %vm442_vm6, %v7601_v54 }
 0x27a   : > { %v2192_v2 = vpop.f32.mrf.mxu0  ;;  %v2300_v5 = vld [vmem:[#allocation3 + $0x58] sm:$0xff] }
 0x27b   : > { %2280 = vst.msk [vmem:[#allocation3 + $0x78] sm:$0xff] %vm442_vm6, %v2256_v61  ;;  %v2255_v6 = vadd.f32 %v2192_v2, %v1963_v1  ;;  %2753 = vrot.lane.b32.xlu0 %v7547_v23, %s6647_s8  ;;  %2563 = vrot.lane.b32.xlu1 %v7552_v32, %s6649_s10  ;;  %v7617_v7 = vmax.f32 %v2328_v63, 0.0  ;;  %v2331_v9 = vadd.f32 %v7524_v56, %v2300_v5 }
 0x27c   : > { %2420 = vst.msk [vmem:[#allocation4 + $0x8c] sm:$0xf] %vm2411_vm9, %v7607_v62  ;;  %v6312_v11 = vpop.f32.mrf.mxu0  ;;  %v2299_v15 = vld [vmem:[#allocation3 + $0x50] sm:$0xff] }
 0x27d   : > { %2279 = vst.msk [vmem:[#allocation3 + $0x70] sm:$0xff] %vm442_vm6, %v2255_v6  ;;  %v2258_v16 = vadd.f32 %v6312_v11, %v1966_v10  ;;  %v7623_v17 = vmax.f32 %v2331_v9, 0.0  ;;  %v2330_v18 = vadd.f32 %v7524_v56, %v2299_v15  ;;  %2419 = vst.msk [vmem:[#allocation4 + $0x84] sm:$0xff] %vm442_vm6, %v7617_v7 }
 0x27e   : > { %v2202_v22 = vpop.f32.mrf.mxu0  ;;  %v2302_v8 = vld [vmem:[#allocation3 + $0x68] sm:$0xff] }
 0x27f   : > { %2282 = vst.msk [vmem:[#allocation3 + $0x88] sm:$0xff] %vm442_vm6, %v2258_v16  ;;  %v2257_v23 = vadd.f32 %v2202_v22, %v1965_v19  ;;  %2759 = vrot.lane.b32.xlu0 %v7552_v32, %s6647_s8  ;;  %2661 = vrot.lane.b32.xlu1 %v7552_v32, %s6650_s11  ;;  %v7633_v24 = vmax.f32 %v2330_v18, 0.0  ;;  %v2333_v25 = vadd.f32 %v7524_v56, %v2302_v8  ;;  %v1967_v32 = vld [vmem:[#allocation3 + $0x90] sm:$0xff] }
 0x280   : > { %2422 = vst.msk [vmem:[#allocation4 + $0x9c] sm:$0xf] %vm2411_vm9, %v7623_v17  ;;  %v6315_v28 = vpop.f32.mrf.mxu0  ;;  %v2301_v31 = vld [vmem:[#allocation3 + $0x60] sm:$0xff] }
 0x281   : > { %2281 = vst.msk [vmem:[#allocation3 + $0x80] sm:$0xff] %vm442_vm6, %v2257_v23  ;;  %v2260_v13 = vadd.f32 %v6315_v28, %v1968_v0  ;;  %v7639_v35 = vmax.f32 %v2333_v25, 0.0  ;;  %v2332_v36 = vadd.f32 %v7524_v56, %v2301_v31  ;;  %2421 = vst.msk [vmem:[#allocation4 + $0x94] sm:$0xff] %vm442_vm6, %v7633_v24 }
 0x282   : > { %v2212_v37 = vpop.f32.mrf.mxu0  ;;  %v2304_v38 = vld [vmem:[#allocation3 + $0x78] sm:$0xff] }
 0x283   : > { %2284 = vst.msk [vmem:[#allocation3 + $0x98] sm:$0xff] %vm442_vm6, %v2260_v13  ;;  %v2259_v39 = vadd.f32 %v2212_v37, %v1967_v32  ;;  %2561 = vrot.lane.b32.xlu0 %v7564_v41, %s6649_s10  ;;  %2463 = vrot.lane.b32.xlu1 %v7564_v41, %s6648_s9  ;;  %v7649_v40 = vmax.f32 %v2332_v36, 0.0  ;;  %v2335_v42 = vadd.f32 %v7524_v56, %v2304_v38  ;;  %v5579_v37 = vld [vmem:[%s8580_s3 + $0x50] sm:$0xff] }
 0x284   : > { %2424 = vst.msk [vmem:[#allocation4 + $0xac] sm:$0xf] %vm2411_vm9, %v7639_v35  ;;  %v6318_v26 = vpop.f32.mrf.mxu0  ;;  %v2303_v27 = vld [vmem:[#allocation3 + $0x70] sm:$0xff] }
 0x285   : > { %2283 = vst.msk [vmem:[#allocation3 + $0x90] sm:$0xff] %vm442_vm6, %v2259_v39  ;;  %v2262_v29 = vadd.f32 %v6318_v26, %v1970_v43  ;;  %v7655_v57 = vmax.f32 %v2335_v42, 0.0  ;;  %2423 = vst.msk [vmem:[#allocation4 + $0xa4] sm:$0xff] %vm442_vm6, %v7649_v40  ;;  %v2334_v44 = vadd.f32 %v7524_v56, %v2303_v27 }
 0x286   : > { %v2222_v46 = vpop.f32.mrf.mxu0  ;;  %v2306_v47 = vld [vmem:[#allocation3 + $0x88] sm:$0xff] }
 0x287   : > { %2286 = vst.msk [vmem:[#allocation3 + $0xa8] sm:$0xff] %vm442_vm6, %v2262_v29  ;;  %v2261_v48 = vadd.f32 %v2222_v46, %v1969_v45  ;;  %2659 = vrot.lane.b32.xlu0 %v7564_v41, %s6650_s11  ;;  %2469 = vrot.lane.b32.xlu1 %v7571_v30, %s6648_s9  ;;  %v7667_v49 = vmax.f32 %v2334_v44, 0.0  ;;  %v2337_v3 = vadd.f32 %v7524_v56, %v2306_v47  ;;  %v5578_v45 = vld [vmem:[%s8580_s3 + $0x48] sm:$0xff] }
 0x288   : > { %2426 = vst.msk [vmem:[#allocation4 + $0xbc] sm:$0xf] %vm2411_vm9, %v7655_v57  ;;  %v6321_v12 = vpop.f32.mrf.mxu0  ;;  %v2305_v14 = vld [vmem:[#allocation3 + $0x80] sm:$0xff] }
 0x289   : > { %2285 = vst.msk [vmem:[#allocation3 + $0xa0] sm:$0xff] %vm442_vm6, %v2261_v48  ;;  %v2264_v20 = vadd.f32 %v6321_v12, %v1972_v4  ;;  %2425 = vst.msk [vmem:[#allocation4 + $0xb4] sm:$0xff] %vm442_vm6, %v7667_v49  ;;  %v7673_v33 = vmax.f32 %v2337_v3, 0.0  ;;  %v2336_v34 = vadd.f32 %v7524_v56, %v2305_v14 }
 0x28a   : > { %v2232_v52 = vpop.f32.mrf.mxu0  ;;  %v2308_v53 = vld [vmem:[#allocation3 + $0x98] sm:$0xff] }
 0x28b   : > { %2288 = vst.msk [vmem:[#allocation3 + $0xb8] sm:$0xff] %vm442_vm6, %v2264_v20  ;;  %v2263_v55 = vadd.f32 %v2232_v52, %v1971_v51  ;;  %2757 = vrot.lane.b32.xlu0 %v7564_v41, %s6647_s8  ;;  %2567 = vrot.lane.b32.xlu1 %v7571_v30, %s6649_s10  ;;  %v7683_v58 = vmax.f32 %v2336_v34, 0.0  ;;  %v2339_v59 = vadd.f32 %v7524_v56, %v2308_v53  ;;  %v5577_v34 = vld [vmem:[%s8580_s3 + $0x40] sm:$0xff] }
 0x28c   : > { %2428 = vst.msk [vmem:[#allocation4 + $0xcc] sm:$0xf] %vm2411_vm9, %v7673_v33  ;;  %v2307_v60 = vld [vmem:[#allocation3 + $0x90] sm:$0xff] }
 0x28d   : > { %2287 = vst.msk [vmem:[#allocation3 + $0xb0] sm:$0xff] %vm442_vm6, %v2263_v55  ;;  %2427 = vst.msk [vmem:[#allocation4 + $0xc4] sm:$0xff] %vm442_vm6, %v7683_v58  ;;  %v7689_v61 = vmax.f32 %v2339_v59, 0.0  ;;  %v2338_v41 = vadd.f32 %v7524_v56, %v2307_v60  ;;  %v5617_v59 = vld [vmem:[%s8580_s3 + $0x78] sm:$0x3f] }
 0x28e   : > { %v2310_v63 = vld [vmem:[#allocation3 + $0xa8] sm:$0xff]  ;;  %6490 = vmatprep.subr.msk.mxu0 %vm3047_vm8, %v5617_v59 }
 0x28f   : > { %2763 = vrot.lane.b32.xlu0 %v7571_v30, %s6647_s8  ;;  %2665 = vrot.lane.b32.xlu1 %v7571_v30, %s6650_s11  ;;  %2430 = vst.msk [vmem:[#allocation4 + $0xdc] sm:$0xf] %vm2411_vm9, %v7689_v61  ;;  %v7698_v1 = vmax.f32 %v2338_v41, 0.0  ;;  %v2341_v2 = vadd.f32 %v7524_v56, %v2310_v63 }
 0x290   : > { %v2309_v5 = vld [vmem:[#allocation3 + $0xa0] sm:$0xff]  ;;  %6491 = vmatpush3.msk.msra.mxu0 %vm3047_vm8, %v5617_v59 }
 0x291   : > { %2429 = vst.msk [vmem:[#allocation4 + $0xd4] sm:$0xff] %vm442_vm6, %v7698_v1  ;;  %v7703_v6 = vmax.f32 %v2341_v2, 0.0  ;;  %v2340_v9 = vadd.f32 %v7524_v56, %v2309_v5  ;;  %v7971_v2 = vld [vmem:[%s8580_s3 + $0x98] sm:$0x3f]  ;;  %v5616_v5 = vld [vmem:[%s8580_s3 + $0x70] sm:$0xff] }
 0x292   : > { %v2312_v10 = vld [vmem:[#allocation3 + $0xb8] sm:$0xff]  ;;  %6492 = vmatprep.subr.mxu0 %v5616_v5 }
 0x293   : > { %2565 = vrot.lane.b32.xlu0 %v7583_v50, %s6649_s10  ;;  %2467 = vrot.lane.b32.xlu1 %v7583_v50, %s6648_s9  ;;  %2432 = vst.msk [vmem:[#allocation4 + $0xec] sm:$0xf] %vm2411_vm9, %v7703_v6  ;;  %v7712_v30 = vmax.f32 %v2340_v9, 0.0  ;;  %v2343_v11 = vadd.f32 %v7524_v56, %v2312_v10 }
 0x294   : > { %v2311_v15 = vld [vmem:[#allocation3 + $0xb0] sm:$0xff]  ;;  %6493 = vmatpush3.msra.mxu0 %v5616_v5 }
 0x295   : > { %2431 = vst.msk [vmem:[#allocation4 + $0xe4] sm:$0xff] %vm442_vm6, %v7712_v30  ;;  %v7717_v16 = vmax.f32 %v2343_v11, 0.0  ;;  %v2342_v18 = vadd.f32 %v7524_v56, %v2311_v15  ;;  %v5614_v15 = vld [vmem:[%s8580_s3 + $0x60] sm:$0xff] }
 0x297   : > { %2663 = vrot.lane.b32.xlu0 %v7583_v50, %s6650_s11  ;;  %2473 = vrot.lane.b32.xlu1 %v7590_v21, %s6648_s9  ;;  %2434 = vst.msk [vmem:[#allocation4 + $0xfc] sm:$0xf] %vm2411_vm9, %v7717_v16  ;;  %v7726_v19 = vmax.f32 %v2342_v18, 0.0 }
 0x299   : > { %2433 = vst.msk [vmem:[#allocation4 + $0xf4] sm:$0xff] %vm442_vm6, %v7726_v19 }
 0x29b   : > { %2761 = vrot.lane.b32.xlu0 %v7583_v50, %s6647_s8  ;;  %2571 = vrot.lane.b32.xlu1 %v7590_v21, %s6649_s10 }
 0x29f   : > { %2767 = vrot.lane.b32.xlu0 %v7590_v21, %s6647_s8  ;;  %2669 = vrot.lane.b32.xlu1 %v7590_v21, %s6650_s11 }
 0x2a3   : > { %2569 = vrot.lane.b32.xlu0 %v7601_v54, %s6649_s10  ;;  %2471 = vrot.lane.b32.xlu1 %v7601_v54, %s6648_s9 }
 0x2a7   : > { %2667 = vrot.lane.b32.xlu0 %v7601_v54, %s6650_s11  ;;  %2477 = vrot.lane.b32.xlu1 %v7607_v62, %s6648_s9 }
 0x2ab   : > { %2765 = vrot.lane.b32.xlu0 %v7601_v54, %s6647_s8  ;;  %2575 = vrot.lane.b32.xlu1 %v7607_v62, %s6649_s10 }
 0x2af   : > { %2771 = vrot.lane.b32.xlu0 %v7607_v62, %s6647_s8  ;;  %2673 = vrot.lane.b32.xlu1 %v7607_v62, %s6650_s11 }
 0x2b3   : > { %2573 = vrot.lane.b32.xlu0 %v7617_v7, %s6649_s10  ;;  %2475 = vrot.lane.b32.xlu1 %v7617_v7, %s6648_s9 }
 0x2b7   : > { %2671 = vrot.lane.b32.xlu0 %v7617_v7, %s6650_s11  ;;  %2481 = vrot.lane.b32.xlu1 %v7623_v17, %s6648_s9 }
 0x2bb   : > { %2769 = vrot.lane.b32.xlu0 %v7617_v7, %s6647_s8  ;;  %2579 = vrot.lane.b32.xlu1 %v7623_v17, %s6649_s10 }
 0x2bf   : > { %2775 = vrot.lane.b32.xlu0 %v7623_v17, %s6647_s8  ;;  %2677 = vrot.lane.b32.xlu1 %v7623_v17, %s6650_s11 }
 0x2c3   : > { %2577 = vrot.lane.b32.xlu0 %v7633_v24, %s6649_s10  ;;  %2479 = vrot.lane.b32.xlu1 %v7633_v24, %s6648_s9 }
 0x2c7   : > { %2675 = vrot.lane.b32.xlu0 %v7633_v24, %s6650_s11  ;;  %2485 = vrot.lane.b32.xlu1 %v7639_v35, %s6648_s9 }
 0x2cb   : > { %2773 = vrot.lane.b32.xlu0 %v7633_v24, %s6647_s8  ;;  %2583 = vrot.lane.b32.xlu1 %v7639_v35, %s6649_s10  ;;  %v5580_v24 = vld [vmem:[%s8580_s3 + $0x58] sm:$0x3f] }
 0x2cc   : > { %6434 = vmatprep.subr.msk.mxu1 %vm3047_vm8, %v5580_v24 }
 0x2cd   : > { %6435 = vmatpush3.msk.msra.mxu1 %vm3047_vm8, %v5580_v24 }
 0x2ce   : > { %6436 = vmatprep.subr.mxu1 %v5579_v37 }
 0x2cf   : > { %2779 = vrot.lane.b32.xlu0 %v7639_v35, %s6647_s8  ;;  %2681 = vrot.lane.b32.xlu1 %v7639_v35, %s6650_s11 }
 0x2d0   : > { %6437 = vmatpush3.msra.mxu1 %v5579_v37 }
 0x2d1   : > { %6438 = vmatprep.subr.mxu1 %v5578_v45 }
 0x2d2   : > { %6439 = vmatpush3.msra.mxu1 %v5578_v45 }
 0x2d3   : > { %2581 = vrot.lane.b32.xlu0 %v7649_v40, %s6649_s10  ;;  %2483 = vrot.lane.b32.xlu1 %v7649_v40, %s6648_s9 }
 0x2d4   : > { %6440 = vmatprep.subr.mxu1 %v5577_v34 }
 0x2d5   : > { %6441 = vmatpush3.msra.mxu1 %v5577_v34 }
 0x2d6   : > { %6546 = vmatprep.subr.msk.mxu1 %vm3047_vm8, %v7971_v2 }
 0x2d7   : > { %2679 = vrot.lane.b32.xlu0 %v7649_v40, %s6650_s11  ;;  %2489 = vrot.lane.b32.xlu1 %v7655_v57, %s6648_s9 }
 0x2db   : > { %2777 = vrot.lane.b32.xlu0 %v7649_v40, %s6647_s8  ;;  %2587 = vrot.lane.b32.xlu1 %v7655_v57, %s6649_s10 }
 0x2dd   : > { %v2756_v56 = vpop.permute.xlu0 %2755  ;;  %v2462_v50 = vpop.permute.xlu1 %2461 }
 0x2de   : > { %2534 = vst.msk [vmem:[#allocation4 + $0x4b] sm:$0xf] %vm2533_vm10, %v2462_v50 }
 0x2df   : > { %2783 = vrot.lane.b32.xlu0 %v7655_v57, %s6647_s8  ;;  %2685 = vrot.lane.b32.xlu1 %v7655_v57, %s6650_s11 }
 0x2e1   : > { %v2560_v21 = vpop.permute.xlu1 %2559  ;;  %v2460_v54 = vpop.permute.xlu0 %2459 }
 0x2e2   : > { %2532 = vst.msk [vmem:[#allocation4 + $0x43] sm:$0xff] %vm2531_vm11, %v2460_v54 }
 0x2e3   : > { %2632 = vst.msk [vmem:[#allocation4 + $0x4a] sm:$0xf] %vm2631_vm12, %v2560_v21  ;;  %2585 = vrot.lane.b32.xlu0 %v7667_v49, %s6649_s10  ;;  %2487 = vrot.lane.b32.xlu1 %v7667_v49, %s6648_s9 }
 0x2e5   : > { %v2658_v62 = vpop.permute.xlu1 %2657  ;;  %v2558_v7 = vpop.permute.xlu0 %2557 }
 0x2e6   : > { %2630 = vst.msk [vmem:[#allocation4 + $0x42] sm:$0xff] %vm2629_vm13, %v2558_v7 }
 0x2e7   : > { %2730 = vst.msk [vmem:[#allocation4 + $0x49] sm:$0xf] %vm2729_vm14, %v2658_v62  ;;  %2683 = vrot.lane.b32.xlu0 %v7667_v49, %s6650_s11  ;;  %2493 = vrot.lane.b32.xlu1 %v7673_v33, %s6648_s9 }
 0x2e9   : > { %v2656_v17 = vpop.permute.xlu0 %2655  ;;  %v2466_v22 = vpop.permute.xlu1 %2465 }
 0x2ea   : > { %2728 = vst.msk [vmem:[#allocation4 + $0x41] sm:$0xff] %vm2727_vm15, %v2656_v17 }
 0x2eb   : > { %2536 = vst.msk [vmem:[#allocation4 + $0x5b] sm:$0xf] %vm2533_vm10, %v2466_v22  ;;  %2781 = vrot.lane.b32.xlu0 %v7667_v49, %s6647_s8  ;;  %2591 = vrot.lane.b32.xlu1 %v7673_v33, %s6649_s10 }
 0x2ec   : > { %2828 = vst.msk [vmem:[#allocation4 + $0x48] sm:$0xf] %vm2827_vm0, %v2756_v56 }
 0x2ed   : > { %v2754_v8 = vpop.permute.xlu0 %2753  ;;  %v2564_v23 = vpop.permute.xlu1 %2563 }
 0x2ee   : > { %2826 = vst.msk [vmem:[#allocation4 + $0x40] sm:$0xff] %vm2825_vm1, %v2754_v8 }
 0x2ef   : > { %2787 = vrot.lane.b32.xlu0 %v7673_v33, %s6647_s8  ;;  %2689 = vrot.lane.b32.xlu1 %v7673_v33, %s6650_s11 }
 0x2f1   : > { %v2760_v25 = vpop.permute.xlu0 %2759  ;;  %v2662_v0 = vpop.permute.xlu1 %2661 }
 0x2f3   : > { %2589 = vrot.lane.b32.xlu0 %v7683_v58, %s6649_s10  ;;  %2491 = vrot.lane.b32.xlu1 %v7683_v58, %s6648_s9  ;;  %v7843_v35 = vld [vmem:[#allocation4 + $0x48] sm:$0xff] }
 0x2f5   : > { %v2562_v28 = vpop.permute.xlu0 %2561  ;;  %v2464_v31 = vpop.permute.xlu1 %2463  ;;  %v7836_v13 = vld [vmem:[#allocation4 + $0x40] sm:$0xff] }
 0x2f6   : > { %2535 = vst.msk [vmem:[#allocation4 + $0x53] sm:$0xff] %vm2531_vm11, %v2464_v31  ;;  %6342 = vmatprep.mubr.msk.f32.mxu1 %vm2368_vm7, %v7836_v13  ;;  %6395 = vmatprep.mubr.msk.f32.mxu0 %vm2368_vm7, %v7836_v13 }
 0x2f7   : > { %2634 = vst.msk [vmem:[#allocation4 + $0x5a] sm:$0xf] %vm2631_vm12, %v2564_v23  ;;  %6343 = vmatmul.mubr.msk.f32.gmra.mxu1 %vm2368_vm7, %v7843_v35  ;;  %6396 = vmatmul.mubr.msk.f32.gmra.mxu0 %vm2368_vm7, %v7843_v35 }
 0x2f8   : > { %2633 = vst.msk [vmem:[#allocation4 + $0x52] sm:$0xff] %vm2629_vm13, %v2562_v28  ;;  %2687 = vrot.lane.b32.xlu0 %v7683_v58, %s6650_s11  ;;  %2497 = vrot.lane.b32.xlu1 %v7689_v61, %s6648_s9 }
 0x2f9   : > { %2732 = vst.msk [vmem:[#allocation4 + $0x59] sm:$0xf] %vm2729_vm14, %v2662_v0  ;;  %v2660_v36 = vpop.permute.xlu0 %2659  ;;  %v2470_v32 = vpop.permute.xlu1 %2469 }
 0x2fa   : > { %2731 = vst.msk [vmem:[#allocation4 + $0x51] sm:$0xff] %vm2727_vm15, %v2660_v36 }
 0x2fb   : > { %2538 = vst.msk [vmem:[#allocation4 + $0x6b] sm:$0xf] %vm2533_vm10, %v2470_v32 }
 0x2fc   : > { %2830 = vst.msk [vmem:[#allocation4 + $0x58] sm:$0xf] %vm2827_vm0, %v2760_v25  ;;  %2785 = vrot.lane.b32.xlu0 %v7683_v58, %s6647_s8  ;;  %2595 = vrot.lane.b32.xlu1 %v7689_v61, %s6649_s10 }
 0x2fd   : > { %v2758_v38 = vpop.permute.xlu0 %2757  ;;  %v2568_v39 = vpop.permute.xlu1 %2567 }
 0x2fe   : > { %2829 = vst.msk [vmem:[#allocation4 + $0x50] sm:$0xff] %vm2825_vm1, %v2758_v38 }
 0x300   : > { %2791 = vrot.lane.b32.xlu0 %v7689_v61, %s6647_s8  ;;  %2693 = vrot.lane.b32.xlu1 %v7689_v61, %s6650_s11 }
 0x301   : > { %v2764_v40 = vpop.permute.xlu0 %2763  ;;  %v2666_v42 = vpop.permute.xlu1 %2665 }
 0x303   : > { %v7882_v29 = vld [vmem:[#allocation4 + $0x58] sm:$0xff] }
 0x304   : > { %2593 = vrot.lane.b32.xlu0 %v7698_v1, %s6649_s10  ;;  %2495 = vrot.lane.b32.xlu1 %v7698_v1, %s6648_s9 }
 0x305   : > { %v2566_v43 = vpop.permute.xlu0 %2565  ;;  %v2468_v26 = vpop.permute.xlu1 %2467  ;;  %v7875_v27 = vld [vmem:[#allocation4 + $0x50] sm:$0xff] }
 0x306   : > { %2537 = vst.msk [vmem:[#allocation4 + $0x63] sm:$0xff] %vm2531_vm11, %v2468_v26  ;;  %6345 = vmatprep.mubr.msk.f32.mxu1 %vm2368_vm7, %v7875_v27  ;;  %6398 = vmatprep.mubr.msk.f32.mxu0 %vm2368_vm7, %v7875_v27 }
 0x307   : > { %2636 = vst.msk [vmem:[#allocation4 + $0x6a] sm:$0xf] %vm2631_vm12, %v2568_v39  ;;  %6346 = vmatmul.mubr.msk.f32.gmra.mxu1 %vm2368_vm7, %v7882_v29  ;;  %6399 = vmatmul.mubr.msk.f32.gmra.mxu0 %vm2368_vm7, %v7882_v29 }
 0x308   : > { %2635 = vst.msk [vmem:[#allocation4 + $0x62] sm:$0xff] %vm2629_vm13, %v2566_v43  ;;  %2691 = vrot.lane.b32.xlu0 %v7698_v1, %s6650_s11  ;;  %2501 = vrot.lane.b32.xlu1 %v7703_v6, %s6648_s9 }
 0x309   : > { %2734 = vst.msk [vmem:[#allocation4 + $0x69] sm:$0xf] %vm2729_vm14, %v2666_v42  ;;  %v2664_v57 = vpop.permute.xlu0 %2663  ;;  %v2474_v44 = vpop.permute.xlu1 %2473 }
 0x30a   : > { %2733 = vst.msk [vmem:[#allocation4 + $0x61] sm:$0xff] %vm2727_vm15, %v2664_v57 }
 0x30b   : > { %2540 = vst.msk [vmem:[#allocation4 + $0x7b] sm:$0xf] %vm2533_vm10, %v2474_v44 }
 0x30c   : > { %2832 = vst.msk [vmem:[#allocation4 + $0x68] sm:$0xf] %vm2827_vm0, %v2764_v40  ;;  %2789 = vrot.lane.b32.xlu0 %v7698_v1, %s6647_s8  ;;  %2599 = vrot.lane.b32.xlu1 %v7703_v6, %s6649_s10 }
 0x30d   : > { %v2762_v46 = vpop.permute.xlu0 %2761  ;;  %v2572_v47 = vpop.permute.xlu1 %2571 }
 0x30e   : > { %2831 = vst.msk [vmem:[#allocation4 + $0x60] sm:$0xff] %vm2825_vm1, %v2762_v46 }
 0x310   : > { %2795 = vrot.lane.b32.xlu0 %v7703_v6, %s6647_s8  ;;  %2697 = vrot.lane.b32.xlu1 %v7703_v6, %s6650_s11 }
 0x311   : > { %v2768_v48 = vpop.permute.xlu0 %2767  ;;  %v2670_v49 = vpop.permute.xlu1 %2669 }
 0x313   : > { %v7921_v14 = vld [vmem:[#allocation4 + $0x68] sm:$0xff] }
 0x314   : > { %2597 = vrot.lane.b32.xlu0 %v7712_v30, %s6649_s10  ;;  %2499 = vrot.lane.b32.xlu1 %v7712_v30, %s6648_s9 }
 0x315   : > { %v2570_v3 = vpop.permute.xlu0 %2569  ;;  %v2472_v4 = vpop.permute.xlu1 %2471  ;;  %v7914_v12 = vld [vmem:[#allocation4 + $0x60] sm:$0xff] }
 0x316   : > { %2539 = vst.msk [vmem:[#allocation4 + $0x73] sm:$0xff] %vm2531_vm11, %v2472_v4  ;;  %6348 = vmatprep.mubr.msk.f32.mxu1 %vm2368_vm7, %v7914_v12  ;;  %6401 = vmatprep.mubr.msk.f32.mxu0 %vm2368_vm7, %v7914_v12  ;;  %v6332_v58 = vpop.f32.mrf.mxu0 }
 0x317   : > { %2638 = vst.msk [vmem:[#allocation4 + $0x7a] sm:$0xf] %vm2631_vm12, %v2572_v47  ;;  %6349 = vmatmul.mubr.msk.f32.gmra.mxu1 %vm2368_vm7, %v7921_v14  ;;  %6402 = vmatmul.mubr.msk.f32.gmra.mxu0 %vm2368_vm7, %v7921_v14 }
 0x318   : > { %2637 = vst.msk [vmem:[#allocation4 + $0x72] sm:$0xff] %vm2629_vm13, %v2570_v3  ;;  %2695 = vrot.lane.b32.xlu0 %v7712_v30, %s6650_s11  ;;  %2505 = vrot.lane.b32.xlu1 %v7717_v16, %s6648_s9  ;;  %v7966_v1 = vpop.f32.mrf.mxu0 }
 0x319   : > { %2736 = vst.msk [vmem:[#allocation4 + $0x79] sm:$0xf] %vm2729_vm14, %v2670_v49  ;;  %v2668_v20 = vpop.permute.xlu0 %2667  ;;  %v2478_v33 = vpop.permute.xlu1 %2477 }
 0x31a   : > { %2735 = vst.msk [vmem:[#allocation4 + $0x71] sm:$0xff] %vm2727_vm15, %v2668_v20  ;;  %v6335_v6 = vpop.f32.mrf.mxu0 }
 0x31b   : > { %2542 = vst.msk [vmem:[#allocation4 + $0x8b] sm:$0xf] %vm2533_vm10, %v2478_v33 }
 0x31c   : > { %2834 = vst.msk [vmem:[#allocation4 + $0x78] sm:$0xf] %vm2827_vm0, %v2768_v48  ;;  %2793 = vrot.lane.b32.xlu0 %v7712_v30, %s6647_s8  ;;  %2603 = vrot.lane.b32.xlu1 %v7717_v16, %s6649_s10  ;;  %v5615_v30 = vld [vmem:[%s8580_s3 + $0x68] sm:$0xff]  ;;  %v3127_v11 = vpop.f32.mrf.mxu0 }
 0x31d   : > { %v2766_v51 = vpop.permute.xlu0 %2765  ;;  %v2576_v52 = vpop.permute.xlu1 %2575  ;;  %6494 = vmatprep.subr.mxu0 %v5615_v30 }
 0x31e   : > { %2833 = vst.msk [vmem:[#allocation4 + $0x70] sm:$0xff] %vm2825_vm1, %v2766_v51  ;;  %6495 = vmatpush3.msra.mxu0 %v5615_v30 }
 0x31f   : > { %6496 = vmatprep.subr.mxu0 %v5614_v15  ;;  %v6338_v0 = vpop.f32.mrf.mxu1 }
 0x320   : > { %2701 = vrot.lane.b32.xlu1 %v7717_v16, %s6650_s11  ;;  %2601 = vrot.lane.b32.xlu0 %v7726_v19, %s6649_s10 }
 0x321   : > { %v2772_v53 = vpop.permute.xlu0 %2771  ;;  %v2674_v55 = vpop.permute.xlu1 %2673  ;;  %6497 = vmatpush3.msra.mxu0 %v5614_v15 }
 0x323   : > { %v7964_v63 = vld [vmem:[#allocation4 + $0x78] sm:$0xff] }
 0x324   : > { %2699 = vrot.lane.b32.xlu0 %v7726_v19, %s6650_s11  ;;  %2503 = vrot.lane.b32.xlu1 %v7726_v19, %s6648_s9 }
 0x325   : > { %v2574_v60 = vpop.permute.xlu0 %2573  ;;  %v2476_v61 = vpop.permute.xlu1 %2475  ;;  %v7956_v41 = vld [vmem:[#allocation4 + $0x70] sm:$0xff] }
 0x326   : > { %2541 = vst.msk [vmem:[#allocation4 + $0x83] sm:$0xff] %vm2531_vm11, %v2476_v61  ;;  %6351 = vmatprep.mubr.msk.f32.mxu1 %vm2368_vm7, %v7956_v41  ;;  %6404 = vmatprep.mubr.msk.f32.mxu0 %vm2368_vm7, %v7956_v41 }
 0x327   : > { %2640 = vst.msk [vmem:[#allocation4 + $0x8a] sm:$0xf] %vm2631_vm12, %v2576_v52  ;;  %6352 = vmatmul.mubr.msk.f32.gmra.mxu1 %vm2368_vm7, %v7964_v63  ;;  %6405 = vmatmul.mubr.msk.f32.gmra.mxu0 %vm2368_vm7, %v7964_v63 }
 0x328   : > { %2639 = vst.msk [vmem:[#allocation4 + $0x82] sm:$0xff] %vm2629_vm13, %v2574_v60  ;;  %2797 = vrot.lane.b32.xlu0 %v7726_v19, %s6647_s8  ;;  %2799 = vrot.lane.b32.xlu1 %v7717_v16, %s6647_s8  ;;  %v6388_v19 = vpop.f32.mrf.mxu0 }
 0x329   : > { %2738 = vst.msk [vmem:[#allocation4 + $0x89] sm:$0xf] %vm2729_vm14, %v2674_v55  ;;  %v2672_v9 = vpop.permute.xlu0 %2671  ;;  %v2482_v10 = vpop.permute.xlu1 %2481  ;;  %v8000_v56 = vadd.f32 %v6388_v19, %v6332_v58 }
 0x32a   : > { %2737 = vst.msk [vmem:[#allocation4 + $0x81] sm:$0xff] %vm2727_vm15, %v2672_v9  ;;  %v8002_v50 = vpop.f32.mrf.mxu0 }
 0x32b   : > { %2544 = vst.msk [vmem:[#allocation4 + $0x9b] sm:$0xf] %vm2533_vm10, %v2482_v10 }
 0x32c   : > { %2836 = vst.msk [vmem:[#allocation4 + $0x88] sm:$0xf] %vm2827_vm0, %v2772_v53  ;;  %v6391_v62 = vpop.f32.mrf.mxu0 }
 0x32d   : > { %v2770_v16 = vpop.permute.xlu0 %2769  ;;  %v2580_v18 = vpop.permute.xlu1 %2579  ;;  %v8004_v7 = vadd.f32 %v6391_v62, %v6335_v6 }
 0x32e   : > { %2835 = vst.msk [vmem:[#allocation4 + $0x80] sm:$0xff] %vm2825_vm1, %v2770_v16  ;;  %v3585_v17 = vpop.f32.mrf.mxu0 }
 0x32f   : > { %v8008_v24 = vadd.f32 %v3585_v17, %v3127_v11 }
 0x330   : > { %v6394_v28 = vpop.f32.mrf.mxu0 }
 0x331   : > { %v2776_v21 = vpop.permute.xlu0 %2775  ;;  %v2678_v54 = vpop.permute.xlu1 %2677  ;;  %v8023_v31 = vadd.f32 %v6394_v28, %v6338_v0 }
 0x333   : > { %v8015_v25 = vld [vmem:[#allocation4 + $0x88] sm:$0xff] }
 0x335   : > { %v2578_v22 = vpop.permute.xlu0 %2577  ;;  %v2480_v8 = vpop.permute.xlu1 %2479  ;;  %v8006_v23 = vld [vmem:[#allocation4 + $0x80] sm:$0xff] }
 0x336   : > { %2543 = vst.msk [vmem:[#allocation4 + $0x93] sm:$0xff] %vm2531_vm11, %v2480_v8  ;;  %6354 = vmatprep.mubr.msk.f32.mxu1 %vm2368_vm7, %v8006_v23  ;;  %6407 = vmatprep.mubr.msk.f32.mxu0 %vm2368_vm7, %v8006_v23 }
 0x337   : > { %2642 = vst.msk [vmem:[#allocation4 + $0x9a] sm:$0xf] %vm2631_vm12, %v2580_v18  ;;  %6355 = vmatmul.mubr.msk.f32.gmra.mxu1 %vm2368_vm7, %v8015_v25  ;;  %6408 = vmatmul.mubr.msk.f32.gmra.mxu0 %vm2368_vm7, %v8015_v25 }
 0x338   : > { %2641 = vst.msk [vmem:[#allocation4 + $0x92] sm:$0xff] %vm2629_vm13, %v2578_v22 }
 0x339   : > { %2740 = vst.msk [vmem:[#allocation4 + $0x99] sm:$0xf] %vm2729_vm14, %v2678_v54  ;;  %v2676_v36 = vpop.permute.xlu0 %2675  ;;  %v2486_v32 = vpop.permute.xlu1 %2485 }
 0x33a   : > { %2739 = vst.msk [vmem:[#allocation4 + $0x91] sm:$0xff] %vm2727_vm15, %v2676_v36 }
 0x33b   : > { %2546 = vst.msk [vmem:[#allocation4 + $0xab] sm:$0xf] %vm2533_vm10, %v2486_v32 }
 0x33c   : > { %2838 = vst.msk [vmem:[#allocation4 + $0x98] sm:$0xf] %vm2827_vm0, %v2776_v21 }
 0x33d   : > { %v2774_v37 = vpop.permute.xlu0 %2773  ;;  %v2584_v38 = vpop.permute.xlu1 %2583 }
 0x33e   : > { %2837 = vst.msk [vmem:[#allocation4 + $0x90] sm:$0xff] %vm2825_vm1, %v2774_v37 }
 0x341   : > { %v2780_v39 = vpop.permute.xlu0 %2779  ;;  %v2682_v40 = vpop.permute.xlu1 %2681 }
 0x343   : > { %v8037_v57 = vld [vmem:[#allocation4 + $0x98] sm:$0xff] }
 0x345   : > { %v2582_v42 = vpop.permute.xlu0 %2581  ;;  %v2484_v43 = vpop.permute.xlu1 %2483  ;;  %v8030_v26 = vld [vmem:[#allocation4 + $0x90] sm:$0xff] }
 0x346   : > { %2545 = vst.msk [vmem:[#allocation4 + $0xa3] sm:$0xff] %vm2531_vm11, %v2484_v43  ;;  %6357 = vmatprep.mubr.msk.f32.mxu1 %vm2368_vm7, %v8030_v26  ;;  %6410 = vmatprep.mubr.msk.f32.mxu0 %vm2368_vm7, %v8030_v26 }
 0x347   : > { %2644 = vst.msk [vmem:[#allocation4 + $0xaa] sm:$0xf] %vm2631_vm12, %v2584_v38  ;;  %6358 = vmatmul.mubr.msk.f32.gmra.mxu1 %vm2368_vm7, %v8037_v57  ;;  %6411 = vmatmul.mubr.msk.f32.gmra.mxu0 %vm2368_vm7, %v8037_v57 }
 0x348   : > { %2643 = vst.msk [vmem:[#allocation4 + $0xa2] sm:$0xff] %vm2629_vm13, %v2582_v42 }
 0x349   : > { %2742 = vst.msk [vmem:[#allocation4 + $0xa9] sm:$0xf] %vm2729_vm14, %v2682_v40  ;;  %v2680_v44 = vpop.permute.xlu0 %2679  ;;  %v2490_v45 = vpop.permute.xlu1 %2489 }
 0x34a   : > { %2741 = vst.msk [vmem:[#allocation4 + $0xa1] sm:$0xff] %vm2727_vm15, %v2680_v44 }
 0x34b   : > { %2548 = vst.msk [vmem:[#allocation4 + $0xbb] sm:$0xf] %vm2533_vm10, %v2490_v45 }
 0x34c   : > { %2840 = vst.msk [vmem:[#allocation4 + $0xa8] sm:$0xf] %vm2827_vm0, %v2780_v39 }
 0x34d   : > { %v2778_v46 = vpop.permute.xlu0 %2777  ;;  %v2588_v47 = vpop.permute.xlu1 %2587 }
 0x34e   : > { %2839 = vst.msk [vmem:[#allocation4 + $0xa0] sm:$0xff] %vm2825_vm1, %v2778_v46 }
 0x351   : > { %v2784_v48 = vpop.permute.xlu0 %2783  ;;  %v2686_v49 = vpop.permute.xlu1 %2685 }
 0x353   : > { %v8057_v33 = vld [vmem:[#allocation4 + $0xa8] sm:$0xff] }
 0x355   : > { %v2586_v3 = vpop.permute.xlu0 %2585  ;;  %v2488_v4 = vpop.permute.xlu1 %2487  ;;  %v8050_v20 = vld [vmem:[#allocation4 + $0xa0] sm:$0xff] }
 0x356   : > { %2547 = vst.msk [vmem:[#allocation4 + $0xb3] sm:$0xff] %vm2531_vm11, %v2488_v4  ;;  %6360 = vmatprep.mubr.msk.f32.mxu1 %vm2368_vm7, %v8050_v20  ;;  %6413 = vmatprep.mubr.msk.f32.mxu0 %vm2368_vm7, %v8050_v20 }
 0x357   : > { %2646 = vst.msk [vmem:[#allocation4 + $0xba] sm:$0xf] %vm2631_vm12, %v2588_v47  ;;  %6361 = vmatmul.mubr.msk.f32.gmra.mxu1 %vm2368_vm7, %v8057_v33  ;;  %6414 = vmatmul.mubr.msk.f32.gmra.mxu0 %vm2368_vm7, %v8057_v33 }
 0x358   : > { %2645 = vst.msk [vmem:[#allocation4 + $0xb2] sm:$0xff] %vm2629_vm13, %v2586_v3 }
 0x359   : > { %2744 = vst.msk [vmem:[#allocation4 + $0xb9] sm:$0xf] %vm2729_vm14, %v2686_v49  ;;  %v2684_v34 = vpop.permute.xlu0 %2683  ;;  %v2494_v51 = vpop.permute.xlu1 %2493 }
 0x35a   : > { %2743 = vst.msk [vmem:[#allocation4 + $0xb1] sm:$0xff] %vm2727_vm15, %v2684_v34 }
 0x35b   : > { %2550 = vst.msk [vmem:[#allocation4 + $0xcb] sm:$0xf] %vm2533_vm10, %v2494_v51  ;;  %v8153_v51 = vld [vmem:[#allocation4 + $0x100] sm:$0xff] }
 0x35c   : > { %2842 = vst.msk [vmem:[#allocation4 + $0xb8] sm:$0xf] %vm2827_vm0, %v2784_v48 }
 0x35d   : > { %v2782_v52 = vpop.permute.xlu0 %2781  ;;  %v2592_v53 = vpop.permute.xlu1 %2591 }
 0x35e   : > { %2841 = vst.msk [vmem:[#allocation4 + $0xb0] sm:$0xff] %vm2825_vm1, %v2782_v52  ;;  %v6630_v52 = vld [vmem:[#allocation4 + $0x20] sm:$0xff] }
 0x361   : > { %v2788_v55 = vpop.permute.xlu0 %2787  ;;  %v2690_v58 = vpop.permute.xlu1 %2689 }
 0x363   : > { %v8077_v5 = vld [vmem:[#allocation4 + $0xb8] sm:$0xff] }
 0x365   : > { %v2590_v59 = vpop.permute.xlu0 %2589  ;;  %v2492_v60 = vpop.permute.xlu1 %2491  ;;  %v8070_v61 = vld [vmem:[#allocation4 + $0xb0] sm:$0xff] }
 0x366   : > { %2549 = vst.msk [vmem:[#allocation4 + $0xc3] sm:$0xff] %vm2531_vm11, %v2492_v60  ;;  %6363 = vmatprep.mubr.msk.f32.mxu1 %vm2368_vm7, %v8070_v61  ;;  %6416 = vmatprep.mubr.msk.f32.mxu0 %vm2368_vm7, %v8070_v61  ;;  %v5652_v60 = vld [vmem:[%s8580_s3 + $0x88] sm:$0xff] }
 0x367   : > { %2648 = vst.msk [vmem:[#allocation4 + $0xca] sm:$0xf] %vm2631_vm12, %v2592_v53  ;;  %6364 = vmatmul.mubr.msk.f32.gmra.mxu1 %vm2368_vm7, %v8077_v5  ;;  %6417 = vmatmul.mubr.msk.f32.gmra.mxu0 %vm2368_vm7, %v8077_v5  ;;  %v8166_v53 = vld [vmem:[#allocation4 + $0x108] sm:$0xff] }
 0x368   : > { %2647 = vst.msk [vmem:[#allocation4 + $0xc2] sm:$0xff] %vm2629_vm13, %v2590_v59  ;;  %v6632_v59 = vld [vmem:[#allocation4 + $0x30] sm:$0xff] }
 0x369   : > { %2746 = vst.msk [vmem:[#allocation4 + $0xc9] sm:$0xf] %vm2729_vm14, %v2690_v58  ;;  %v6631_v58 = vld [vmem:[#allocation4 + $0x28] sm:$0xff] }
 0x36a   : > { %v2688_v6 = vpop.permute.xlu0 %2687  ;;  %v2498_v9 = vpop.permute.xlu1 %2497 }
 0x36b   : > { %2745 = vst.msk [vmem:[#allocation4 + $0xc1] sm:$0xff] %vm2727_vm15, %v2688_v6  ;;  %v6633_v6 = vld [vmem:[#allocation4 + $0x38] sm:$0xff] }
 0x36c   : > { %2552 = vst.msk [vmem:[#allocation4 + $0xdb] sm:$0xf] %vm2533_vm10, %v2498_v9  ;;  %v8198_v9 = vpop.f32.mrf.mxu1 }
 0x36d   : > { %2844 = vst.msk [vmem:[#allocation4 + $0xc8] sm:$0xf] %vm2827_vm0, %v2788_v55  ;;  %v5653_v55 = vld [vmem:[%s8580_s3 + $0x90] sm:$0xff] }
 0x36e   : > { %v2786_v10 = vpop.permute.xlu0 %2785  ;;  %v2596_v30 = vpop.permute.xlu1 %2595 }
 0x36f   : > { %2843 = vst.msk [vmem:[#allocation4 + $0xc0] sm:$0xff] %vm2825_vm1, %v2786_v10  ;;  %v8206_v10 = vpop.f32.mrf.mxu1 }
 0x372   : > { %v2792_v11 = vpop.permute.xlu0 %2791  ;;  %v2694_v15 = vpop.permute.xlu1 %2693 }
 0x374   : > { %v8097_v21 = vld [vmem:[#allocation4 + $0xc8] sm:$0xff] }
 0x376   : > { %v2594_v16 = vpop.permute.xlu0 %2593  ;;  %v2496_v18 = vpop.permute.xlu1 %2495  ;;  %v8090_v19 = vld [vmem:[#allocation4 + $0xc0] sm:$0xff] }
 0x377   : > { %2551 = vst.msk [vmem:[#allocation4 + $0xd3] sm:$0xff] %vm2531_vm11, %v2496_v18  ;;  %6366 = vmatprep.mubr.msk.f32.mxu1 %vm2368_vm7, %v8090_v19  ;;  %6419 = vmatprep.mubr.msk.f32.mxu0 %vm2368_vm7, %v8090_v19 }
 0x378   : > { %2650 = vst.msk [vmem:[#allocation4 + $0xda] sm:$0xf] %vm2631_vm12, %v2596_v30  ;;  %6367 = vmatmul.mubr.msk.f32.gmra.mxu1 %vm2368_vm7, %v8097_v21  ;;  %6420 = vmatmul.mubr.msk.f32.gmra.mxu0 %vm2368_vm7, %v8097_v21  ;;  %v3147_v30 = vpop.f32.mrf.mxu1 }
 0x379   : > { %2649 = vst.msk [vmem:[#allocation4 + $0xd2] sm:$0xff] %vm2629_vm13, %v2594_v16 }
 0x37a   : > { %2748 = vst.msk [vmem:[#allocation4 + $0xd9] sm:$0xf] %vm2729_vm14, %v2694_v15  ;;  %v2692_v54 = vpop.permute.xlu0 %2691  ;;  %v2502_v62 = vpop.permute.xlu1 %2501 }
 0x37b   : > { %2747 = vst.msk [vmem:[#allocation4 + $0xd1] sm:$0xff] %vm2727_vm15, %v2692_v54 }
 0x37c   : > { %2554 = vst.msk [vmem:[#allocation4 + $0xeb] sm:$0xf] %vm2533_vm10, %v2502_v62 }
 0x37d   : > { %2846 = vst.msk [vmem:[#allocation4 + $0xd8] sm:$0xf] %vm2827_vm0, %v2792_v11 }
 0x37e   : > { %v2790_v17 = vpop.permute.xlu0 %2789  ;;  %v2600_v22 = vpop.permute.xlu1 %2599 }
 0x37f   : > { %2845 = vst.msk [vmem:[#allocation4 + $0xd0] sm:$0xff] %vm2825_vm1, %v2790_v17 }
 0x382   : > { %v2796_v8 = vpop.permute.xlu0 %2795  ;;  %v2698_v0 = vpop.permute.xlu1 %2697 }
 0x384   : > { %v8117_v37 = vld [vmem:[#allocation4 + $0xd8] sm:$0xff] }
 0x386   : > { %v2598_v28 = vpop.permute.xlu0 %2597  ;;  %v2500_v36 = vpop.permute.xlu1 %2499  ;;  %v8110_v32 = vld [vmem:[#allocation4 + $0xd0] sm:$0xff] }
 0x387   : > { %2553 = vst.msk [vmem:[#allocation4 + $0xe3] sm:$0xff] %vm2531_vm11, %v2500_v36  ;;  %6369 = vmatprep.mubr.msk.f32.mxu1 %vm2368_vm7, %v8110_v32  ;;  %6422 = vmatprep.mubr.msk.f32.mxu0 %vm2368_vm7, %v8110_v32 }
 0x388   : > { %2652 = vst.msk [vmem:[#allocation4 + $0xea] sm:$0xf] %vm2631_vm12, %v2600_v22  ;;  %6370 = vmatmul.mubr.msk.f32.gmra.mxu1 %vm2368_vm7, %v8117_v37  ;;  %6423 = vmatmul.mubr.msk.f32.gmra.mxu0 %vm2368_vm7, %v8117_v37 }
 0x389   : > { %2651 = vst.msk [vmem:[#allocation4 + $0xe2] sm:$0xff] %vm2629_vm13, %v2598_v28 }
 0x38a   : > { %2750 = vst.msk [vmem:[#allocation4 + $0xe9] sm:$0xf] %vm2729_vm14, %v2698_v0  ;;  %v2696_v38 = vpop.permute.xlu0 %2695  ;;  %v2506_v39 = vpop.permute.xlu1 %2505 }
 0x38b   : > { %2749 = vst.msk [vmem:[#allocation4 + $0xe1] sm:$0xff] %vm2727_vm15, %v2696_v38 }
 0x38c   : > { %2556 = vst.msk [vmem:[#allocation4 + $0xfb] sm:$0xf] %vm2533_vm10, %v2506_v39 }
 0x38d   : > { %2848 = vst.msk [vmem:[#allocation4 + $0xe8] sm:$0xf] %vm2827_vm0, %v2796_v8 }
 0x38e   : > { %v2794_v40 = vpop.permute.xlu0 %2793  ;;  %v2604_v42 = vpop.permute.xlu1 %2603 }
 0x38f   : > { %2847 = vst.msk [vmem:[#allocation4 + $0xe0] sm:$0xff] %vm2825_vm1, %v2794_v40  ;;  %v3829_v40 = vld [vmem:[#allocation4 + $0x110] sm:$0xff] }
 0x392   : > { %v2702_v43 = vpop.permute.xlu1 %2701  ;;  %v2602_v44 = vpop.permute.xlu0 %2601 }
 0x394   : > { %v8137_v48 = vld [vmem:[#allocation4 + $0xe8] sm:$0xff] }
 0x396   : > { %v2700_v45 = vpop.permute.xlu0 %2699  ;;  %v2504_v46 = vpop.permute.xlu1 %2503  ;;  %v8130_v47 = vld [vmem:[#allocation4 + $0xe0] sm:$0xff] }
 0x397   : > { %2555 = vst.msk [vmem:[#allocation4 + $0xf3] sm:$0xff] %vm2531_vm11, %v2504_v46  ;;  %6372 = vmatprep.mubr.msk.f32.mxu1 %vm2368_vm7, %v8130_v47  ;;  %6425 = vmatprep.mubr.msk.f32.mxu0 %vm2368_vm7, %v8130_v47  ;;  %v4288_v46 = vld [vmem:[#allocation4 + $0x128] sm:$0xff] }
 0x398   : > { %2653 = vst.msk [vmem:[#allocation4 + $0xf2] sm:$0xff] %vm2629_vm13, %v2602_v44  ;;  %6373 = vmatmul.mubr.msk.f32.gmra.mxu1 %vm2368_vm7, %v8137_v48  ;;  %6426 = vmatmul.mubr.msk.f32.gmra.mxu0 %vm2368_vm7, %v8137_v48  ;;  %v4714_v44 = vld [vmem:[#allocation4 + $0x40] sm:$0xff] }
 0x399   : > { %2654 = vst.msk [vmem:[#allocation4 + $0xfa] sm:$0xf] %vm2631_vm12, %v2604_v42  ;;  %v3830_v42 = vld [vmem:[#allocation4 + $0x118] sm:$0xff] }
 0x39a   : > { %2752 = vst.msk [vmem:[#allocation4 + $0xf9] sm:$0xf] %vm2729_vm14, %v2702_v43  ;;  %v2798_v49 = vpop.permute.xlu0 %2797  ;;  %v2800_v3 = vpop.permute.xlu1 %2799  ;;  %v4287_v43 = vld [vmem:[#allocation4 + $0x120] sm:$0xff] }
 0x39b   : > { %2751 = vst.msk [vmem:[#allocation4 + $0xf1] sm:$0xff] %vm2727_vm15, %v2700_v45 }
 0x39c   : > { %2849 = vst.msk [vmem:[#allocation4 + $0xf0] sm:$0xff] %vm2825_vm1, %v2798_v49 }
 0x39d   : > { %2850 = vst.msk [vmem:[#allocation4 + $0xf8] sm:$0xf] %vm2827_vm0, %v2800_v3  ;;  %v4715_v3 = vld [vmem:[#allocation4 + $0x48] sm:$0xff] }
 0x3a3   : > { %v8149_v4 = vld [vmem:[#allocation4 + $0xf0] sm:$0xff] }
 0x3a4   : > { %v8151_v34 = vld [vmem:[#allocation4 + $0xf8] sm:$0xff]  ;;  %6375 = vmatprep.mubr.msk.f32.mxu1 %vm2368_vm7, %v8149_v4  ;;  %6428 = vmatprep.mubr.msk.f32.mxu0 %vm2368_vm7, %v8149_v4 }
 0x3a5   : > { %6376 = vmatmul.mubr.msk.f32.gmra.mxu1 %vm2368_vm7, %v8151_v34  ;;  %6429 = vmatmul.mubr.msk.f32.gmra.mxu0 %vm2368_vm7, %v8151_v34 }
 0x3a6   : > { %6431 = vmatprep.mubr.msk.f32.mxu0 %vm2368_vm7, %v8153_v51  ;;  %6442 = vmatprep.mubr.msk.f32.mxu1 %vm2368_vm7, %v6630_v52 }
 0x3a9   : > { %6432 = vmatmul.mubr.msk.f32.gmra.mxu0 %vm2368_vm7, %v8166_v53  ;;  %6443 = vmatmul.mubr.msk.f32.vlgmr.msra.gmra.mxu1 %vm2368_vm7, %v6631_v58 }
 0x3aa   : > { %6547 = vmatpush3.msk.msra.mxu1 %vm3047_vm8, %v7971_v2  ;;  %6445 = vmatprep.mubr.msk.f32.mxu1 %vm2368_vm7, %v6632_v59  ;;  %v5651_v2 = vld [vmem:[%s8580_s3 + $0x80] sm:$0xff] }
 0x3ab   : > { %6498 = vmatprep.mubr.msk.f32.mxu0 %vm2368_vm7, %v6632_v59  ;;  %6548 = vmatprep.subr.mxu1 %v5653_v55 }
 0x3ac   : > { %6549 = vmatpush3.msra.mxu1 %v5653_v55 }
 0x3ad   : > { %6446 = vmatmul.mubr.msk.f32.gmra.mxu1 %vm2368_vm7, %v6633_v6  ;;  %6499 = vmatmul.mubr.msk.f32.vlgmr.msra.gmra.mxu0 %vm2368_vm7, %v6633_v6 }
 0x3ae   : > { %6448 = vmatprep.mubr.msk.f32.mxu1 %vm2368_vm7, %v7836_v13  ;;  %6501 = vmatprep.mubr.msk.f32.mxu0 %vm2368_vm7, %v7836_v13  ;;  %v8200_v13 = vpop.f32.mrf.mxu0 }
 0x3af   : > { %6550 = vmatprep.subr.mxu1 %v5652_v60 }
 0x3b0   : > { %6551 = vmatpush3.msra.mxu1 %v5652_v60 }
 0x3b1   : > { %6449 = vmatmul.mubr.msk.f32.gmra.mxu1 %vm2368_vm7, %v7843_v35  ;;  %6502 = vmatmul.mubr.msk.f32.gmra.mxu0 %vm2368_vm7, %v7843_v35 }
 0x3b2   : > { %6451 = vmatprep.mubr.msk.f32.mxu1 %vm2368_vm7, %v7875_v27  ;;  %6504 = vmatprep.mubr.msk.f32.mxu0 %vm2368_vm7, %v7875_v27 }
 0x3b3   : > { %6552 = vmatprep.subr.mxu1 %v5651_v2 }
 0x3b4   : > { %6553 = vmatpush3.msra.mxu1 %v5651_v2 }
 0x3b5   : > { %6452 = vmatmul.mubr.msk.f32.gmra.mxu1 %vm2368_vm7, %v7882_v29  ;;  %6505 = vmatmul.mubr.msk.f32.gmra.mxu0 %vm2368_vm7, %v7882_v29 }
 0x3b6   : > { %6454 = vmatprep.mubr.msk.f32.mxu1 %vm2368_vm7, %v7914_v12  ;;  %6507 = vmatprep.mubr.msk.f32.mxu0 %vm2368_vm7, %v7914_v12 }
 0x3b7   : > { %v8212_v35 = vpop.f32.mrf.mxu0  ;;  %v6344_v16 = vpop.f32.mrf.mxu1 }
 0x3b9   : > { %6455 = vmatmul.mubr.msk.f32.gmra.mxu1 %vm2368_vm7, %v7921_v14  ;;  %6508 = vmatmul.mubr.msk.f32.gmra.mxu0 %vm2368_vm7, %v7921_v14  ;;  %v3605_v11 = vpop.f32.mrf.mxu0  ;;  %v3157_v62 = vpop.f32.mrf.mxu1 }
 0x3ba   : > { %6457 = vmatprep.mubr.msk.f32.mxu1 %vm2368_vm7, %v7956_v41  ;;  %6510 = vmatprep.mubr.msk.f32.mxu0 %vm2368_vm7, %v7956_v41  ;;  %v8222_v15 = vadd.f32 %v3605_v11, %v3147_v30 }
 0x3bd   : > { %6458 = vmatmul.mubr.msk.f32.gmra.mxu1 %vm2368_vm7, %v7964_v63  ;;  %6511 = vmatmul.mubr.msk.f32.gmra.mxu0 %vm2368_vm7, %v7964_v63 }
 0x3be   : > { %6460 = vmatprep.mubr.msk.f32.mxu1 %vm2368_vm7, %v8006_v23  ;;  %6513 = vmatprep.mubr.msk.f32.mxu0 %vm2368_vm7, %v8006_v23 }
 0x3c1   : > { %6461 = vmatmul.mubr.msk.f32.gmra.mxu1 %vm2368_vm7, %v8015_v25  ;;  %6514 = vmatmul.mubr.msk.f32.gmra.mxu0 %vm2368_vm7, %v8015_v25 }
 0x3c2   : > { %6463 = vmatprep.mubr.msk.f32.mxu1 %vm2368_vm7, %v8030_v26  ;;  %6516 = vmatprep.mubr.msk.f32.mxu0 %vm2368_vm7, %v8030_v26 }
 0x3c5   : > { %6464 = vmatmul.mubr.msk.f32.gmra.mxu1 %vm2368_vm7, %v8037_v57  ;;  %6517 = vmatmul.mubr.msk.f32.gmra.mxu0 %vm2368_vm7, %v8037_v57 }
 0x3c6   : > { %6466 = vmatprep.mubr.msk.f32.mxu1 %vm2368_vm7, %v8050_v20  ;;  %6519 = vmatprep.mubr.msk.f32.mxu0 %vm2368_vm7, %v8050_v20 }
 0x3c7   : > { %v6400_v18 = vpop.f32.mrf.mxu0  ;;  %v6347_v8 = vpop.f32.mrf.mxu1 }
 0x3c8   : > { %v8248_v54 = vadd.f32 %v6400_v18, %v6344_v16 }
 0x3c9   : > { %6467 = vmatmul.mubr.msk.f32.gmra.mxu1 %vm2368_vm7, %v8057_v33  ;;  %6520 = vmatmul.mubr.msk.f32.gmra.mxu0 %vm2368_vm7, %v8057_v33  ;;  %v3615_v17 = vpop.f32.mrf.mxu0  ;;  %v3167_v36 = vpop.f32.mrf.mxu1 }
 0x3ca   : > { %6469 = vmatprep.mubr.msk.f32.mxu1 %vm2368_vm7, %v8070_v61  ;;  %6522 = vmatprep.mubr.msk.f32.mxu0 %vm2368_vm7, %v8070_v61  ;;  %v8258_v22 = vadd.f32 %v3615_v17, %v3157_v62 }
 0x3cd   : > { %6470 = vmatmul.mubr.msk.f32.gmra.mxu1 %vm2368_vm7, %v8077_v5  ;;  %6523 = vmatmul.mubr.msk.f32.gmra.mxu0 %vm2368_vm7, %v8077_v5 }
 0x3ce   : > { %6472 = vmatprep.mubr.msk.f32.mxu1 %vm2368_vm7, %v8090_v19  ;;  %6525 = vmatprep.mubr.msk.f32.mxu0 %vm2368_vm7, %v8090_v19 }
 0x3d1   : > { %6473 = vmatmul.mubr.msk.f32.gmra.mxu1 %vm2368_vm7, %v8097_v21  ;;  %6526 = vmatmul.mubr.msk.f32.gmra.mxu0 %vm2368_vm7, %v8097_v21 }
 0x3d2   : > { %6475 = vmatprep.mubr.msk.f32.mxu1 %vm2368_vm7, %v8110_v32  ;;  %6528 = vmatprep.mubr.msk.f32.mxu0 %vm2368_vm7, %v8110_v32 }
 0x3d5   : > { %6476 = vmatmul.mubr.msk.f32.gmra.mxu1 %vm2368_vm7, %v8117_v37  ;;  %6529 = vmatmul.mubr.msk.f32.gmra.mxu0 %vm2368_vm7, %v8117_v37 }
 0x3d6   : > { %6478 = vmatprep.mubr.msk.f32.mxu1 %vm2368_vm7, %v8130_v47  ;;  %6531 = vmatprep.mubr.msk.f32.mxu0 %vm2368_vm7, %v8130_v47 }
 0x3d7   : > { %v6403_v0 = vpop.f32.mrf.mxu0  ;;  %v6350_v45 = vpop.f32.mrf.mxu1 }
 0x3d8   : > { %v8284_v28 = vadd.f32 %v6403_v0, %v6347_v8 }
 0x3d9   : > { %6479 = vmatmul.mubr.msk.f32.gmra.mxu1 %vm2368_vm7, %v8137_v48  ;;  %6532 = vmatmul.mubr.msk.f32.gmra.mxu0 %vm2368_vm7, %v8137_v48  ;;  %v3625_v38 = vpop.f32.mrf.mxu0  ;;  %v3177_v55 = vpop.f32.mrf.mxu1 }
 0x3da   : > { %6481 = vmatprep.mubr.msk.f32.mxu1 %vm2368_vm7, %v8149_v4  ;;  %6534 = vmatprep.mubr.msk.f32.mxu0 %vm2368_vm7, %v8149_v4  ;;  %v8294_v39 = vadd.f32 %v3625_v38, %v3167_v36 }
 0x3dd   : > { %6482 = vmatmul.mubr.msk.f32.gmra.mxu1 %vm2368_vm7, %v8151_v34  ;;  %6535 = vmatmul.mubr.msk.f32.gmra.mxu0 %vm2368_vm7, %v8151_v34 }
 0x3de   : > { %6484 = vmatprep.mubr.msk.f32.mxu1 %vm2368_vm7, %v8153_v51  ;;  %6537 = vmatprep.mubr.msk.f32.mxu0 %vm2368_vm7, %v8153_v51 }
 0x3e1   : > { %6485 = vmatmul.mubr.msk.f32.gmra.mxu1 %vm2368_vm7, %v8166_v53  ;;  %6538 = vmatmul.mubr.msk.f32.gmra.mxu0 %vm2368_vm7, %v8166_v53 }
 0x3e2   : > { %6487 = vmatprep.mubr.msk.f32.mxu1 %vm2368_vm7, %v3829_v40  ;;  %6540 = vmatprep.mubr.msk.f32.mxu0 %vm2368_vm7, %v3829_v40 }
 0x3e5   : > { %6488 = vmatmul.mubr.msk.f32.gmra.mxu1 %vm2368_vm7, %v3830_v42  ;;  %6541 = vmatmul.mubr.msk.f32.gmra.mxu0 %vm2368_vm7, %v3830_v42 }
 0x3e6   : > { %6554 = vmatprep.mubr.msk.f32.mxu1 %vm2368_vm7, %v4714_v44  ;;  %6543 = vmatprep.mubr.msk.f32.mxu0 %vm2368_vm7, %v4287_v43 }
 0x3e7   : > { %v6406_v49 = vpop.f32.mrf.mxu0  ;;  %v6353_v60 = vpop.f32.mrf.mxu1 }
 0x3e8   : > { %v8314_v52 = vadd.f32 %v6406_v49, %v6350_v45 }
 0x3e9   : > { %6544 = vmatmul.mubr.msk.f32.gmra.mxu0 %vm2368_vm7, %v4288_v46  ;;  %6555 = vmatmul.mubr.msk.f32.vlgmr.msra.gmra.mxu1 %vm2368_vm7, %v4715_v3  ;;  %v3635_v58 = vpop.f32.mrf.mxu0 }
 0x3ea   : > { %6557 = vmatprep.mubr.msk.f32.mxu1 %vm2368_vm7, %v7875_v27  ;;  %v8320_v59 = vadd.f32 %v3635_v58, %v3177_v55 }
 0x3ed   : > { %6558 = vmatmul.mubr.msk.f32.gmra.mxu1 %vm2368_vm7, %v7882_v29  ;;  %v3187_v29 = vpop.f32.mrf.mxu1 }
 0x3ee   : > { %6560 = vmatprep.mubr.msk.f32.mxu1 %vm2368_vm7, %v7914_v12 }
 0x3f1   : > { %6561 = vmatmul.mubr.msk.f32.gmra.mxu1 %vm2368_vm7, %v7921_v14 }
 0x3f2   : > { %6563 = vmatprep.mubr.msk.f32.mxu1 %vm2368_vm7, %v7956_v41 }
 0x3f5   : > { %6564 = vmatmul.mubr.msk.f32.gmra.mxu1 %vm2368_vm7, %v7964_v63 }
 0x3f6   : > { %6566 = vmatprep.mubr.msk.f32.mxu1 %vm2368_vm7, %v8006_v23 }
 0x3f7   : > { %v6409_v27 = vpop.f32.mrf.mxu0  ;;  %v6356_v41 = vpop.f32.mrf.mxu1 }
 0x3f8   : > { %v8334_v6 = vadd.f32 %v6409_v27, %v6353_v60 }
 0x3f9   : > { %6567 = vmatmul.mubr.msk.f32.gmra.mxu1 %vm2368_vm7, %v8015_v25  ;;  %v3645_v12 = vpop.f32.mrf.mxu0  ;;  %v8368_v25 = vpop.f32.mrf.mxu1 }
 0x3fa   : > { %6569 = vmatprep.mubr.msk.f32.mxu1 %vm2368_vm7, %v8030_v26  ;;  %v8340_v14 = vadd.f32 %v3645_v12, %v3187_v29 }
 0x3fd   : > { %6570 = vmatmul.mubr.msk.f32.gmra.mxu1 %vm2368_vm7, %v8037_v57 }
 0x3fe   : > { %6572 = vmatprep.mubr.msk.f32.mxu1 %vm2368_vm7, %v8050_v20 }
 0x401   : > { %6573 = vmatmul.mubr.msk.f32.gmra.mxu1 %vm2368_vm7, %v8057_v33 }
 0x402   : > { %6575 = vmatprep.mubr.msk.f32.mxu1 %vm2368_vm7, %v8070_v61 }
 0x405   : > { %6576 = vmatmul.mubr.msk.f32.gmra.mxu1 %vm2368_vm7, %v8077_v5 }
 0x406   : > { %6578 = vmatprep.mubr.msk.f32.mxu1 %vm2368_vm7, %v8090_v19 }
 0x407   : > { %v6412_v63 = vpop.f32.mrf.mxu0  ;;  %v6359_v26 = vpop.f32.mrf.mxu1 }
 0x408   : > { %v8354_v23 = vadd.f32 %v6412_v63, %v6356_v41 }
 0x409   : > { %6579 = vmatmul.mubr.msk.f32.gmra.mxu1 %vm2368_vm7, %v8097_v21  ;;  %v8372_v57 = vpop.f32.mrf.mxu0  ;;  %v3207_v61 = vpop.f32.mrf.mxu1  ;;  %v4744_v21 = vld [vmem:[#allocation4 + $0x130] sm:$0xff] }
 0x40a   : > { %6581 = vmatprep.mubr.msk.f32.mxu1 %vm2368_vm7, %v8110_v32  ;;  %v4745_v32 = vld [vmem:[#allocation4 + $0x138] sm:$0xff] }
 0x40d   : > { %6582 = vmatmul.mubr.msk.f32.gmra.mxu1 %vm2368_vm7, %v8117_v37  ;;  %v6651_v37 = vmov 0  }
 0x40e   : > { %6584 = vmatprep.mubr.msk.f32.mxu1 %vm2368_vm7, %v8130_v47  ;;  %6628 = vset.pattern.permute.xlu1 %v6651_v37  ;;  %v5267_v47 = vld [vmem:[%s8581_s4] sm:$0x7] }
 0x40f   : > { %5270 = vperm.xlu1 %6628, %v5267_v47  }
 0x411   : > { %6585 = vmatmul.mubr.msk.f32.gmra.mxu1 %vm2368_vm7, %v8137_v48 }
 0x412   : > { %6587 = vmatprep.mubr.msk.f32.mxu1 %vm2368_vm7, %v8149_v4 }
 0x415   : > { %6588 = vmatmul.mubr.msk.f32.gmra.mxu1 %vm2368_vm7, %v8151_v34 }
 0x416   : > { %6590 = vmatprep.mubr.msk.f32.mxu1 %vm2368_vm7, %v8153_v51 }
 0x417   : > { %v6415_v20 = vpop.f32.mrf.mxu0  ;;  %v6362_v48 = vpop.f32.mrf.mxu1 }
 0x418   : > { %v8376_v33 = vadd.f32 %v6415_v20, %v6359_v26 }
 0x419   : > { %6591 = vmatmul.mubr.msk.f32.gmra.mxu1 %vm2368_vm7, %v8166_v53  ;;  %v3665_v5 = vpop.f32.mrf.mxu0  ;;  %v3217_v51 = vpop.f32.mrf.mxu1 }
 0x41a   : > { %6593 = vmatprep.mubr.msk.f32.mxu1 %vm2368_vm7, %v3829_v40  ;;  %v8381_v19 = vadd.f32 %v3665_v5, %v3207_v61 }
 0x41d   : > { %6594 = vmatmul.mubr.msk.f32.gmra.mxu1 %vm2368_vm7, %v3830_v42 }
 0x41e   : > { %6596 = vmatprep.mubr.msk.f32.mxu1 %vm2368_vm7, %v4287_v43 }
 0x421   : > { %6597 = vmatmul.mubr.msk.f32.gmra.mxu1 %vm2368_vm7, %v4288_v46 }
 0x422   : > { %6599 = vmatprep.mubr.msk.f32.mxu1 %vm2368_vm7, %v4744_v21 }
 0x425   : > { %6600 = vmatmul.mubr.msk.f32.gmra.mxu1 %vm2368_vm7, %v4745_v32 }
 0x427   : > { %v6418_v4 = vpop.f32.mrf.mxu0  ;;  %v6365_v30 = vpop.f32.mrf.mxu1 }
 0x428   : > { %v8392_v34 = vadd.f32 %v6418_v4, %v6362_v48 }
 0x429   : > { %v3675_v53 = vpop.f32.mrf.mxu0  ;;  %v3227_v18 = vpop.f32.mrf.mxu1 }
 0x42a   : > { %v8394_v2 = vadd.f32 %v3675_v53, %v3217_v51 }
 0x438   : > { %v6421_v11 = vpop.f32.mrf.mxu0  ;;  %v6368_v8 = vpop.f32.mrf.mxu1 }
 0x439   : > { %v8396_v16 = vadd.f32 %v6421_v11, %v6365_v30  ;;  %v3738_v11 = vadd.f32 %v8200_v13, %v8198_v9 }
 0x43a   : > { %v3685_v62 = vpop.f32.mrf.mxu0  ;;  %v3237_v38 = vpop.f32.mrf.mxu1 }
 0x43b   : > { %v8398_v17 = vadd.f32 %v3685_v62, %v3227_v18  ;;  %v3741_v62 = vadd.f32 %v8212_v35, %v8206_v10 }
 0x448   : > { %v6424_v0 = vpop.f32.mrf.mxu0  ;;  %v6371_v43 = vpop.f32.mrf.mxu1 }
 0x449   : > { %v8400_v36 = vadd.f32 %v6424_v0, %v6368_v8 }
 0x44a   : > { %v3695_v40 = vpop.f32.mrf.mxu0  ;;  %v3247_v46 = vpop.f32.mrf.mxu1 }
 0x44b   : > { %v8402_v42 = vadd.f32 %v3695_v40, %v3237_v38 }
 0x458   : > { %v6427_v44 = vpop.f32.mrf.mxu0  ;;  %v6374_v55 = vpop.f32.mrf.mxu1 }
 0x459   : > { %v8404_v45 = vadd.f32 %v6427_v44, %v6371_v43 }
 0x45a   : > { %v3705_v49 = vpop.f32.mrf.mxu0  ;;  %v3257_v58 = vpop.f32.mrf.mxu1 }
 0x45b   : > { %v8406_v3 = vadd.f32 %v3705_v49, %v3247_v46 }
 0x465   : > { %v6377_v60 = vpop.f32.mrf.mxu1  ;;  %v6430_v27 = vpop.f32.mrf.mxu0 }
 0x466   : > { %v8408_v29 = vadd.f32 %v6430_v27, %v6374_v55 }
 0x467   : > { %v3267_v12 = vpop.f32.mrf.mxu1  ;;  %v3715_v41 = vpop.f32.mrf.mxu0 }
 0x468   : > { %v8410_v63 = vadd.f32 %v3715_v41, %v3257_v58 }
 0x469   : > { %v6433_v26 = vpop.f32.mrf.mxu0  ;;  %v6444_v20 = vpop.f32.mrf.mxu1 }
 0x46a   : > { %v8412_v61 = vadd.f32 %v6433_v26, %v6377_v60  ;;  %v8415_v5 = vadd.f32 %v6444_v20, %v8000_v56 }
 0x46b   : > { %v3725_v21 = vpop.f32.mrf.mxu0  ;;  %v8417_v32 = vpop.f32.mrf.mxu1 }
 0x46c   : > { %v8419_v47 = vadd.f32 %v3725_v21, %v3267_v12 }
 0x46d   : > { %v6447_v48 = vpop.f32.mrf.mxu1  ;;  %v6500_v49 = vpop.f32.mrf.mxu0 }
 0x46e   : > { %v8422_v4 = vadd.f32 %v6447_v48, %v8004_v7 }
 0x46f   : > { %v4043_v51 = vpop.f32.mrf.mxu1  ;;  %v4491_v60 = vpop.f32.mrf.mxu0 }
 0x470   : > { %v8425_v53 = vadd.f32 %v4043_v51, %v8008_v24 }
 0x471   : > { %v6450_v30 = vpop.f32.mrf.mxu1 }
 0x472   : > { %v8430_v56 = vadd.f32 %v6450_v30, %v8023_v31 }
 0x473   : > { %v4053_v18 = vpop.f32.mrf.mxu1 }
 0x474   : > { %v8434_v8 = vadd.f32 %v4053_v18, %v3738_v11 }
 0x475   : > { %v6453_v0 = vpop.f32.mrf.mxu1 }
 0x476   : > { %v8436_v7 = vadd.f32 %v6453_v0, %v3741_v62 }
 0x477   : > { %v4063_v38 = vpop.f32.mrf.mxu1 }
 0x478   : > { %v8439_v24 = vadd.f32 %v4063_v38, %v8222_v15 }
 0x479   : > { %v6456_v40 = vpop.f32.mrf.mxu1 }
 0x47a   : > { %v8442_v43 = vadd.f32 %v6456_v40, %v8248_v54 }
 0x47b   : > { %v4073_v9 = vpop.f32.mrf.mxu1 }
 0x47c   : > { %v8445_v31 = vadd.f32 %v4073_v9, %v8258_v22 }
 0x47d   : > { %v6459_v13 = vpop.f32.mrf.mxu1 }
 0x47e   : > { %v8448_v10 = vadd.f32 %v6459_v13, %v8284_v28 }
 0x47f   : > { %v4083_v35 = vpop.f32.mrf.mxu1 }
 0x480   : > { %v8451_v44 = vadd.f32 %v4083_v35, %v8294_v39 }
 0x481   : > { %v6462_v46 = vpop.f32.mrf.mxu1 }
 0x482   : > { %v8454_v15 = vadd.f32 %v6462_v46, %v8314_v52  ;;  %v6503_v52 = vpop.f32.mrf.mxu0 }
 0x483   : > { %v4093_v55 = vpop.f32.mrf.mxu1 }
 0x484   : > { %v8457_v54 = vadd.f32 %v4093_v55, %v8320_v59  ;;  %v4501_v20 = vpop.f32.mrf.mxu0 }
 0x485   : > { %v6465_v58 = vpop.f32.mrf.mxu1 }
 0x486   : > { %v8460_v22 = vadd.f32 %v6465_v58, %v8334_v6  ;;  %v6506_v51 = vpop.f32.mrf.mxu0 }
 0x487   : > { %v4103_v28 = vpop.f32.mrf.mxu1 }
 0x488   : > { %v8463_v27 = vadd.f32 %v4103_v28, %v8340_v14 }
 0x489   : > { %v6468_v39 = vpop.f32.mrf.mxu1 }
 0x48a   : > { %v8466_v12 = vadd.f32 %v6468_v39, %v8354_v23 }
 0x48b   : > { %v8468_v41 = vpop.f32.mrf.mxu1 }
 0x48d   : > { %v6471_v26 = vpop.f32.mrf.mxu1 }
 0x48e   : > { %v8471_v59 = vadd.f32 %v6471_v26, %v8376_v33  ;;  %v4511_v33 = vpop.f32.mrf.mxu0 }
 0x48f   : > { %v4123_v21 = vpop.f32.mrf.mxu1 }
 0x490   : > { %v8474_v6 = vadd.f32 %v4123_v21, %v8381_v19 }
 0x491   : > { %v6474_v48 = vpop.f32.mrf.mxu1 }
 0x492   : > { %v8477_v14 = vadd.f32 %v6474_v48, %v8392_v34  ;;  %v8491_v34 = vpop.f32.mrf.mxu0 }
 0x493   : > { %v4133_v30 = vpop.f32.mrf.mxu1 }
 0x494   : > { %v8480_v23 = vadd.f32 %v4133_v30, %v8394_v2 }
 0x495   : > { %v6477_v11 = vpop.f32.mrf.mxu1 }
 0x496   : > { %v8483_v18 = vadd.f32 %v6477_v11, %v8396_v16  ;;  %v4521_v16 = vpop.f32.mrf.mxu0 }
 0x497   : > { %v4143_v62 = vpop.f32.mrf.mxu1 }
 0x498   : > { %v8486_v0 = vadd.f32 %v4143_v62, %v8398_v17 }
 0x499   : > { %v6480_v19 = vpop.f32.mrf.mxu1 }
 0x49a   : > { %v8489_v38 = vadd.f32 %v6480_v19, %v8400_v36  ;;  %v8505_v36 = vpop.f32.mrf.mxu0 }
 0x49b   : > { %v4153_v40 = vpop.f32.mrf.mxu1 }
 0x49c   : > { %v8494_v9 = vadd.f32 %v4153_v40, %v8402_v42  ;;  %v4531_v26 = vpop.f32.mrf.mxu0  ;;  %v4651_v40 = vadd.f32 %v6500_v49, %v8415_v5  ;;  %v4654_v49 = vadd.f32 %v4511_v33, %v8434_v8 }
 0x49d   : > { %v6483_v2 = vpop.f32.mrf.mxu1 }
 0x49e   : > { %v8497_v13 = vadd.f32 %v6483_v2, %v8404_v45  ;;  %v3734_v45 = vadd.f32 %v8002_v50, %v7966_v1  ;;  %v8519_v11 = vpop.f32.mrf.mxu0 }
 0x49f   : > { %v4163_v35 = vpop.f32.mrf.mxu1 }
 0x4a0   : > { %v8500_v46 = vadd.f32 %v4163_v35, %v8406_v3  ;;  %v4192_v21 = vadd.f32 %v8417_v32, %v3734_v45  ;;  %v4541_v1 = vpop.f32.mrf.mxu0  ;;  %v4652_v35 = vadd.f32 %v4501_v20, %v8425_v53 }
 0x4a1   : > { %v6486_v17 = vpop.f32.mrf.mxu1 }
 0x4a2   : > { %v8503_v55 = vadd.f32 %v6486_v17, %v8408_v29  ;;  %v4650_v30 = vadd.f32 %v4491_v60, %v4192_v21  ;;  %v8523_v32 = vpop.f32.mrf.mxu0 }
 0x4a3   : > { %v4173_v58 = vpop.f32.mrf.mxu1 }
 0x4a4   : > { %v8508_v28 = vadd.f32 %v4173_v58, %v8410_v63  ;;  %v4653_v58 = vadd.f32 %v6503_v52, %v8422_v4 }
 0x4a5   : > { %v6489_v42 = vpop.f32.mrf.mxu1 }
 0x4a6   : > { %v8513_v39 = vadd.f32 %v6489_v42, %v8412_v61  ;;  %v4551_v42 = vpop.f32.mrf.mxu0 }
 0x4a7   : > { %v4183_v3 = vpop.f32.mrf.mxu1 }
 0x4a8   : > { %v8517_v29 = vadd.f32 %v4183_v3, %v8419_v47  ;;  %v8527_v21 = vpop.f32.mrf.mxu0 }
 0x4a9   : > { %v6556_v48 = vpop.f32.mrf.mxu1 }
 0x4aa   : > { %v5108_v61 = vadd.f32 %v6556_v48, %v4651_v40  ;;  %v4656_v40 = vadd.f32 %v4521_v16, %v8439_v24  ;;  %v4658_v24 = vadd.f32 %v4531_v26, %v8445_v31  ;;  %v4660_v31 = vadd.f32 %v4541_v1, %v8451_v44 }
 0x4ab   : > { %v4948_v63 = vpop.f32.mrf.mxu1  ;;  %v4662_v44 = vadd.f32 %v4551_v42, %v8457_v54 }
 0x4ac   : > { %v5107_v62 = vadd.f32 %v4948_v63, %v4650_v30  ;;  %v4655_v30 = vadd.f32 %v6506_v51, %v8430_v56  ;;  %v8530_v63 = vpop.f32.mrf.mxu0  ;;  %v4657_v56 = vadd.f32 %v8491_v34, %v8436_v7 }
 0x4ad   : > { %v6559_v19 = vpop.f32.mrf.mxu1  ;;  %v4664_v54 = vadd.f32 %v8530_v63, %v8463_v27 }
 0x4ae   : > { %5203 = vxpose.xlu0.b32.start [1/16] (narrow) %v5107_v62, 8  ;;  %v5110_v3 = vadd.f32 %v6559_v19, %v4653_v58  ;;  %v6524_v19 = vpop.f32.mrf.mxu0 }
 0x4af   : > { %v4958_v50 = vpop.f32.mrf.mxu1 }
 0x4b0   : > { %v5109_v17 = vadd.f32 %v4958_v50, %v4652_v35  ;;  %v4571_v51 = vpop.f32.mrf.mxu0 }
 0x4b1   : > { %v6562_v2 = vpop.f32.mrf.mxu1 }
 0x4b2   : > { %5204 = vxpose.xlu0.b32.cont [2/16] (narrow) %v5108_v61, 8  ;;  %v5112_v4 = vadd.f32 %v6562_v2, %v4655_v30  ;;  %v3750_v61 = vadd.f32 %v8372_v57, %v8368_v25  ;;  %v6527_v58 = vpop.f32.mrf.mxu0  ;;  %v4659_v25 = vadd.f32 %v8505_v36, %v8442_v43  ;;  %v4667_v57 = vadd.f32 %v6524_v19, %v8466_v12 }
 0x4b3   : > { %v4968_v47 = vpop.f32.mrf.mxu1  ;;  %v4661_v43 = vadd.f32 %v8519_v11, %v8448_v10  ;;  %v4669_v12 = vadd.f32 %v6527_v58, %v8471_v59  ;;  %v4663_v10 = vadd.f32 %v8523_v32, %v8454_v15  ;;  %v4665_v15 = vadd.f32 %v8527_v21, %v8460_v22 }
 0x4b4   : > { %v5111_v53 = vadd.f32 %v4968_v47, %v4654_v49  ;;  %v4208_v2 = vadd.f32 %v8468_v41, %v3750_v61  ;;  %v4581_v7 = vpop.f32.mrf.mxu0 }
 0x4b5   : > { %v6565_v60 = vpop.f32.mrf.mxu1  ;;  %v4668_v26 = vadd.f32 %v4581_v7, %v8474_v6 }
 0x4b6   : > { %5205 = vxpose.xlu0.b32.cont [3/16] (narrow) %v5109_v17, 8  ;;  %v5114_v47 = vadd.f32 %v6565_v60, %v4657_v56  ;;  %v4666_v16 = vadd.f32 %v4571_v51, %v4208_v2 }
 0x4b7   : > { %v4978_v45 = vpop.f32.mrf.mxu1 }
 0x4b8   : > { %v5113_v8 = vadd.f32 %v4978_v45, %v4656_v40 }
 0x4b9   : > { %v6568_v5 = vpop.f32.mrf.mxu1 }
 0x4ba   : > { %5206 = vxpose.xlu0.b32.cont [4/16] (narrow) %v5110_v3, 8  ;;  %v5116_v41 = vadd.f32 %v6568_v5, %v4659_v25 }
 0x4bb   : > { %v4988_v48 = vpop.f32.mrf.mxu1 }
 0x4bc   : > { %v5115_v3 = vadd.f32 %v4988_v48, %v4658_v24  ;;  %v6530_v48 = vpop.f32.mrf.mxu0 }
 0x4bd   : > { %v6571_v20 = vpop.f32.mrf.mxu1  ;;  %v4671_v59 = vadd.f32 %v6530_v48, %v8477_v14 }
 0x4be   : > { %5207 = vxpose.xlu0.b32.cont [5/16] (narrow) %v5111_v53, 8  ;;  %v4591_v36 = vpop.f32.mrf.mxu0  ;;  %v5118_v5 = vadd.f32 %v6571_v20, %v4661_v43 }
 0x4bf   : > { %v4998_v62 = vpop.f32.mrf.mxu1  ;;  %v4670_v6 = vadd.f32 %v4591_v36, %v8480_v23 }
 0x4c0   : > { %v5117_v30 = vadd.f32 %v4998_v62, %v4660_v31  ;;  %v6533_v1 = vpop.f32.mrf.mxu0 }
 0x4c1   : > { %v6574_v52 = vpop.f32.mrf.mxu1  ;;  %v4673_v14 = vadd.f32 %v6533_v1, %v8483_v18 }
 0x4c2   : > { %5208 = vxpose.xlu0.b32.cont [6/16] (narrow) %v5112_v4, 8  ;;  %v4601_v11 = vpop.f32.mrf.mxu0  ;;  %v5120_v20 = vadd.f32 %v6574_v52, %v4663_v10 }
 0x4c3   : > { %v5008_v50 = vpop.f32.mrf.mxu1  ;;  %v4672_v23 = vadd.f32 %v4601_v11, %v8486_v0 }
 0x4c4   : > { %v5119_v62 = vadd.f32 %v5008_v50, %v4662_v44  ;;  %v6536_v42 = vpop.f32.mrf.mxu0 }
 0x4c5   : > { %v8533_v33 = vpop.f32.mrf.mxu1  ;;  %v4675_v58 = vadd.f32 %v6536_v42, %v8489_v38 }
 0x4c6   : > { %5209 = vxpose.xlu0.b32.cont [7/16] (narrow) %v5113_v8, 8  ;;  %v4611_v32 = vpop.f32.mrf.mxu0  ;;  %v5122_v52 = vadd.f32 %v8533_v33, %v4665_v15 }
 0x4c7   : > { %v5018_v35 = vpop.f32.mrf.mxu1  ;;  %v4674_v0 = vadd.f32 %v4611_v32, %v8494_v9 }
 0x4c8   : > { %v5121_v50 = vadd.f32 %v5018_v35, %v4664_v54  ;;  %v6539_v63 = vpop.f32.mrf.mxu0 }
 0x4c9   : > { %v6580_v17 = vpop.f32.mrf.mxu1 }
 0x4ca   : > { %5210 = vxpose.xlu0.b32.cont [8/16] (narrow) %v5114_v47, 8  ;;  %v5124_v34 = vadd.f32 %v6580_v17, %v4667_v57  ;;  %v4621_v22 = vpop.f32.mrf.mxu0 }
 0x4cb   : > { %v5028_v45 = vpop.f32.mrf.mxu1 }
 0x4cc   : > { %v5123_v49 = vadd.f32 %v5028_v45, %v4666_v16  ;;  %v4676_v45 = vadd.f32 %v4621_v22, %v8500_v46 }
 0x4cd   : > { %v6583_v53 = vpop.f32.mrf.mxu1 }
 0x4ce   : > { %5211 = vxpose.xlu0.b32.cont [9/16] (narrow) %v5115_v3, 8  ;;  %5235 = vxpose.xlu1.b32.start [1/16] (narrow) %v5123_v49, 8  ;;  %v5126_v19 = vadd.f32 %v6583_v53, %v4669_v12  ;;  %v6542_v3 = vpop.f32.mrf.mxu0  ;;  %v4677_v53 = vadd.f32 %v6539_v63, %v8497_v13 }
 0x4cf   : > { %v5038_v60 = vpop.f32.mrf.mxu1 }
 0x4d0   : > { %v5125_v4 = vadd.f32 %v5038_v60, %v4668_v26  ;;  %v4631_v9 = vpop.f32.mrf.mxu0  ;;  %v4679_v60 = vadd.f32 %v6542_v3, %v8503_v55 }
 0x4d1   : > { %v6586_v40 = vpop.f32.mrf.mxu1  ;;  %v4678_v7 = vadd.f32 %v4631_v9, %v8508_v28  ;;  %v5271_v28 = vpop.permute.xlu1 %5270 }
 0x4d2   : > { %5212 = vxpose.xlu0.b32.cont [10/16] (narrow) %v5116_v41, 8  ;;  %5236 = vxpose.xlu1.b32.cont [2/16] (narrow) %v5124_v34, 8  ;;  %v5128_v51 = vadd.f32 %v6586_v40, %v4671_v59  ;;  %v6545_v38 = vpop.f32.mrf.mxu0 }
 0x4d3   : > { %v5048_v8 = vpop.f32.mrf.mxu1 }
 0x4d4   : > { %v5127_v61 = vadd.f32 %v5048_v8, %v4670_v6  ;;  %v4641_v46 = vpop.f32.mrf.mxu0 }
 0x4d5   : > { %v6589_v56 = vpop.f32.mrf.mxu1  ;;  %v4680_v48 = vadd.f32 %v4641_v46, %v8517_v29 }
 0x4d6   : > { %5213 = vxpose.xlu0.b32.cont [11/16] (narrow) %v5117_v30, 8  ;;  %5237 = vxpose.xlu1.b32.cont [3/16] (narrow) %v5125_v4, 8  ;;  %v5130_v24 = vadd.f32 %v6589_v56, %v4673_v14  ;;  %v4681_v30 = vadd.f32 %v6545_v38, %v8513_v39 }
 0x4d7   : > { %v5058_v2 = vpop.f32.mrf.mxu1 }
 0x4d8   : > { %v5129_v47 = vadd.f32 %v5058_v2, %v4672_v23 }
 0x4d9   : > { %v6592_v17 = vpop.f32.mrf.mxu1 }
 0x4da   : > { %5214 = vxpose.xlu0.b32.cont [12/16] (narrow) %v5118_v5, 8  ;;  %5238 = vxpose.xlu1.b32.cont [4/16] (narrow) %v5126_v19, 8  ;;  %v5132_v21 = vadd.f32 %v6592_v17, %v4675_v58 }
 0x4db   : > { %v5068_v27 = vpop.f32.mrf.mxu1 }
 0x4dc   : > { %v5131_v35 = vadd.f32 %v5068_v27, %v4674_v0 }
 0x4dd   : > { %v6595_v16 = vpop.f32.mrf.mxu1 }
 0x4de   : > { %5215 = vxpose.xlu0.b32.cont [13/16] (narrow) %v5119_v62, 8  ;;  %5239 = vxpose.xlu1.b32.cont [5/16] (narrow) %v5127_v61, 8  ;;  %v5134_v25 = vadd.f32 %v6595_v16, %v4677_v53 }
 0x4df   : > { %v5078_v18 = vpop.f32.mrf.mxu1 }
 0x4e0   : > { %v5133_v33 = vadd.f32 %v5078_v18, %v4676_v45 }
 0x4e1   : > { %v6598_v49 = vpop.f32.mrf.mxu1 }
 0x4e2   : > { %5216 = vxpose.xlu0.b32.cont [14/16] (narrow) %v5120_v20, 8  ;;  %5240 = vxpose.xlu1.b32.cont [6/16] (narrow) %v5128_v51, 8  ;;  %v5136_v31 = vadd.f32 %v6598_v49, %v4679_v60 }
 0x4e3   : > { %v5088_v57 = vpop.f32.mrf.mxu1 }
 0x4e4   : > { %v5135_v41 = vadd.f32 %v5088_v57, %v4678_v7 }
 0x4e5   : > { %v6601_v34 = vpop.f32.mrf.mxu1 }
 0x4e6   : > { %5217 = vxpose.xlu0.b32.cont [15/16] (narrow) %v5121_v50, 8  ;;  %5241 = vxpose.xlu1.b32.cont [7/16] (narrow) %v5129_v47, 8  ;;  %v5138_v4 = vadd.f32 %v6601_v34, %v4681_v30 }
 0x4e7   : > { %v5098_v26 = vpop.f32.mrf.mxu1 }
 0x4e8   : > { %v5137_v13 = vadd.f32 %v5098_v26, %v4680_v48 }
 0x4ea   : > { %5218 = vxpose.xlu0.b32.end [16/16] (narrow) %v5122_v52, 8  ;;  %5242 = vxpose.xlu1.b32.cont [8/16] (narrow) %v5130_v24, 8 }
 0x4ee   : > { %5243 = vxpose.xlu1.b32.cont [9/16] (narrow) %v5131_v35, 8 }
 0x4f2   : > { %5244 = vxpose.xlu1.b32.cont [10/16] (narrow) %v5132_v21, 8 }
 0x4f6   : > { %5245 = vxpose.xlu1.b32.cont [11/16] (narrow) %v5133_v33, 8 }
 0x4fa   : > { %5246 = vxpose.xlu1.b32.cont [12/16] (narrow) %v5134_v25, 8 }
 0x4fe   : > { %5247 = vxpose.xlu1.b32.cont [13/16] (narrow) %v5135_v41, 8 }
 0x502   : > { %5248 = vxpose.xlu1.b32.cont [14/16] (narrow) %v5136_v31, 8 }
 0x506   : > { %5249 = vxpose.xlu1.b32.cont [15/16] (narrow) %v5137_v13, 8 }
 0x50a   : > { %5250 = vxpose.xlu1.b32.end [16/16] (narrow) %v5138_v4, 8 }
 0x513   : > { %6629 = vset.pattern.permute.xlu0 %v6651_v37 }
 0x52a   : > { %v5219_v40 = vpop.trf.xlu0 }
 0x52b   : > { %v5273_v43 = vadd.f32 %v5271_v28, %v5219_v40 }
 0x52d   : > { %v5275_v36 = vmax.f32 %v5273_v43, 0.0 }
 0x54a   : > { %v5251_v55 = vpop.trf.xlu1 }
 0x54b   : > { %v5274_v12 = vadd.f32 %v5271_v28, %v5251_v55 }
 0x54d   : > { %v5276_v5 = vmax.f32 %v5274_v12, 0.0 }
 0x54f   : > { %v5279_v29 = vcombine.low %v5275_v36, %v5276_v5 }
 0x551   : > { %5281 = vst [vmem:[%s224_s21] sm:$0x77] %v5279_v29 }
 0x552 PF: > { %s15_s18 = sadd.s32 1, %s6640_s18  }
 0x553   : > { %p12_p4 = scmp.ge.s32.totalorder %s15_s18, 4  }
 0x555   :  { %14 = sbr.rel (!%p12_p4) target bundleno = 1 (0x1), region = 86 }

</bundles_post_ra>
